<compile_context>
chip_gen: v6e
topology: v6e:2x2x1
jax: 0.10.0
libtpu: 0.0.40
codegen_flags: <defaults>
</compile_context>

<pallas_src>
import numpy as np
import jax
import jax.numpy as jnp
from jax.experimental import pallas as pl
from jax.experimental.pallas import tpu as pltpu

# ----------------------------- small config ---------------------------------
B = 2            # batch size (documents)
S = 8            # sentences per document (GRU sequence length)
L = 6            # tokens per sentence (BERT stub)
D = 32           # config.hidden_size (BERT output dim)
H = 16           # config.sent_hidden_size
H2 = 2 * H       # bidirectional GRU output dim; must equal D for the matmuls
C = 4            # config.num_classes
NQ = 5           # number of query embeddings
VOCAB = 50
assert H2 == D

NTOT = B * S + NQ          # 21 pooled embeddings (16 sentences + 5 queries)
NTOK = NTOT * L            # 126 tokens total
G3 = 3 * H                 # 48  (one direction's gate width)
G6 = 6 * H                 # 96  (both directions)
A1 = (NQ + 1) * H2         # 192 (5 query nets + value net, fused)

# packed-slab layout (single fp32 weight slab)
OFF_WIH = 0                # (D, 96)   [wih_f | wih_b], gate order r,z,n per dir
OFF_WHH = G6               # (2H, 96)  block-diag [whh_f ; whh_b]
OFF_WA1 = 2 * G6           # (2H, 192) [wq_0..wq_4 | wv1]
OFF_WD = 2 * G6 + A1       # (2H, 4)   document_fc weight
R_EMB = H2                 # rows 32:82  embedding table (VOCAB, D)
R_BIAS = 88                # row 88      biases, mirroring the weight-lane layout
R_WV2 = 89                 # row 89      wv2^T (1, 2H)
SLAB_ROWS, SLAB_LANES = 96, 512
OUT_ROWS, OUT_LANES = 8, 128


# ------------------------------- kernel -------------------------------------
def _hbqda_kernel(tok_ref, mw_ref, slab_ref, out_ref):
    f32 = jnp.float32

    # ---- static views into the single packed weight slab ----
    w_ih = slab_ref[0:D, OFF_WIH:OFF_WIH + G6]                 # (32, 96)
    w_hh = slab_ref[0:H2, OFF_WHH:OFF_WHH + G6]                # (32, 96) block-diag
    w_a1 = slab_ref[0:H2, OFF_WA1:OFF_WA1 + A1]                # (32, 192)
    w_d = slab_ref[0:H2, OFF_WD:OFF_WD + C]                    # (32, 4)
    emb = slab_ref[R_EMB:R_EMB + VOCAB, 0:D]                   # (50, 32)
    b_ih = slab_ref[R_BIAS:R_BIAS + 1, OFF_WIH:OFF_WIH + G6]   # (1, 96)
    b_hh = slab_ref[R_BIAS:R_BIAS + 1, OFF_WHH:OFF_WHH + G6]   # (1, 96)
    b_a1 = slab_ref[R_BIAS:R_BIAS + 1, OFF_WA1:OFF_WA1 + A1]   # (1, 192)
    b_d = slab_ref[R_BIAS:R_BIAS + 1, OFF_WD:OFF_WD + C]       # (1, 4)
    wv2_row = slab_ref[R_WV2:R_WV2 + 1, 0:H2]                  # (1, 32)

    # ---- fused BERT stub: one-hot gather + masked mean pool (2 MXU matmuls) ----
    tok = tok_ref[...]                                          # (126, 1) int32
    w = mw_ref[...]                                             # (126, 1) f32  mask / count
    vocab_iota = jax.lax.broadcasted_iota(jnp.int32, (NTOK, VOCAB), 1)
    gw = jnp.where(tok == vocab_iota, w, 0.0)                   # (126, 50) weighted one-hot
    emb_tok = jnp.dot(gw, emb, preferred_element_type=f32)      # (126, 32)
    r_i = jax.lax.broadcasted_iota(jnp.int32, (NTOT, NTOK), 0)
    c_i = jax.lax.broadcasted_iota(jnp.int32, (NTOT, NTOK), 1)
    pool = ((c_i >= r_i * L) & (c_i < r_i * L + L)).astype(f32)  # (21, 126) group-sum
    pooled = jnp.dot(pool, emb_tok, preferred_element_type=f32)  # (21, 32)
    x_tm = pooled[0:B * S, :]                                   # (16, 32) rows = t*B + b
    q_emb = pooled[B * S:NTOT, :]                               # (5, 32)

    # ---- bidirectional GRU: hoisted input projection + interleaved fwd/bwd ----
    gx_all = jnp.dot(x_tm, w_ih, preferred_element_type=f32) + b_ih   # (16, 96)
    h_cat = jnp.zeros((B, H2), f32)                             # [h_f | h_b]
    fwd = [None] * S
    bwd = [None] * S

    def cell(gx, gh, h_prev):
        r = jax.nn.sigmoid(gx[:, 0:H] + gh[:, 0:H])
        z = jax.nn.sigmoid(gx[:, H:2 * H] + gh[:, H:2 * H])
        n = jnp.tanh(gx[:, 2 * H:G3] + r * gh[:, 2 * H:G3])
        return (1.0 - z) * n + z * h_prev

    for t in range(S):
        # one matmul per step serves both directions (block-diag recurrent weight)
        gh = jnp.dot(h_cat, w_hh, preferred_element_type=f32) + b_hh    # (2, 96)
        h_f = cell(gx_all[t * B:(t + 1) * B, 0:G3], gh[:, 0:G3], h_cat[:, 0:H])
        h_b = cell(gx_all[(S - 1 - t) * B:(S - t) * B, G3:G6], gh[:, G3:G6],
                   h_cat[:, H:H2])
        h_cat = jnp.concatenate([h_f, h_b], axis=-1)
        fwd[t] = h_f
        bwd[S - 1 - t] = h_b

    # f_output, flattened batch-major: row = b*S + s
    f2 = jnp.stack([jnp.concatenate([fwd[t], bwd[t]], axis=-1) for t in range(S)],
                   axis=1).reshape(B * S, H2)                   # (16, 32)

    # ---- fused attention projections: 5 query nets + value net in ONE matmul ----
    act = jnp.tanh(jnp.dot(f2, w_a1, preferred_element_type=f32) + b_a1)   # (16, 192)

    # scores[:, k<5] = tanh(f Wq_k + b_k) . q_k ; scores[:, 5] = alpha_v
    qv = jnp.concatenate([q_emb, wv2_row], axis=0)              # (6, 32)
    tiled = jnp.concatenate([qv] * (NQ + 1), axis=1)            # (6, 192)
    cc = jax.lax.broadcasted_iota(jnp.int32, (NQ + 1, A1), 1)
    blk = jax.lax.broadcasted_iota(jnp.int32, (NQ + 1, A1), 0) * H2
    w2t = jnp.where((cc >= blk) & (cc < blk + H2), tiled, 0.0)   # (6, 192) block-structured
    scores = jax.lax.dot_general(act, w2t, (((1,), (1,)), ((), ())),
                                 preferred_element_type=f32)     # (16, 6)

    scale_k = 1.0 / jnp.sqrt(jnp.float32(H2))
    scale_a = 1.0 / jnp.sqrt(jnp.float32(S))

    doc_rows = []
    att_rows = []
    for b in range(B):
        sc = scores[b * S:(b + 1) * S, :]                        # (8, 6)
        ql = sc[:, 0:NQ] * scale_k                               # (8, 5)
        ql = ql - jnp.max(ql, axis=0, keepdims=True)
        e = jnp.exp(ql)
        alpha_q = e * pl.reciprocal(jnp.sum(e, axis=0, keepdims=True), approx=True)
        alpha_v = sc[:, NQ:NQ + 1]                               # (8, 1)
        lg = jnp.sum(alpha_v * alpha_q, axis=0, keepdims=True) * scale_a   # (1, 5)
        lg = lg - jnp.max(lg, axis=1, keepdims=True)
        e2 = jnp.exp(lg)
        att_a = e2 * pl.reciprocal(jnp.sum(e2, axis=1, keepdims=True), approx=True)  # (1, 5)
        att_q = jnp.sum(att_a * alpha_q, axis=1, keepdims=True)  # (8, 1)
        doc_rows.append(jnp.sum(att_q * f2[b * S:(b + 1) * S, :],
                                axis=0, keepdims=True))          # (1, 32)
        att_rows.append(att_a)

    doc_vec = jnp.concatenate(doc_rows, axis=0)                  # (2, 32)
    att_all = jnp.concatenate(att_rows, axis=0)                  # (2, 5)
    doc = jnp.dot(doc_vec, w_d, preferred_element_type=f32) + b_d          # (2, 4)

    # ---- single lane-dense (8, 128) output block: [doc | att_a | h_f | h_b] ----
    payload = jnp.concatenate([doc, att_all, h_cat], axis=-1)    # (2, 41)
    payload = jnp.concatenate(
        [payload, jnp.zeros((B, OUT_LANES - payload.shape[1]), f32)], axis=-1)
    out_ref[...] = jnp.concatenate(
        [payload, jnp.zeros((OUT_ROWS - B, OUT_LANES), f32)], axis=0)


# --------------------------- host-side glue ----------------------------------
def pack_params(p):
    """Pack every weight/bias + the embedding table into one fp32 slab."""
    slab = jnp.zeros((SLAB_ROWS, SLAB_LANES), jnp.float32)
    slab = slab.at[0:D, OFF_WIH:OFF_WIH + G6].set(
        jnp.concatenate([p['wih_f'], p['wih_b']], axis=1))
    whh_bd = jnp.zeros((H2, G6), jnp.float32)
    whh_bd = whh_bd.at[0:H, 0:G3].set(p['whh_f'])
    whh_bd = whh_bd.at[H:H2, G3:G6].set(p['whh_b'])
    slab = slab.at[0:H2, OFF_WHH:OFF_WHH + G6].set(whh_bd)
    watt1 = jnp.concatenate([p['wq'][k] for k in range(NQ)] + [p['wv1']], axis=1)
    slab = slab.at[0:H2, OFF_WA1:OFF_WA1 + A1].set(watt1)
    slab = slab.at[0:H2, OFF_WD:OFF_WD + C].set(p['wd'])
    slab = slab.at[R_EMB:R_EMB + VOCAB, 0:D].set(p['emb'])
    b_ih = jnp.concatenate([p['bih_f'], p['bih_b']], axis=1)
    b_hh = jnp.concatenate([p['bhh_f'], p['bhh_b']], axis=1)
    b_a1 = jnp.concatenate([p['bq'][k][None, :] for k in range(NQ)] + [p['bv1']], axis=1)
    brow = jnp.concatenate([b_ih, b_hh, b_a1, p['bd']], axis=1)  # (1, 388)
    slab = slab.at[R_BIAS:R_BIAS + 1, 0:brow.shape[1]].set(brow)
    slab = slab.at[R_WV2:R_WV2 + 1, 0:H2].set(p['wv2'].T)
    return slab


def model_forward(slab, x_tokens, mask, q_tokens):
    # token preprocessing only (no weight math): time-major sentence order, queries appended
    tok_x = jnp.transpose(x_tokens, (1, 0, 2)).reshape(S * B, L)
    m_x = jnp.transpose(mask, (1, 0, 2)).reshape(S * B, L).astype(jnp.float32)
    tok_all = jnp.concatenate([tok_x, q_tokens], axis=0).astype(jnp.int32)   # (21, L)
    m_all = jnp.concatenate([m_x, jnp.ones((NQ, L), jnp.float32)], axis=0)
    w_all = m_all / jnp.maximum(jnp.sum(m_all, axis=1, keepdims=True), 1.0)
    tok_flat = tok_all.reshape(NTOK, 1)
    w_flat = w_all.reshape(NTOK, 1)

    vmem = pl.BlockSpec(memory_space=pltpu.MemorySpace.VMEM)
    out = pl.pallas_call(
        _hbqda_kernel,
        out_shape=jax.ShapeDtypeStruct((OUT_ROWS, OUT_LANES), jnp.float32),
        in_specs=[vmem, vmem, vmem],
        out_specs=vmem,
    )(tok_flat, w_flat, slab)

    doc = out[0:B, 0:C]                               # document_fc output
    att = out[0:B, C:C + NQ]                          # att_a.squeeze()
    h_n = jnp.stack([out[0:B, C + NQ:C + NQ + H],
                     out[0:B, C + NQ + H:C + NQ + 2 * H]], axis=0)   # GRU h_n (2, B, H)
    return doc, att, h_n


# ------------------------ pure-JAX reference ---------------------------------
def ref_forward(p, x_tokens, mask, q_tokens):
    emb = p['emb']

    def bert_pool(tok, m):
        e = emb[tok]                                  # (..., L, D)
        mm = m[..., None].astype(jnp.float32)
        return jnp.sum(e * mm, -2) / jnp.maximum(jnp.sum(mm, -2), 1.0)

    x = bert_pool(x_tokens, mask)                     # (B, S, D)
    q_emb = bert_pool(q_tokens, jnp.ones_like(q_tokens))   # (NQ, D)

    def cell(x_t, h_prev, wih, whh, bih, bhh):
        gx = x_t @ wih + bih
        gh = h_prev @ whh + bhh
        r = jax.nn.sigmoid(gx[:, :H] + gh[:, :H])
        z = jax.nn.sigmoid(gx[:, H:2 * H] + gh[:, H:2 * H])
        n = jnp.tanh(gx[:, 2 * H:] + r * gh[:, 2 * H:])
        return (1.0 - z) * n + z * h_prev

    h_f = jnp.zeros((B, H), jnp.float32); fwd = []
    for t in range(S):
        h_f = cell(x[:, t], h_f, p['wih_f'], p['whh_f'], p['bih_f'], p['bhh_f'])
        fwd.append(h_f)
    h_b = jnp.zeros((B, H), jnp.float32); bwd = [None] * S
    for t in range(S - 1, -1, -1):
        h_b = cell(x[:, t], h_b, p['wih_b'], p['whh_b'], p['bih_b'], p['bhh_b'])
        bwd[t] = h_b
    f_out = jnp.concatenate([jnp.stack(fwd, 1), jnp.stack(bwd, 1)], -1)    # (B, S, 2H)

    alphas = []
    for k in range(NQ):
        a = jnp.tanh(f_out @ p['wq'][k] + p['bq'][k])
        sc = (a @ q_emb[k]) / np.sqrt(H2)
        alphas.append(jax.nn.softmax(sc, -1))
    alpha_q_all = jnp.stack(alphas, 1)                                     # (B, NQ, S)
    alpha_v = jnp.squeeze(jnp.tanh(f_out @ p['wv1'] + p['bv1']) @ p['wv2'], -1)
    att_a = jax.nn.softmax(jnp.einsum('bs,bks->bk', alpha_v, alpha_q_all) / np.sqrt(S), -1)
    att_q = jnp.einsum('bk,bks->bs', att_a, alpha_q_all)
    doc_vec = jnp.einsum('bs,bsh->bh', att_q, f_out)
    doc = doc_vec @ p['wd'] + p['bd']
    return doc, att_a, jnp.stack([h_f, h_b], 0)


# --------------------------------- main ---------------------------------------
def init_params(key):
    def nrm(k, shape, scale=0.2):
        return (jax.random.normal(k, shape) * scale).astype(jnp.float32)
    ks = jax.random.split(key, 20)
    return {
        'emb':   nrm(ks[0], (VOCAB, D), 0.5),
        'wih_f': nrm(ks[1], (D, 3 * H)), 'whh_f': nrm(ks[2], (H, 3 * H)),
        'bih_f': nrm(ks[3], (1, 3 * H)), 'bhh_f': nrm(ks[4], (1, 3 * H)),
        'wih_b': nrm(ks[5], (D, 3 * H)), 'whh_b': nrm(ks[6], (H, 3 * H)),
        'bih_b': nrm(ks[7], (1, 3 * H)), 'bhh_b': nrm(ks[8], (1, 3 * H)),
        'wv1':   nrm(ks[9], (H2, H2)),   'bv1':   nrm(ks[10], (1, H2)),
        'wv2':   nrm(ks[11], (H2, 1)),
        'wq':    nrm(ks[12], (NQ, H2, H2)), 'bq': nrm(ks[13], (NQ, H2)),
        'wd':    nrm(ks[14], (H2, C)),   'bd':   nrm(ks[15], (1, C)),
    }


if __name__ == "__main__":
    key = jax.random.PRNGKey(0)
    kp, kx, km, kq = jax.random.split(key, 4)
    params = init_params(kp)
    slab = pack_params(params)

    x_tokens = jax.random.randint(kx, (B, S, L), 0, VOCAB)
    mask = (jax.random.uniform(km, (B, S, L)) > 0.2).astype(jnp.int32)
    mask = mask.at[..., 0].set(1)                     # keep >=1 token per sentence
    q_tokens = jax.random.randint(kq, (NQ, L), 0, VOCAB)

    fwd_fn = jax.jit(model_forward)
    doc_out, att_out, h_out = fwd_fn(slab, x_tokens, mask, q_tokens)
    jax.block_until_ready((doc_out, att_out, h_out))

    ref_doc, ref_att, ref_h = ref_forward(params, x_tokens, mask, q_tokens)
    assert np.allclose(np.asarray(doc_out), np.asarray(ref_doc), rtol=2e-3, atol=2e-3)
    assert np.allclose(np.asarray(att_out), np.asarray(ref_att), rtol=2e-3, atol=2e-3)
    assert np.allclose(np.asarray(h_out), np.asarray(ref_h), rtol=2e-3, atol=2e-3)

    print("KERNEL_OK")
</pallas_src>

<mosaic_0001>
module attributes {stable_mosaic.version = 11 : i64} {
  func.func @_hbqda_kernel(%arg0: memref<126x1xi32, #tpu.memory_space<vmem>>, %arg1: memref<126x1xf32, #tpu.memory_space<vmem>>, %arg2: memref<96x512xf32, #tpu.memory_space<vmem>>, %arg3: memref<8x128xf32, #tpu.memory_space<vmem>>) attributes {dimension_semantics = [], scalar_prefetch = 0 : i64, scratch_operands = 0 : i64, tpu.core_type = #tpu.core_type<tc>} {
    %c0 = arith.constant 0 : index
    %c0_0 = arith.constant 0 : index
    %0 = vector.load %arg2[%c0, %c0_0] : memref<96x512xf32, #tpu.memory_space<vmem>>, vector<32x96xf32>
    %c0_1 = arith.constant 0 : index
    %c96 = arith.constant 96 : index
    %1 = vector.load %arg2[%c0_1, %c96] : memref<96x512xf32, #tpu.memory_space<vmem>>, vector<32x96xf32>
    %c0_2 = arith.constant 0 : index
    %c192 = arith.constant 192 : index
    %2 = vector.load %arg2[%c0_2, %c192] : memref<96x512xf32, #tpu.memory_space<vmem>>, vector<32x192xf32>
    %c0_3 = arith.constant 0 : index
    %c384 = arith.constant 384 : index
    %3 = vector.load %arg2[%c0_3, %c384] : memref<96x512xf32, #tpu.memory_space<vmem>>, vector<32x4xf32>
    %c32 = arith.constant 32 : index
    %c0_4 = arith.constant 0 : index
    %4 = vector.load %arg2[%c32, %c0_4] : memref<96x512xf32, #tpu.memory_space<vmem>>, vector<50x32xf32>
    %c88 = arith.constant 88 : index
    %c0_5 = arith.constant 0 : index
    %5 = vector.load %arg2[%c88, %c0_5] : memref<96x512xf32, #tpu.memory_space<vmem>>, vector<1x96xf32>
    %c88_6 = arith.constant 88 : index
    %c96_7 = arith.constant 96 : index
    %6 = vector.load %arg2[%c88_6, %c96_7] : memref<96x512xf32, #tpu.memory_space<vmem>>, vector<1x96xf32>
    %c88_8 = arith.constant 88 : index
    %c192_9 = arith.constant 192 : index
    %7 = vector.load %arg2[%c88_8, %c192_9] : memref<96x512xf32, #tpu.memory_space<vmem>>, vector<1x192xf32>
    %c88_10 = arith.constant 88 : index
    %c384_11 = arith.constant 384 : index
    %8 = vector.load %arg2[%c88_10, %c384_11] : memref<96x512xf32, #tpu.memory_space<vmem>>, vector<1x4xf32>
    %c89 = arith.constant 89 : index
    %c0_12 = arith.constant 0 : index
    %9 = vector.load %arg2[%c89, %c0_12] : memref<96x512xf32, #tpu.memory_space<vmem>>, vector<1x32xf32>
    %c0_13 = arith.constant 0 : index
    %c0_14 = arith.constant 0 : index
    %10 = vector.load %arg0[%c0_13, %c0_14] : memref<126x1xi32, #tpu.memory_space<vmem>>, vector<126x1xi32>
    %c0_15 = arith.constant 0 : index
    %c0_16 = arith.constant 0 : index
    %11 = vector.load %arg1[%c0_15, %c0_16] : memref<126x1xf32, #tpu.memory_space<vmem>>, vector<126x1xf32>
    %12 = tpu.iota {dimensions = array<i32: 1>} : vector<126x50xi32>
    %13 = vector.broadcast %10 : vector<126x1xi32> to vector<126x50xi32>
    %14 = arith.cmpi eq, %13, %12 : vector<126x50xi32>
    %cst = arith.constant 0.000000e+00 : f32
    %15 = vector.shape_cast %11 : vector<126x1xf32> to vector<126x1xf32>
    %16 = vector.broadcast %15 : vector<126x1xf32> to vector<126x50xf32>
    %17 = vector.broadcast %cst : f32 to vector<126x50xf32>
    %18 = arith.select %14, %16, %17 : vector<126x50xi1>, vector<126x50xf32>
    %cst_17 = arith.constant dense<0.000000e+00> : vector<126x32xf32>
    %19 = tpu.matmul %18, %4, %cst_17 {dimension_numbers = #tpu.dot_dimension_numbers<[1], [0], [0], [1], [0, 0, 1, 1], [], []>} : vector<126x50xf32>, vector<50x32xf32>, vector<126x32xf32> -> vector<126x32xf32>
    %20 = tpu.iota {dimensions = array<i32: 0>} : vector<21x126xi32>
    %21 = tpu.iota {dimensions = array<i32: 1>} : vector<21x126xi32>
    %c6_i32 = arith.constant 6 : i32
    %22 = vector.broadcast %c6_i32 : i32 to vector<21x126xi32>
    %23 = arith.muli %20, %22 : vector<21x126xi32>
    %24 = arith.cmpi sge, %21, %23 : vector<21x126xi32>
    %c6_i32_18 = arith.constant 6 : i32
    %25 = vector.broadcast %c6_i32_18 : i32 to vector<21x126xi32>
    %26 = arith.muli %20, %25 : vector<21x126xi32>
    %c6_i32_19 = arith.constant 6 : i32
    %27 = vector.broadcast %c6_i32_19 : i32 to vector<21x126xi32>
    %28 = arith.addi %26, %27 : vector<21x126xi32>
    %29 = arith.cmpi slt, %21, %28 : vector<21x126xi32>
    %30 = arith.andi %24, %29 : vector<21x126xi1>
    %31 = arith.extui %30 : vector<21x126xi1> to vector<21x126xi32>
    %32 = arith.sitofp %31 : vector<21x126xi32> to vector<21x126xf32>
    %cst_20 = arith.constant dense<0.000000e+00> : vector<21x32xf32>
    %33 = tpu.matmul %32, %19, %cst_20 {dimension_numbers = #tpu.dot_dimension_numbers<[1], [0], [0], [1], [0, 0, 1, 1], [], []>} : vector<21x126xf32>, vector<126x32xf32>, vector<21x32xf32> -> vector<21x32xf32>
    %34 = vector.extract_strided_slice %33 {offsets = [0, 0], sizes = [16, 32], strides = [1, 1]} : vector<21x32xf32> to vector<16x32xf32>
    %35 = vector.extract_strided_slice %33 {offsets = [16, 0], sizes = [5, 32], strides = [1, 1]} : vector<21x32xf32> to vector<5x32xf32>
    %cst_21 = arith.constant dense<0.000000e+00> : vector<16x96xf32>
    %36 = tpu.matmul %34, %0, %cst_21 {dimension_numbers = #tpu.dot_dimension_numbers<[1], [0], [0], [1], [0, 0, 1, 1], [], []>} : vector<16x32xf32>, vector<32x96xf32>, vector<16x96xf32> -> vector<16x96xf32>
    %37 = vector.broadcast %5 : vector<1x96xf32> to vector<16x96xf32>
    %38 = arith.addf %36, %37 : vector<16x96xf32>
    %cst_22 = arith.constant 0.000000e+00 : f32
    %39 = vector.broadcast %cst_22 : f32 to vector<2x32xf32>
    %cst_23 = arith.constant dense<0.000000e+00> : vector<2x96xf32>
    %40 = tpu.matmul %39, %1, %cst_23 {dimension_numbers = #tpu.dot_dimension_numbers<[1], [0], [0], [1], [0, 0, 1, 1], [], []>} : vector<2x32xf32>, vector<32x96xf32>, vector<2x96xf32> -> vector<2x96xf32>
    %41 = vector.broadcast %6 : vector<1x96xf32> to vector<2x96xf32>
    %42 = arith.addf %40, %41 : vector<2x96xf32>
    %43 = vector.extract_strided_slice %38 {offsets = [0, 0], sizes = [2, 48], strides = [1, 1]} : vector<16x96xf32> to vector<2x48xf32>
    %44 = vector.extract_strided_slice %42 {offsets = [0, 0], sizes = [2, 48], strides = [1, 1]} : vector<2x96xf32> to vector<2x48xf32>
    %45 = vector.extract_strided_slice %39 {offsets = [0, 0], sizes = [2, 16], strides = [1, 1]} : vector<2x32xf32> to vector<2x16xf32>
    %46 = vector.extract_strided_slice %43 {offsets = [0, 0], sizes = [2, 16], strides = [1, 1]} : vector<2x48xf32> to vector<2x16xf32>
    %47 = vector.extract_strided_slice %44 {offsets = [0, 0], sizes = [2, 16], strides = [1, 1]} : vector<2x48xf32> to vector<2x16xf32>
    %48 = arith.addf %46, %47 : vector<2x16xf32>
    %49 = arith.negf %48 : vector<2x16xf32>
    %50 = math.exp %49 : vector<2x16xf32>
    %cst_24 = arith.constant 1.000000e+00 : f32
    %51 = vector.broadcast %cst_24 : f32 to vector<2x16xf32>
    %52 = arith.addf %51, %50 : vector<2x16xf32>
    %53 = arith.divf %51, %52 : vector<2x16xf32>
    %54 = vector.extract_strided_slice %43 {offsets = [0, 16], sizes = [2, 16], strides = [1, 1]} : vector<2x48xf32> to vector<2x16xf32>
    %55 = vector.extract_strided_slice %44 {offsets = [0, 16], sizes = [2, 16], strides = [1, 1]} : vector<2x48xf32> to vector<2x16xf32>
    %56 = arith.addf %54, %55 : vector<2x16xf32>
    %57 = arith.negf %56 : vector<2x16xf32>
    %58 = math.exp %57 : vector<2x16xf32>
    %cst_25 = arith.constant 1.000000e+00 : f32
    %59 = vector.broadcast %cst_25 : f32 to vector<2x16xf32>
    %60 = arith.addf %59, %58 : vector<2x16xf32>
    %61 = arith.divf %59, %60 : vector<2x16xf32>
    %62 = vector.extract_strided_slice %43 {offsets = [0, 32], sizes = [2, 16], strides = [1, 1]} : vector<2x48xf32> to vector<2x16xf32>
    %63 = vector.extract_strided_slice %44 {offsets = [0, 32], sizes = [2, 16], strides = [1, 1]} : vector<2x48xf32> to vector<2x16xf32>
    %64 = arith.mulf %53, %63 : vector<2x16xf32>
    %65 = arith.addf %62, %64 : vector<2x16xf32>
    %66 = math.tanh %65 : vector<2x16xf32>
    %cst_26 = arith.constant 1.000000e+00 : f32
    %67 = vector.broadcast %cst_26 : f32 to vector<2x16xf32>
    %68 = arith.subf %67, %61 : vector<2x16xf32>
    %69 = arith.mulf %68, %66 : vector<2x16xf32>
    %70 = arith.mulf %61, %45 : vector<2x16xf32>
    %71 = arith.addf %69, %70 : vector<2x16xf32>
    %72 = vector.extract_strided_slice %38 {offsets = [14, 48], sizes = [2, 48], strides = [1, 1]} : vector<16x96xf32> to vector<2x48xf32>
    %73 = vector.extract_strided_slice %42 {offsets = [0, 48], sizes = [2, 48], strides = [1, 1]} : vector<2x96xf32> to vector<2x48xf32>
    %74 = vector.extract_strided_slice %39 {offsets = [0, 16], sizes = [2, 16], strides = [1, 1]} : vector<2x32xf32> to vector<2x16xf32>
    %75 = vector.extract_strided_slice %72 {offsets = [0, 0], sizes = [2, 16], strides = [1, 1]} : vector<2x48xf32> to vector<2x16xf32>
    %76 = vector.extract_strided_slice %73 {offsets = [0, 0], sizes = [2, 16], strides = [1, 1]} : vector<2x48xf32> to vector<2x16xf32>
    %77 = arith.addf %75, %76 : vector<2x16xf32>
    %78 = arith.negf %77 : vector<2x16xf32>
    %79 = math.exp %78 : vector<2x16xf32>
    %cst_27 = arith.constant 1.000000e+00 : f32
    %80 = vector.broadcast %cst_27 : f32 to vector<2x16xf32>
    %81 = arith.addf %80, %79 : vector<2x16xf32>
    %82 = arith.divf %80, %81 : vector<2x16xf32>
    %83 = vector.extract_strided_slice %72 {offsets = [0, 16], sizes = [2, 16], strides = [1, 1]} : vector<2x48xf32> to vector<2x16xf32>
    %84 = vector.extract_strided_slice %73 {offsets = [0, 16], sizes = [2, 16], strides = [1, 1]} : vector<2x48xf32> to vector<2x16xf32>
    %85 = arith.addf %83, %84 : vector<2x16xf32>
    %86 = arith.negf %85 : vector<2x16xf32>
    %87 = math.exp %86 : vector<2x16xf32>
    %cst_28 = arith.constant 1.000000e+00 : f32
    %88 = vector.broadcast %cst_28 : f32 to vector<2x16xf32>
    %89 = arith.addf %88, %87 : vector<2x16xf32>
    %90 = arith.divf %88, %89 : vector<2x16xf32>
    %91 = vector.extract_strided_slice %72 {offsets = [0, 32], sizes = [2, 16], strides = [1, 1]} : vector<2x48xf32> to vector<2x16xf32>
    %92 = vector.extract_strided_slice %73 {offsets = [0, 32], sizes = [2, 16], strides = [1, 1]} : vector<2x48xf32> to vector<2x16xf32>
    %93 = arith.mulf %82, %92 : vector<2x16xf32>
    %94 = arith.addf %91, %93 : vector<2x16xf32>
    %95 = math.tanh %94 : vector<2x16xf32>
    %cst_29 = arith.constant 1.000000e+00 : f32
    %96 = vector.broadcast %cst_29 : f32 to vector<2x16xf32>
    %97 = arith.subf %96, %90 : vector<2x16xf32>
    %98 = arith.mulf %97, %95 : vector<2x16xf32>
    %99 = arith.mulf %90, %74 : vector<2x16xf32>
    %100 = arith.addf %98, %99 : vector<2x16xf32>
    %101 = tpu.concatenate %71, %100 in 1 : vector<2x16xf32>, vector<2x16xf32> -> vector<2x32xf32>
    %cst_30 = arith.constant dense<0.000000e+00> : vector<2x96xf32>
    %102 = tpu.matmul %101, %1, %cst_30 {dimension_numbers = #tpu.dot_dimension_numbers<[1], [0], [0], [1], [0, 0, 1, 1], [], []>} : vector<2x32xf32>, vector<32x96xf32>, vector<2x96xf32> -> vector<2x96xf32>
    %103 = vector.broadcast %6 : vector<1x96xf32> to vector<2x96xf32>
    %104 = arith.addf %102, %103 : vector<2x96xf32>
    %105 = vector.extract_strided_slice %38 {offsets = [2, 0], sizes = [2, 48], strides = [1, 1]} : vector<16x96xf32> to vector<2x48xf32>
    %106 = vector.extract_strided_slice %104 {offsets = [0, 0], sizes = [2, 48], strides = [1, 1]} : vector<2x96xf32> to vector<2x48xf32>
    %107 = vector.extract_strided_slice %101 {offsets = [0, 0], sizes = [2, 16], strides = [1, 1]} : vector<2x32xf32> to vector<2x16xf32>
    %108 = vector.extract_strided_slice %105 {offsets = [0, 0], sizes = [2, 16], strides = [1, 1]} : vector<2x48xf32> to vector<2x16xf32>
    %109 = vector.extract_strided_slice %106 {offsets = [0, 0], sizes = [2, 16], strides = [1, 1]} : vector<2x48xf32> to vector<2x16xf32>
    %110 = arith.addf %108, %109 : vector<2x16xf32>
    %111 = arith.negf %110 : vector<2x16xf32>
    %112 = math.exp %111 : vector<2x16xf32>
    %cst_31 = arith.constant 1.000000e+00 : f32
    %113 = vector.broadcast %cst_31 : f32 to vector<2x16xf32>
    %114 = arith.addf %113, %112 : vector<2x16xf32>
    %115 = arith.divf %113, %114 : vector<2x16xf32>
    %116 = vector.extract_strided_slice %105 {offsets = [0, 16], sizes = [2, 16], strides = [1, 1]} : vector<2x48xf32> to vector<2x16xf32>
    %117 = vector.extract_strided_slice %106 {offsets = [0, 16], sizes = [2, 16], strides = [1, 1]} : vector<2x48xf32> to vector<2x16xf32>
    %118 = arith.addf %116, %117 : vector<2x16xf32>
    %119 = arith.negf %118 : vector<2x16xf32>
    %120 = math.exp %119 : vector<2x16xf32>
    %cst_32 = arith.constant 1.000000e+00 : f32
    %121 = vector.broadcast %cst_32 : f32 to vector<2x16xf32>
    %122 = arith.addf %121, %120 : vector<2x16xf32>
    %123 = arith.divf %121, %122 : vector<2x16xf32>
    %124 = vector.extract_strided_slice %105 {offsets = [0, 32], sizes = [2, 16], strides = [1, 1]} : vector<2x48xf32> to vector<2x16xf32>
    %125 = vector.extract_strided_slice %106 {offsets = [0, 32], sizes = [2, 16], strides = [1, 1]} : vector<2x48xf32> to vector<2x16xf32>
    %126 = arith.mulf %115, %125 : vector<2x16xf32>
    %127 = arith.addf %124, %126 : vector<2x16xf32>
    %128 = math.tanh %127 : vector<2x16xf32>
    %cst_33 = arith.constant 1.000000e+00 : f32
    %129 = vector.broadcast %cst_33 : f32 to vector<2x16xf32>
    %130 = arith.subf %129, %123 : vector<2x16xf32>
    %131 = arith.mulf %130, %128 : vector<2x16xf32>
    %132 = arith.mulf %123, %107 : vector<2x16xf32>
    %133 = arith.addf %131, %132 : vector<2x16xf32>
    %134 = vector.extract_strided_slice %38 {offsets = [12, 48], sizes = [2, 48], strides = [1, 1]} : vector<16x96xf32> to vector<2x48xf32>
    %135 = vector.extract_strided_slice %104 {offsets = [0, 48], sizes = [2, 48], strides = [1, 1]} : vector<2x96xf32> to vector<2x48xf32>
    %136 = vector.extract_strided_slice %101 {offsets = [0, 16], sizes = [2, 16], strides = [1, 1]} : vector<2x32xf32> to vector<2x16xf32>
    %137 = vector.extract_strided_slice %134 {offsets = [0, 0], sizes = [2, 16], strides = [1, 1]} : vector<2x48xf32> to vector<2x16xf32>
    %138 = vector.extract_strided_slice %135 {offsets = [0, 0], sizes = [2, 16], strides = [1, 1]} : vector<2x48xf32> to vector<2x16xf32>
    %139 = arith.addf %137, %138 : vector<2x16xf32>
    %140 = arith.negf %139 : vector<2x16xf32>
    %141 = math.exp %140 : vector<2x16xf32>
    %cst_34 = arith.constant 1.000000e+00 : f32
    %142 = vector.broadcast %cst_34 : f32 to vector<2x16xf32>
    %143 = arith.addf %142, %141 : vector<2x16xf32>
    %144 = arith.divf %142, %143 : vector<2x16xf32>
    %145 = vector.extract_strided_slice %134 {offsets = [0, 16], sizes = [2, 16], strides = [1, 1]} : vector<2x48xf32> to vector<2x16xf32>
    %146 = vector.extract_strided_slice %135 {offsets = [0, 16], sizes = [2, 16], strides = [1, 1]} : vector<2x48xf32> to vector<2x16xf32>
    %147 = arith.addf %145, %146 : vector<2x16xf32>
    %148 = arith.negf %147 : vector<2x16xf32>
    %149 = math.exp %148 : vector<2x16xf32>
    %cst_35 = arith.constant 1.000000e+00 : f32
    %150 = vector.broadcast %cst_35 : f32 to vector<2x16xf32>
    %151 = arith.addf %150, %149 : vector<2x16xf32>
    %152 = arith.divf %150, %151 : vector<2x16xf32>
    %153 = vector.extract_strided_slice %134 {offsets = [0, 32], sizes = [2, 16], strides = [1, 1]} : vector<2x48xf32> to vector<2x16xf32>
    %154 = vector.extract_strided_slice %135 {offsets = [0, 32], sizes = [2, 16], strides = [1, 1]} : vector<2x48xf32> to vector<2x16xf32>
    %155 = arith.mulf %144, %154 : vector<2x16xf32>
    %156 = arith.addf %153, %155 : vector<2x16xf32>
    %157 = math.tanh %156 : vector<2x16xf32>
    %cst_36 = arith.constant 1.000000e+00 : f32
    %158 = vector.broadcast %cst_36 : f32 to vector<2x16xf32>
    %159 = arith.subf %158, %152 : vector<2x16xf32>
    %160 = arith.mulf %159, %157 : vector<2x16xf32>
    %161 = arith.mulf %152, %136 : vector<2x16xf32>
    %162 = arith.addf %160, %161 : vector<2x16xf32>
    %163 = tpu.concatenate %133, %162 in 1 : vector<2x16xf32>, vector<2x16xf32> -> vector<2x32xf32>
    %cst_37 = arith.constant dense<0.000000e+00> : vector<2x96xf32>
    %164 = tpu.matmul %163, %1, %cst_37 {dimension_numbers = #tpu.dot_dimension_numbers<[1], [0], [0], [1], [0, 0, 1, 1], [], []>} : vector<2x32xf32>, vector<32x96xf32>, vector<2x96xf32> -> vector<2x96xf32>
    %165 = vector.broadcast %6 : vector<1x96xf32> to vector<2x96xf32>
    %166 = arith.addf %164, %165 : vector<2x96xf32>
    %167 = vector.extract_strided_slice %38 {offsets = [4, 0], sizes = [2, 48], strides = [1, 1]} : vector<16x96xf32> to vector<2x48xf32>
    %168 = vector.extract_strided_slice %166 {offsets = [0, 0], sizes = [2, 48], strides = [1, 1]} : vector<2x96xf32> to vector<2x48xf32>
    %169 = vector.extract_strided_slice %163 {offsets = [0, 0], sizes = [2, 16], strides = [1, 1]} : vector<2x32xf32> to vector<2x16xf32>
    %170 = vector.extract_strided_slice %167 {offsets = [0, 0], sizes = [2, 16], strides = [1, 1]} : vector<2x48xf32> to vector<2x16xf32>
    %171 = vector.extract_strided_slice %168 {offsets = [0, 0], sizes = [2, 16], strides = [1, 1]} : vector<2x48xf32> to vector<2x16xf32>
    %172 = arith.addf %170, %171 : vector<2x16xf32>
    %173 = arith.negf %172 : vector<2x16xf32>
    %174 = math.exp %173 : vector<2x16xf32>
    %cst_38 = arith.constant 1.000000e+00 : f32
    %175 = vector.broadcast %cst_38 : f32 to vector<2x16xf32>
    %176 = arith.addf %175, %174 : vector<2x16xf32>
    %177 = arith.divf %175, %176 : vector<2x16xf32>
    %178 = vector.extract_strided_slice %167 {offsets = [0, 16], sizes = [2, 16], strides = [1, 1]} : vector<2x48xf32> to vector<2x16xf32>
    %179 = vector.extract_strided_slice %168 {offsets = [0, 16], sizes = [2, 16], strides = [1, 1]} : vector<2x48xf32> to vector<2x16xf32>
    %180 = arith.addf %178, %179 : vector<2x16xf32>
    %181 = arith.negf %180 : vector<2x16xf32>
    %182 = math.exp %181 : vector<2x16xf32>
    %cst_39 = arith.constant 1.000000e+00 : f32
    %183 = vector.broadcast %cst_39 : f32 to vector<2x16xf32>
    %184 = arith.addf %183, %182 : vector<2x16xf32>
    %185 = arith.divf %183, %184 : vector<2x16xf32>
    %186 = vector.extract_strided_slice %167 {offsets = [0, 32], sizes = [2, 16], strides = [1, 1]} : vector<2x48xf32> to vector<2x16xf32>
    %187 = vector.extract_strided_slice %168 {offsets = [0, 32], sizes = [2, 16], strides = [1, 1]} : vector<2x48xf32> to vector<2x16xf32>
    %188 = arith.mulf %177, %187 : vector<2x16xf32>
    %189 = arith.addf %186, %188 : vector<2x16xf32>
    %190 = math.tanh %189 : vector<2x16xf32>
    %cst_40 = arith.constant 1.000000e+00 : f32
    %191 = vector.broadcast %cst_40 : f32 to vector<2x16xf32>
    %192 = arith.subf %191, %185 : vector<2x16xf32>
    %193 = arith.mulf %192, %190 : vector<2x16xf32>
    %194 = arith.mulf %185, %169 : vector<2x16xf32>
    %195 = arith.addf %193, %194 : vector<2x16xf32>
    %196 = vector.extract_strided_slice %38 {offsets = [10, 48], sizes = [2, 48], strides = [1, 1]} : vector<16x96xf32> to vector<2x48xf32>
    %197 = vector.extract_strided_slice %166 {offsets = [0, 48], sizes = [2, 48], strides = [1, 1]} : vector<2x96xf32> to vector<2x48xf32>
    %198 = vector.extract_strided_slice %163 {offsets = [0, 16], sizes = [2, 16], strides = [1, 1]} : vector<2x32xf32> to vector<2x16xf32>
    %199 = vector.extract_strided_slice %196 {offsets = [0, 0], sizes = [2, 16], strides = [1, 1]} : vector<2x48xf32> to vector<2x16xf32>
    %200 = vector.extract_strided_slice %197 {offsets = [0, 0], sizes = [2, 16], strides = [1, 1]} : vector<2x48xf32> to vector<2x16xf32>
    %201 = arith.addf %199, %200 : vector<2x16xf32>
    %202 = arith.negf %201 : vector<2x16xf32>
    %203 = math.exp %202 : vector<2x16xf32>
    %cst_41 = arith.constant 1.000000e+00 : f32
    %204 = vector.broadcast %cst_41 : f32 to vector<2x16xf32>
    %205 = arith.addf %204, %203 : vector<2x16xf32>
    %206 = arith.divf %204, %205 : vector<2x16xf32>
    %207 = vector.extract_strided_slice %196 {offsets = [0, 16], sizes = [2, 16], strides = [1, 1]} : vector<2x48xf32> to vector<2x16xf32>
    %208 = vector.extract_strided_slice %197 {offsets = [0, 16], sizes = [2, 16], strides = [1, 1]} : vector<2x48xf32> to vector<2x16xf32>
    %209 = arith.addf %207, %208 : vector<2x16xf32>
    %210 = arith.negf %209 : vector<2x16xf32>
    %211 = math.exp %210 : vector<2x16xf32>
    %cst_42 = arith.constant 1.000000e+00 : f32
    %212 = vector.broadcast %cst_42 : f32 to vector<2x16xf32>
    %213 = arith.addf %212, %211 : vector<2x16xf32>
    %214 = arith.divf %212, %213 : vector<2x16xf32>
    %215 = vector.extract_strided_slice %196 {offsets = [0, 32], sizes = [2, 16], strides = [1, 1]} : vector<2x48xf32> to vector<2x16xf32>
    %216 = vector.extract_strided_slice %197 {offsets = [0, 32], sizes = [2, 16], strides = [1, 1]} : vector<2x48xf32> to vector<2x16xf32>
    %217 = arith.mulf %206, %216 : vector<2x16xf32>
    %218 = arith.addf %215, %217 : vector<2x16xf32>
    %219 = math.tanh %218 : vector<2x16xf32>
    %cst_43 = arith.constant 1.000000e+00 : f32
    %220 = vector.broadcast %cst_43 : f32 to vector<2x16xf32>
    %221 = arith.subf %220, %214 : vector<2x16xf32>
    %222 = arith.mulf %221, %219 : vector<2x16xf32>
    %223 = arith.mulf %214, %198 : vector<2x16xf32>
    %224 = arith.addf %222, %223 : vector<2x16xf32>
    %225 = tpu.concatenate %195, %224 in 1 : vector<2x16xf32>, vector<2x16xf32> -> vector<2x32xf32>
    %cst_44 = arith.constant dense<0.000000e+00> : vector<2x96xf32>
    %226 = tpu.matmul %225, %1, %cst_44 {dimension_numbers = #tpu.dot_dimension_numbers<[1], [0], [0], [1], [0, 0, 1, 1], [], []>} : vector<2x32xf32>, vector<32x96xf32>, vector<2x96xf32> -> vector<2x96xf32>
    %227 = vector.broadcast %6 : vector<1x96xf32> to vector<2x96xf32>
    %228 = arith.addf %226, %227 : vector<2x96xf32>
    %229 = vector.extract_strided_slice %38 {offsets = [6, 0], sizes = [2, 48], strides = [1, 1]} : vector<16x96xf32> to vector<2x48xf32>
    %230 = vector.extract_strided_slice %228 {offsets = [0, 0], sizes = [2, 48], strides = [1, 1]} : vector<2x96xf32> to vector<2x48xf32>
    %231 = vector.extract_strided_slice %225 {offsets = [0, 0], sizes = [2, 16], strides = [1, 1]} : vector<2x32xf32> to vector<2x16xf32>
    %232 = vector.extract_strided_slice %229 {offsets = [0, 0], sizes = [2, 16], strides = [1, 1]} : vector<2x48xf32> to vector<2x16xf32>
    %233 = vector.extract_strided_slice %230 {offsets = [0, 0], sizes = [2, 16], strides = [1, 1]} : vector<2x48xf32> to vector<2x16xf32>
    %234 = arith.addf %232, %233 : vector<2x16xf32>
    %235 = arith.negf %234 : vector<2x16xf32>
    %236 = math.exp %235 : vector<2x16xf32>
    %cst_45 = arith.constant 1.000000e+00 : f32
    %237 = vector.broadcast %cst_45 : f32 to vector<2x16xf32>
    %238 = arith.addf %237, %236 : vector<2x16xf32>
    %239 = arith.divf %237, %238 : vector<2x16xf32>
    %240 = vector.extract_strided_slice %229 {offsets = [0, 16], sizes = [2, 16], strides = [1, 1]} : vector<2x48xf32> to vector<2x16xf32>
    %241 = vector.extract_strided_slice %230 {offsets = [0, 16], sizes = [2, 16], strides = [1, 1]} : vector<2x48xf32> to vector<2x16xf32>
    %242 = arith.addf %240, %241 : vector<2x16xf32>
    %243 = arith.negf %242 : vector<2x16xf32>
    %244 = math.exp %243 : vector<2x16xf32>
    %cst_46 = arith.constant 1.000000e+00 : f32
    %245 = vector.broadcast %cst_46 : f32 to vector<2x16xf32>
    %246 = arith.addf %245, %244 : vector<2x16xf32>
    %247 = arith.divf %245, %246 : vector<2x16xf32>
    %248 = vector.extract_strided_slice %229 {offsets = [0, 32], sizes = [2, 16], strides = [1, 1]} : vector<2x48xf32> to vector<2x16xf32>
    %249 = vector.extract_strided_slice %230 {offsets = [0, 32], sizes = [2, 16], strides = [1, 1]} : vector<2x48xf32> to vector<2x16xf32>
    %250 = arith.mulf %239, %249 : vector<2x16xf32>
    %251 = arith.addf %248, %250 : vector<2x16xf32>
    %252 = math.tanh %251 : vector<2x16xf32>
    %cst_47 = arith.constant 1.000000e+00 : f32
    %253 = vector.broadcast %cst_47 : f32 to vector<2x16xf32>
    %254 = arith.subf %253, %247 : vector<2x16xf32>
    %255 = arith.mulf %254, %252 : vector<2x16xf32>
    %256 = arith.mulf %247, %231 : vector<2x16xf32>
    %257 = arith.addf %255, %256 : vector<2x16xf32>
    %258 = vector.extract_strided_slice %38 {offsets = [8, 48], sizes = [2, 48], strides = [1, 1]} : vector<16x96xf32> to vector<2x48xf32>
    %259 = vector.extract_strided_slice %228 {offsets = [0, 48], sizes = [2, 48], strides = [1, 1]} : vector<2x96xf32> to vector<2x48xf32>
    %260 = vector.extract_strided_slice %225 {offsets = [0, 16], sizes = [2, 16], strides = [1, 1]} : vector<2x32xf32> to vector<2x16xf32>
    %261 = vector.extract_strided_slice %258 {offsets = [0, 0], sizes = [2, 16], strides = [1, 1]} : vector<2x48xf32> to vector<2x16xf32>
    %262 = vector.extract_strided_slice %259 {offsets = [0, 0], sizes = [2, 16], strides = [1, 1]} : vector<2x48xf32> to vector<2x16xf32>
    %263 = arith.addf %261, %262 : vector<2x16xf32>
    %264 = arith.negf %263 : vector<2x16xf32>
    %265 = math.exp %264 : vector<2x16xf32>
    %cst_48 = arith.constant 1.000000e+00 : f32
    %266 = vector.broadcast %cst_48 : f32 to vector<2x16xf32>
    %267 = arith.addf %266, %265 : vector<2x16xf32>
    %268 = arith.divf %266, %267 : vector<2x16xf32>
    %269 = vector.extract_strided_slice %258 {offsets = [0, 16], sizes = [2, 16], strides = [1, 1]} : vector<2x48xf32> to vector<2x16xf32>
    %270 = vector.extract_strided_slice %259 {offsets = [0, 16], sizes = [2, 16], strides = [1, 1]} : vector<2x48xf32> to vector<2x16xf32>
    %271 = arith.addf %269, %270 : vector<2x16xf32>
    %272 = arith.negf %271 : vector<2x16xf32>
    %273 = math.exp %272 : vector<2x16xf32>
    %cst_49 = arith.constant 1.000000e+00 : f32
    %274 = vector.broadcast %cst_49 : f32 to vector<2x16xf32>
    %275 = arith.addf %274, %273 : vector<2x16xf32>
    %276 = arith.divf %274, %275 : vector<2x16xf32>
    %277 = vector.extract_strided_slice %258 {offsets = [0, 32], sizes = [2, 16], strides = [1, 1]} : vector<2x48xf32> to vector<2x16xf32>
    %278 = vector.extract_strided_slice %259 {offsets = [0, 32], sizes = [2, 16], strides = [1, 1]} : vector<2x48xf32> to vector<2x16xf32>
    %279 = arith.mulf %268, %278 : vector<2x16xf32>
    %280 = arith.addf %277, %279 : vector<2x16xf32>
    %281 = math.tanh %280 : vector<2x16xf32>
    %cst_50 = arith.constant 1.000000e+00 : f32
    %282 = vector.broadcast %cst_50 : f32 to vector<2x16xf32>
    %283 = arith.subf %282, %276 : vector<2x16xf32>
    %284 = arith.mulf %283, %281 : vector<2x16xf32>
    %285 = arith.mulf %276, %260 : vector<2x16xf32>
    %286 = arith.addf %284, %285 : vector<2x16xf32>
    %287 = tpu.concatenate %257, %286 in 1 : vector<2x16xf32>, vector<2x16xf32> -> vector<2x32xf32>
    %cst_51 = arith.constant dense<0.000000e+00> : vector<2x96xf32>
    %288 = tpu.matmul %287, %1, %cst_51 {dimension_numbers = #tpu.dot_dimension_numbers<[1], [0], [0], [1], [0, 0, 1, 1], [], []>} : vector<2x32xf32>, vector<32x96xf32>, vector<2x96xf32> -> vector<2x96xf32>
    %289 = vector.broadcast %6 : vector<1x96xf32> to vector<2x96xf32>
    %290 = arith.addf %288, %289 : vector<2x96xf32>
    %291 = vector.extract_strided_slice %38 {offsets = [8, 0], sizes = [2, 48], strides = [1, 1]} : vector<16x96xf32> to vector<2x48xf32>
    %292 = vector.extract_strided_slice %290 {offsets = [0, 0], sizes = [2, 48], strides = [1, 1]} : vector<2x96xf32> to vector<2x48xf32>
    %293 = vector.extract_strided_slice %287 {offsets = [0, 0], sizes = [2, 16], strides = [1, 1]} : vector<2x32xf32> to vector<2x16xf32>
    %294 = vector.extract_strided_slice %291 {offsets = [0, 0], sizes = [2, 16], strides = [1, 1]} : vector<2x48xf32> to vector<2x16xf32>
    %295 = vector.extract_strided_slice %292 {offsets = [0, 0], sizes = [2, 16], strides = [1, 1]} : vector<2x48xf32> to vector<2x16xf32>
    %296 = arith.addf %294, %295 : vector<2x16xf32>
    %297 = arith.negf %296 : vector<2x16xf32>
    %298 = math.exp %297 : vector<2x16xf32>
    %cst_52 = arith.constant 1.000000e+00 : f32
    %299 = vector.broadcast %cst_52 : f32 to vector<2x16xf32>
    %300 = arith.addf %299, %298 : vector<2x16xf32>
    %301 = arith.divf %299, %300 : vector<2x16xf32>
    %302 = vector.extract_strided_slice %291 {offsets = [0, 16], sizes = [2, 16], strides = [1, 1]} : vector<2x48xf32> to vector<2x16xf32>
    %303 = vector.extract_strided_slice %292 {offsets = [0, 16], sizes = [2, 16], strides = [1, 1]} : vector<2x48xf32> to vector<2x16xf32>
    %304 = arith.addf %302, %303 : vector<2x16xf32>
    %305 = arith.negf %304 : vector<2x16xf32>
    %306 = math.exp %305 : vector<2x16xf32>
    %cst_53 = arith.constant 1.000000e+00 : f32
    %307 = vector.broadcast %cst_53 : f32 to vector<2x16xf32>
    %308 = arith.addf %307, %306 : vector<2x16xf32>
    %309 = arith.divf %307, %308 : vector<2x16xf32>
    %310 = vector.extract_strided_slice %291 {offsets = [0, 32], sizes = [2, 16], strides = [1, 1]} : vector<2x48xf32> to vector<2x16xf32>
    %311 = vector.extract_strided_slice %292 {offsets = [0, 32], sizes = [2, 16], strides = [1, 1]} : vector<2x48xf32> to vector<2x16xf32>
    %312 = arith.mulf %301, %311 : vector<2x16xf32>
    %313 = arith.addf %310, %312 : vector<2x16xf32>
    %314 = math.tanh %313 : vector<2x16xf32>
    %cst_54 = arith.constant 1.000000e+00 : f32
    %315 = vector.broadcast %cst_54 : f32 to vector<2x16xf32>
    %316 = arith.subf %315, %309 : vector<2x16xf32>
    %317 = arith.mulf %316, %314 : vector<2x16xf32>
    %318 = arith.mulf %309, %293 : vector<2x16xf32>
    %319 = arith.addf %317, %318 : vector<2x16xf32>
    %320 = vector.extract_strided_slice %38 {offsets = [6, 48], sizes = [2, 48], strides = [1, 1]} : vector<16x96xf32> to vector<2x48xf32>
    %321 = vector.extract_strided_slice %290 {offsets = [0, 48], sizes = [2, 48], strides = [1, 1]} : vector<2x96xf32> to vector<2x48xf32>
    %322 = vector.extract_strided_slice %287 {offsets = [0, 16], sizes = [2, 16], strides = [1, 1]} : vector<2x32xf32> to vector<2x16xf32>
    %323 = vector.extract_strided_slice %320 {offsets = [0, 0], sizes = [2, 16], strides = [1, 1]} : vector<2x48xf32> to vector<2x16xf32>
    %324 = vector.extract_strided_slice %321 {offsets = [0, 0], sizes = [2, 16], strides = [1, 1]} : vector<2x48xf32> to vector<2x16xf32>
    %325 = arith.addf %323, %324 : vector<2x16xf32>
    %326 = arith.negf %325 : vector<2x16xf32>
    %327 = math.exp %326 : vector<2x16xf32>
    %cst_55 = arith.constant 1.000000e+00 : f32
    %328 = vector.broadcast %cst_55 : f32 to vector<2x16xf32>
    %329 = arith.addf %328, %327 : vector<2x16xf32>
    %330 = arith.divf %328, %329 : vector<2x16xf32>
    %331 = vector.extract_strided_slice %320 {offsets = [0, 16], sizes = [2, 16], strides = [1, 1]} : vector<2x48xf32> to vector<2x16xf32>
    %332 = vector.extract_strided_slice %321 {offsets = [0, 16], sizes = [2, 16], strides = [1, 1]} : vector<2x48xf32> to vector<2x16xf32>
    %333 = arith.addf %331, %332 : vector<2x16xf32>
    %334 = arith.negf %333 : vector<2x16xf32>
    %335 = math.exp %334 : vector<2x16xf32>
    %cst_56 = arith.constant 1.000000e+00 : f32
    %336 = vector.broadcast %cst_56 : f32 to vector<2x16xf32>
    %337 = arith.addf %336, %335 : vector<2x16xf32>
    %338 = arith.divf %336, %337 : vector<2x16xf32>
    %339 = vector.extract_strided_slice %320 {offsets = [0, 32], sizes = [2, 16], strides = [1, 1]} : vector<2x48xf32> to vector<2x16xf32>
    %340 = vector.extract_strided_slice %321 {offsets = [0, 32], sizes = [2, 16], strides = [1, 1]} : vector<2x48xf32> to vector<2x16xf32>
    %341 = arith.mulf %330, %340 : vector<2x16xf32>
    %342 = arith.addf %339, %341 : vector<2x16xf32>
    %343 = math.tanh %342 : vector<2x16xf32>
    %cst_57 = arith.constant 1.000000e+00 : f32
    %344 = vector.broadcast %cst_57 : f32 to vector<2x16xf32>
    %345 = arith.subf %344, %338 : vector<2x16xf32>
    %346 = arith.mulf %345, %343 : vector<2x16xf32>
    %347 = arith.mulf %338, %322 : vector<2x16xf32>
    %348 = arith.addf %346, %347 : vector<2x16xf32>
    %349 = tpu.concatenate %319, %348 in 1 : vector<2x16xf32>, vector<2x16xf32> -> vector<2x32xf32>
    %cst_58 = arith.constant dense<0.000000e+00> : vector<2x96xf32>
    %350 = tpu.matmul %349, %1, %cst_58 {dimension_numbers = #tpu.dot_dimension_numbers<[1], [0], [0], [1], [0, 0, 1, 1], [], []>} : vector<2x32xf32>, vector<32x96xf32>, vector<2x96xf32> -> vector<2x96xf32>
    %351 = vector.broadcast %6 : vector<1x96xf32> to vector<2x96xf32>
    %352 = arith.addf %350, %351 : vector<2x96xf32>
    %353 = vector.extract_strided_slice %38 {offsets = [10, 0], sizes = [2, 48], strides = [1, 1]} : vector<16x96xf32> to vector<2x48xf32>
    %354 = vector.extract_strided_slice %352 {offsets = [0, 0], sizes = [2, 48], strides = [1, 1]} : vector<2x96xf32> to vector<2x48xf32>
    %355 = vector.extract_strided_slice %349 {offsets = [0, 0], sizes = [2, 16], strides = [1, 1]} : vector<2x32xf32> to vector<2x16xf32>
    %356 = vector.extract_strided_slice %353 {offsets = [0, 0], sizes = [2, 16], strides = [1, 1]} : vector<2x48xf32> to vector<2x16xf32>
    %357 = vector.extract_strided_slice %354 {offsets = [0, 0], sizes = [2, 16], strides = [1, 1]} : vector<2x48xf32> to vector<2x16xf32>
    %358 = arith.addf %356, %357 : vector<2x16xf32>
    %359 = arith.negf %358 : vector<2x16xf32>
    %360 = math.exp %359 : vector<2x16xf32>
    %cst_59 = arith.constant 1.000000e+00 : f32
    %361 = vector.broadcast %cst_59 : f32 to vector<2x16xf32>
    %362 = arith.addf %361, %360 : vector<2x16xf32>
    %363 = arith.divf %361, %362 : vector<2x16xf32>
    %364 = vector.extract_strided_slice %353 {offsets = [0, 16], sizes = [2, 16], strides = [1, 1]} : vector<2x48xf32> to vector<2x16xf32>
    %365 = vector.extract_strided_slice %354 {offsets = [0, 16], sizes = [2, 16], strides = [1, 1]} : vector<2x48xf32> to vector<2x16xf32>
    %366 = arith.addf %364, %365 : vector<2x16xf32>
    %367 = arith.negf %366 : vector<2x16xf32>
    %368 = math.exp %367 : vector<2x16xf32>
    %cst_60 = arith.constant 1.000000e+00 : f32
    %369 = vector.broadcast %cst_60 : f32 to vector<2x16xf32>
    %370 = arith.addf %369, %368 : vector<2x16xf32>
    %371 = arith.divf %369, %370 : vector<2x16xf32>
    %372 = vector.extract_strided_slice %353 {offsets = [0, 32], sizes = [2, 16], strides = [1, 1]} : vector<2x48xf32> to vector<2x16xf32>
    %373 = vector.extract_strided_slice %354 {offsets = [0, 32], sizes = [2, 16], strides = [1, 1]} : vector<2x48xf32> to vector<2x16xf32>
    %374 = arith.mulf %363, %373 : vector<2x16xf32>
    %375 = arith.addf %372, %374 : vector<2x16xf32>
    %376 = math.tanh %375 : vector<2x16xf32>
    %cst_61 = arith.constant 1.000000e+00 : f32
    %377 = vector.broadcast %cst_61 : f32 to vector<2x16xf32>
    %378 = arith.subf %377, %371 : vector<2x16xf32>
    %379 = arith.mulf %378, %376 : vector<2x16xf32>
    %380 = arith.mulf %371, %355 : vector<2x16xf32>
    %381 = arith.addf %379, %380 : vector<2x16xf32>
    %382 = vector.extract_strided_slice %38 {offsets = [4, 48], sizes = [2, 48], strides = [1, 1]} : vector<16x96xf32> to vector<2x48xf32>
    %383 = vector.extract_strided_slice %352 {offsets = [0, 48], sizes = [2, 48], strides = [1, 1]} : vector<2x96xf32> to vector<2x48xf32>
    %384 = vector.extract_strided_slice %349 {offsets = [0, 16], sizes = [2, 16], strides = [1, 1]} : vector<2x32xf32> to vector<2x16xf32>
    %385 = vector.extract_strided_slice %382 {offsets = [0, 0], sizes = [2, 16], strides = [1, 1]} : vector<2x48xf32> to vector<2x16xf32>
    %386 = vector.extract_strided_slice %383 {offsets = [0, 0], sizes = [2, 16], strides = [1, 1]} : vector<2x48xf32> to vector<2x16xf32>
    %387 = arith.addf %385, %386 : vector<2x16xf32>
    %388 = arith.negf %387 : vector<2x16xf32>
    %389 = math.exp %388 : vector<2x16xf32>
    %cst_62 = arith.constant 1.000000e+00 : f32
    %390 = vector.broadcast %cst_62 : f32 to vector<2x16xf32>
    %391 = arith.addf %390, %389 : vector<2x16xf32>
    %392 = arith.divf %390, %391 : vector<2x16xf32>
    %393 = vector.extract_strided_slice %382 {offsets = [0, 16], sizes = [2, 16], strides = [1, 1]} : vector<2x48xf32> to vector<2x16xf32>
    %394 = vector.extract_strided_slice %383 {offsets = [0, 16], sizes = [2, 16], strides = [1, 1]} : vector<2x48xf32> to vector<2x16xf32>
    %395 = arith.addf %393, %394 : vector<2x16xf32>
    %396 = arith.negf %395 : vector<2x16xf32>
    %397 = math.exp %396 : vector<2x16xf32>
    %cst_63 = arith.constant 1.000000e+00 : f32
    %398 = vector.broadcast %cst_63 : f32 to vector<2x16xf32>
    %399 = arith.addf %398, %397 : vector<2x16xf32>
    %400 = arith.divf %398, %399 : vector<2x16xf32>
    %401 = vector.extract_strided_slice %382 {offsets = [0, 32], sizes = [2, 16], strides = [1, 1]} : vector<2x48xf32> to vector<2x16xf32>
    %402 = vector.extract_strided_slice %383 {offsets = [0, 32], sizes = [2, 16], strides = [1, 1]} : vector<2x48xf32> to vector<2x16xf32>
    %403 = arith.mulf %392, %402 : vector<2x16xf32>
    %404 = arith.addf %401, %403 : vector<2x16xf32>
    %405 = math.tanh %404 : vector<2x16xf32>
    %cst_64 = arith.constant 1.000000e+00 : f32
    %406 = vector.broadcast %cst_64 : f32 to vector<2x16xf32>
    %407 = arith.subf %406, %400 : vector<2x16xf32>
    %408 = arith.mulf %407, %405 : vector<2x16xf32>
    %409 = arith.mulf %400, %384 : vector<2x16xf32>
    %410 = arith.addf %408, %409 : vector<2x16xf32>
    %411 = tpu.concatenate %381, %410 in 1 : vector<2x16xf32>, vector<2x16xf32> -> vector<2x32xf32>
    %cst_65 = arith.constant dense<0.000000e+00> : vector<2x96xf32>
    %412 = tpu.matmul %411, %1, %cst_65 {dimension_numbers = #tpu.dot_dimension_numbers<[1], [0], [0], [1], [0, 0, 1, 1], [], []>} : vector<2x32xf32>, vector<32x96xf32>, vector<2x96xf32> -> vector<2x96xf32>
    %413 = vector.broadcast %6 : vector<1x96xf32> to vector<2x96xf32>
    %414 = arith.addf %412, %413 : vector<2x96xf32>
    %415 = vector.extract_strided_slice %38 {offsets = [12, 0], sizes = [2, 48], strides = [1, 1]} : vector<16x96xf32> to vector<2x48xf32>
    %416 = vector.extract_strided_slice %414 {offsets = [0, 0], sizes = [2, 48], strides = [1, 1]} : vector<2x96xf32> to vector<2x48xf32>
    %417 = vector.extract_strided_slice %411 {offsets = [0, 0], sizes = [2, 16], strides = [1, 1]} : vector<2x32xf32> to vector<2x16xf32>
    %418 = vector.extract_strided_slice %415 {offsets = [0, 0], sizes = [2, 16], strides = [1, 1]} : vector<2x48xf32> to vector<2x16xf32>
    %419 = vector.extract_strided_slice %416 {offsets = [0, 0], sizes = [2, 16], strides = [1, 1]} : vector<2x48xf32> to vector<2x16xf32>
    %420 = arith.addf %418, %419 : vector<2x16xf32>
    %421 = arith.negf %420 : vector<2x16xf32>
    %422 = math.exp %421 : vector<2x16xf32>
    %cst_66 = arith.constant 1.000000e+00 : f32
    %423 = vector.broadcast %cst_66 : f32 to vector<2x16xf32>
    %424 = arith.addf %423, %422 : vector<2x16xf32>
    %425 = arith.divf %423, %424 : vector<2x16xf32>
    %426 = vector.extract_strided_slice %415 {offsets = [0, 16], sizes = [2, 16], strides = [1, 1]} : vector<2x48xf32> to vector<2x16xf32>
    %427 = vector.extract_strided_slice %416 {offsets = [0, 16], sizes = [2, 16], strides = [1, 1]} : vector<2x48xf32> to vector<2x16xf32>
    %428 = arith.addf %426, %427 : vector<2x16xf32>
    %429 = arith.negf %428 : vector<2x16xf32>
    %430 = math.exp %429 : vector<2x16xf32>
    %cst_67 = arith.constant 1.000000e+00 : f32
    %431 = vector.broadcast %cst_67 : f32 to vector<2x16xf32>
    %432 = arith.addf %431, %430 : vector<2x16xf32>
    %433 = arith.divf %431, %432 : vector<2x16xf32>
    %434 = vector.extract_strided_slice %415 {offsets = [0, 32], sizes = [2, 16], strides = [1, 1]} : vector<2x48xf32> to vector<2x16xf32>
    %435 = vector.extract_strided_slice %416 {offsets = [0, 32], sizes = [2, 16], strides = [1, 1]} : vector<2x48xf32> to vector<2x16xf32>
    %436 = arith.mulf %425, %435 : vector<2x16xf32>
    %437 = arith.addf %434, %436 : vector<2x16xf32>
    %438 = math.tanh %437 : vector<2x16xf32>
    %cst_68 = arith.constant 1.000000e+00 : f32
    %439 = vector.broadcast %cst_68 : f32 to vector<2x16xf32>
    %440 = arith.subf %439, %433 : vector<2x16xf32>
    %441 = arith.mulf %440, %438 : vector<2x16xf32>
    %442 = arith.mulf %433, %417 : vector<2x16xf32>
    %443 = arith.addf %441, %442 : vector<2x16xf32>
    %444 = vector.extract_strided_slice %38 {offsets = [2, 48], sizes = [2, 48], strides = [1, 1]} : vector<16x96xf32> to vector<2x48xf32>
    %445 = vector.extract_strided_slice %414 {offsets = [0, 48], sizes = [2, 48], strides = [1, 1]} : vector<2x96xf32> to vector<2x48xf32>
    %446 = vector.extract_strided_slice %411 {offsets = [0, 16], sizes = [2, 16], strides = [1, 1]} : vector<2x32xf32> to vector<2x16xf32>
    %447 = vector.extract_strided_slice %444 {offsets = [0, 0], sizes = [2, 16], strides = [1, 1]} : vector<2x48xf32> to vector<2x16xf32>
    %448 = vector.extract_strided_slice %445 {offsets = [0, 0], sizes = [2, 16], strides = [1, 1]} : vector<2x48xf32> to vector<2x16xf32>
    %449 = arith.addf %447, %448 : vector<2x16xf32>
    %450 = arith.negf %449 : vector<2x16xf32>
    %451 = math.exp %450 : vector<2x16xf32>
    %cst_69 = arith.constant 1.000000e+00 : f32
    %452 = vector.broadcast %cst_69 : f32 to vector<2x16xf32>
    %453 = arith.addf %452, %451 : vector<2x16xf32>
    %454 = arith.divf %452, %453 : vector<2x16xf32>
    %455 = vector.extract_strided_slice %444 {offsets = [0, 16], sizes = [2, 16], strides = [1, 1]} : vector<2x48xf32> to vector<2x16xf32>
    %456 = vector.extract_strided_slice %445 {offsets = [0, 16], sizes = [2, 16], strides = [1, 1]} : vector<2x48xf32> to vector<2x16xf32>
    %457 = arith.addf %455, %456 : vector<2x16xf32>
    %458 = arith.negf %457 : vector<2x16xf32>
    %459 = math.exp %458 : vector<2x16xf32>
    %cst_70 = arith.constant 1.000000e+00 : f32
    %460 = vector.broadcast %cst_70 : f32 to vector<2x16xf32>
    %461 = arith.addf %460, %459 : vector<2x16xf32>
    %462 = arith.divf %460, %461 : vector<2x16xf32>
    %463 = vector.extract_strided_slice %444 {offsets = [0, 32], sizes = [2, 16], strides = [1, 1]} : vector<2x48xf32> to vector<2x16xf32>
    %464 = vector.extract_strided_slice %445 {offsets = [0, 32], sizes = [2, 16], strides = [1, 1]} : vector<2x48xf32> to vector<2x16xf32>
    %465 = arith.mulf %454, %464 : vector<2x16xf32>
    %466 = arith.addf %463, %465 : vector<2x16xf32>
    %467 = math.tanh %466 : vector<2x16xf32>
    %cst_71 = arith.constant 1.000000e+00 : f32
    %468 = vector.broadcast %cst_71 : f32 to vector<2x16xf32>
    %469 = arith.subf %468, %462 : vector<2x16xf32>
    %470 = arith.mulf %469, %467 : vector<2x16xf32>
    %471 = arith.mulf %462, %446 : vector<2x16xf32>
    %472 = arith.addf %470, %471 : vector<2x16xf32>
    %473 = tpu.concatenate %443, %472 in 1 : vector<2x16xf32>, vector<2x16xf32> -> vector<2x32xf32>
    %cst_72 = arith.constant dense<0.000000e+00> : vector<2x96xf32>
    %474 = tpu.matmul %473, %1, %cst_72 {dimension_numbers = #tpu.dot_dimension_numbers<[1], [0], [0], [1], [0, 0, 1, 1], [], []>} : vector<2x32xf32>, vector<32x96xf32>, vector<2x96xf32> -> vector<2x96xf32>
    %475 = vector.broadcast %6 : vector<1x96xf32> to vector<2x96xf32>
    %476 = arith.addf %474, %475 : vector<2x96xf32>
    %477 = vector.extract_strided_slice %38 {offsets = [14, 0], sizes = [2, 48], strides = [1, 1]} : vector<16x96xf32> to vector<2x48xf32>
    %478 = vector.extract_strided_slice %476 {offsets = [0, 0], sizes = [2, 48], strides = [1, 1]} : vector<2x96xf32> to vector<2x48xf32>
    %479 = vector.extract_strided_slice %473 {offsets = [0, 0], sizes = [2, 16], strides = [1, 1]} : vector<2x32xf32> to vector<2x16xf32>
    %480 = vector.extract_strided_slice %477 {offsets = [0, 0], sizes = [2, 16], strides = [1, 1]} : vector<2x48xf32> to vector<2x16xf32>
    %481 = vector.extract_strided_slice %478 {offsets = [0, 0], sizes = [2, 16], strides = [1, 1]} : vector<2x48xf32> to vector<2x16xf32>
    %482 = arith.addf %480, %481 : vector<2x16xf32>
    %483 = arith.negf %482 : vector<2x16xf32>
    %484 = math.exp %483 : vector<2x16xf32>
    %cst_73 = arith.constant 1.000000e+00 : f32
    %485 = vector.broadcast %cst_73 : f32 to vector<2x16xf32>
    %486 = arith.addf %485, %484 : vector<2x16xf32>
    %487 = arith.divf %485, %486 : vector<2x16xf32>
    %488 = vector.extract_strided_slice %477 {offsets = [0, 16], sizes = [2, 16], strides = [1, 1]} : vector<2x48xf32> to vector<2x16xf32>
    %489 = vector.extract_strided_slice %478 {offsets = [0, 16], sizes = [2, 16], strides = [1, 1]} : vector<2x48xf32> to vector<2x16xf32>
    %490 = arith.addf %488, %489 : vector<2x16xf32>
    %491 = arith.negf %490 : vector<2x16xf32>
    %492 = math.exp %491 : vector<2x16xf32>
    %cst_74 = arith.constant 1.000000e+00 : f32
    %493 = vector.broadcast %cst_74 : f32 to vector<2x16xf32>
    %494 = arith.addf %493, %492 : vector<2x16xf32>
    %495 = arith.divf %493, %494 : vector<2x16xf32>
    %496 = vector.extract_strided_slice %477 {offsets = [0, 32], sizes = [2, 16], strides = [1, 1]} : vector<2x48xf32> to vector<2x16xf32>
    %497 = vector.extract_strided_slice %478 {offsets = [0, 32], sizes = [2, 16], strides = [1, 1]} : vector<2x48xf32> to vector<2x16xf32>
    %498 = arith.mulf %487, %497 : vector<2x16xf32>
    %499 = arith.addf %496, %498 : vector<2x16xf32>
    %500 = math.tanh %499 : vector<2x16xf32>
    %cst_75 = arith.constant 1.000000e+00 : f32
    %501 = vector.broadcast %cst_75 : f32 to vector<2x16xf32>
    %502 = arith.subf %501, %495 : vector<2x16xf32>
    %503 = arith.mulf %502, %500 : vector<2x16xf32>
    %504 = arith.mulf %495, %479 : vector<2x16xf32>
    %505 = arith.addf %503, %504 : vector<2x16xf32>
    %506 = vector.extract_strided_slice %38 {offsets = [0, 48], sizes = [2, 48], strides = [1, 1]} : vector<16x96xf32> to vector<2x48xf32>
    %507 = vector.extract_strided_slice %476 {offsets = [0, 48], sizes = [2, 48], strides = [1, 1]} : vector<2x96xf32> to vector<2x48xf32>
    %508 = vector.extract_strided_slice %473 {offsets = [0, 16], sizes = [2, 16], strides = [1, 1]} : vector<2x32xf32> to vector<2x16xf32>
    %509 = vector.extract_strided_slice %506 {offsets = [0, 0], sizes = [2, 16], strides = [1, 1]} : vector<2x48xf32> to vector<2x16xf32>
    %510 = vector.extract_strided_slice %507 {offsets = [0, 0], sizes = [2, 16], strides = [1, 1]} : vector<2x48xf32> to vector<2x16xf32>
    %511 = arith.addf %509, %510 : vector<2x16xf32>
    %512 = arith.negf %511 : vector<2x16xf32>
    %513 = math.exp %512 : vector<2x16xf32>
    %cst_76 = arith.constant 1.000000e+00 : f32
    %514 = vector.broadcast %cst_76 : f32 to vector<2x16xf32>
    %515 = arith.addf %514, %513 : vector<2x16xf32>
    %516 = arith.divf %514, %515 : vector<2x16xf32>
    %517 = vector.extract_strided_slice %506 {offsets = [0, 16], sizes = [2, 16], strides = [1, 1]} : vector<2x48xf32> to vector<2x16xf32>
    %518 = vector.extract_strided_slice %507 {offsets = [0, 16], sizes = [2, 16], strides = [1, 1]} : vector<2x48xf32> to vector<2x16xf32>
    %519 = arith.addf %517, %518 : vector<2x16xf32>
    %520 = arith.negf %519 : vector<2x16xf32>
    %521 = math.exp %520 : vector<2x16xf32>
    %cst_77 = arith.constant 1.000000e+00 : f32
    %522 = vector.broadcast %cst_77 : f32 to vector<2x16xf32>
    %523 = arith.addf %522, %521 : vector<2x16xf32>
    %524 = arith.divf %522, %523 : vector<2x16xf32>
    %525 = vector.extract_strided_slice %506 {offsets = [0, 32], sizes = [2, 16], strides = [1, 1]} : vector<2x48xf32> to vector<2x16xf32>
    %526 = vector.extract_strided_slice %507 {offsets = [0, 32], sizes = [2, 16], strides = [1, 1]} : vector<2x48xf32> to vector<2x16xf32>
    %527 = arith.mulf %516, %526 : vector<2x16xf32>
    %528 = arith.addf %525, %527 : vector<2x16xf32>
    %529 = math.tanh %528 : vector<2x16xf32>
    %cst_78 = arith.constant 1.000000e+00 : f32
    %530 = vector.broadcast %cst_78 : f32 to vector<2x16xf32>
    %531 = arith.subf %530, %524 : vector<2x16xf32>
    %532 = arith.mulf %531, %529 : vector<2x16xf32>
    %533 = arith.mulf %524, %508 : vector<2x16xf32>
    %534 = arith.addf %532, %533 : vector<2x16xf32>
    %535 = tpu.concatenate %505, %534 in 1 : vector<2x16xf32>, vector<2x16xf32> -> vector<2x32xf32>
    %536 = tpu.concatenate %71, %534 in 1 : vector<2x16xf32>, vector<2x16xf32> -> vector<2x32xf32>
    %537 = tpu.concatenate %133, %472 in 1 : vector<2x16xf32>, vector<2x16xf32> -> vector<2x32xf32>
    %538 = tpu.concatenate %195, %410 in 1 : vector<2x16xf32>, vector<2x16xf32> -> vector<2x32xf32>
    %539 = tpu.concatenate %257, %348 in 1 : vector<2x16xf32>, vector<2x16xf32> -> vector<2x32xf32>
    %540 = tpu.concatenate %319, %286 in 1 : vector<2x16xf32>, vector<2x16xf32> -> vector<2x32xf32>
    %541 = tpu.concatenate %381, %224 in 1 : vector<2x16xf32>, vector<2x16xf32> -> vector<2x32xf32>
    %542 = tpu.concatenate %443, %162 in 1 : vector<2x16xf32>, vector<2x16xf32> -> vector<2x32xf32>
    %543 = tpu.concatenate %505, %100 in 1 : vector<2x16xf32>, vector<2x16xf32> -> vector<2x32xf32>
    %544 = vector.shape_cast %536 : vector<2x32xf32> to vector<2x1x32xf32>
    %545 = vector.shape_cast %537 : vector<2x32xf32> to vector<2x1x32xf32>
    %546 = vector.shape_cast %538 : vector<2x32xf32> to vector<2x1x32xf32>
    %547 = vector.shape_cast %539 : vector<2x32xf32> to vector<2x1x32xf32>
    %548 = vector.shape_cast %540 : vector<2x32xf32> to vector<2x1x32xf32>
    %549 = vector.shape_cast %541 : vector<2x32xf32> to vector<2x1x32xf32>
    %550 = vector.shape_cast %542 : vector<2x32xf32> to vector<2x1x32xf32>
    %551 = vector.shape_cast %543 : vector<2x32xf32> to vector<2x1x32xf32>
    %552 = tpu.concatenate %544, %545, %546, %547, %548, %549, %550, %551 in 1 : vector<2x1x32xf32>, vector<2x1x32xf32>, vector<2x1x32xf32>, vector<2x1x32xf32>, vector<2x1x32xf32>, vector<2x1x32xf32>, vector<2x1x32xf32>, vector<2x1x32xf32> -> vector<2x8x32xf32>
    %553 = vector.shape_cast %552 : vector<2x8x32xf32> to vector<16x32xf32>
    %cst_79 = arith.constant dense<0.000000e+00> : vector<16x192xf32>
    %554 = tpu.matmul %553, %2, %cst_79 {dimension_numbers = #tpu.dot_dimension_numbers<[1], [0], [0], [1], [0, 0, 1, 1], [], []>} : vector<16x32xf32>, vector<32x192xf32>, vector<16x192xf32> -> vector<16x192xf32>
    %555 = vector.broadcast %7 : vector<1x192xf32> to vector<16x192xf32>
    %556 = arith.addf %554, %555 : vector<16x192xf32>
    %557 = math.tanh %556 : vector<16x192xf32>
    %558 = tpu.concatenate %35, %9 in 0 : vector<5x32xf32>, vector<1x32xf32> -> vector<6x32xf32>
    %559 = tpu.concatenate %558, %558, %558, %558, %558, %558 in 1 : vector<6x32xf32>, vector<6x32xf32>, vector<6x32xf32>, vector<6x32xf32>, vector<6x32xf32>, vector<6x32xf32> -> vector<6x192xf32>
    %560 = tpu.iota {dimensions = array<i32: 1>} : vector<6x192xi32>
    %561 = tpu.iota {dimensions = array<i32: 0>} : vector<6x192xi32>
    %c32_i32 = arith.constant 32 : i32
    %562 = vector.broadcast %c32_i32 : i32 to vector<6x192xi32>
    %563 = arith.muli %561, %562 : vector<6x192xi32>
    %564 = arith.cmpi sge, %560, %563 : vector<6x192xi32>
    %c32_i32_80 = arith.constant 32 : i32
    %565 = vector.broadcast %c32_i32_80 : i32 to vector<6x192xi32>
    %566 = arith.addi %563, %565 : vector<6x192xi32>
    %567 = arith.cmpi slt, %560, %566 : vector<6x192xi32>
    %568 = arith.andi %564, %567 : vector<6x192xi1>
    %cst_81 = arith.constant 0.000000e+00 : f32
    %569 = vector.broadcast %cst_81 : f32 to vector<6x192xf32>
    %570 = arith.select %568, %559, %569 : vector<6x192xi1>, vector<6x192xf32>
    %cst_82 = arith.constant dense<0.000000e+00> : vector<16x6xf32>
    %571 = tpu.matmul %557, %570, %cst_82 {dimension_numbers = #tpu.dot_dimension_numbers<[1], [1], [0], [0], [0, 0, 1, 0], [], []>} : vector<16x192xf32>, vector<6x192xf32>, vector<16x6xf32> -> vector<16x6xf32>
    %cst_83 = arith.constant 3.200000e+01 : f32
    %572 = math.sqrt %cst_83 : f32
    %cst_84 = arith.constant 1.000000e+00 : f32
    %573 = arith.divf %cst_84, %572 : f32
    %cst_85 = arith.constant 8.000000e+00 : f32
    %574 = math.sqrt %cst_85 : f32
    %cst_86 = arith.constant 1.000000e+00 : f32
    %575 = arith.divf %cst_86, %574 : f32
    %576 = vector.extract_strided_slice %571 {offsets = [0, 0], sizes = [8, 6], strides = [1, 1]} : vector<16x6xf32> to vector<8x6xf32>
    %577 = vector.extract_strided_slice %576 {offsets = [0, 0], sizes = [8, 5], strides = [1, 1]} : vector<8x6xf32> to vector<8x5xf32>
    %578 = vector.broadcast %573 : f32 to vector<8x5xf32>
    %579 = arith.mulf %577, %578 : vector<8x5xf32>
    %cst_87 = arith.constant dense<0xFF800000> : vector<5xf32>
    %580 = vector.multi_reduction <maximumf>, %579, %cst_87 [0] : vector<8x5xf32> to vector<5xf32>
    %581 = vector.shape_cast %580 : vector<5xf32> to vector<1x5xf32>
    %582 = vector.broadcast %581 : vector<1x5xf32> to vector<8x5xf32>
    %583 = arith.subf %579, %582 : vector<8x5xf32>
    %584 = math.exp %583 : vector<8x5xf32>
    %cst_88 = arith.constant dense<0.000000e+00> : vector<5xf32>
    %585 = vector.multi_reduction <add>, %584, %cst_88 [0] : vector<8x5xf32> to vector<5xf32>
    %586 = vector.shape_cast %585 : vector<5xf32> to vector<1x5xf32>
    %587 = tpu.reciprocal %586 {approx = true} : vector<1x5xf32> -> vector<1x5xf32>
    %588 = vector.broadcast %587 : vector<1x5xf32> to vector<8x5xf32>
    %589 = arith.mulf %584, %588 : vector<8x5xf32>
    %590 = vector.extract_strided_slice %576 {offsets = [0, 5], sizes = [8, 1], strides = [1, 1]} : vector<8x6xf32> to vector<8x1xf32>
    %591 = vector.broadcast %590 : vector<8x1xf32> to vector<8x5xf32>
    %592 = arith.mulf %591, %589 : vector<8x5xf32>
    %cst_89 = arith.constant dense<0.000000e+00> : vector<5xf32>
    %593 = vector.multi_reduction <add>, %592, %cst_89 [0] : vector<8x5xf32> to vector<5xf32>
    %594 = vector.shape_cast %593 : vector<5xf32> to vector<1x5xf32>
    %595 = vector.broadcast %575 : f32 to vector<1x5xf32>
    %596 = arith.mulf %594, %595 : vector<1x5xf32>
    %cst_90 = arith.constant dense<0xFF800000> : vector<1xf32>
    %597 = vector.multi_reduction <maximumf>, %596, %cst_90 [1] : vector<1x5xf32> to vector<1xf32>
    %598 = vector.shape_cast %597 : vector<1xf32> to vector<1x1xf32>
    %599 = vector.broadcast %598 : vector<1x1xf32> to vector<1x5xf32>
    %600 = arith.subf %596, %599 : vector<1x5xf32>
    %601 = math.exp %600 : vector<1x5xf32>
    %cst_91 = arith.constant dense<0.000000e+00> : vector<1xf32>
    %602 = vector.multi_reduction <add>, %601, %cst_91 [1] : vector<1x5xf32> to vector<1xf32>
    %603 = vector.shape_cast %602 : vector<1xf32> to vector<1x1xf32>
    %604 = tpu.reciprocal %603 {approx = true} : vector<1x1xf32> -> vector<1x1xf32>
    %605 = vector.broadcast %604 : vector<1x1xf32> to vector<1x5xf32>
    %606 = arith.mulf %601, %605 : vector<1x5xf32>
    %607 = vector.broadcast %606 : vector<1x5xf32> to vector<8x5xf32>
    %608 = arith.mulf %607, %589 : vector<8x5xf32>
    %cst_92 = arith.constant dense<0.000000e+00> : vector<8xf32>
    %609 = vector.multi_reduction <add>, %608, %cst_92 [1] : vector<8x5xf32> to vector<8xf32>
    %610 = vector.shape_cast %609 : vector<8xf32> to vector<8x1xf32>
    %611 = vector.extract_strided_slice %553 {offsets = [0, 0], sizes = [8, 32], strides = [1, 1]} : vector<16x32xf32> to vector<8x32xf32>
    %612 = vector.broadcast %610 : vector<8x1xf32> to vector<8x32xf32>
    %613 = arith.mulf %612, %611 : vector<8x32xf32>
    %cst_93 = arith.constant dense<0.000000e+00> : vector<32xf32>
    %614 = vector.multi_reduction <add>, %613, %cst_93 [0] : vector<8x32xf32> to vector<32xf32>
    %615 = vector.shape_cast %614 : vector<32xf32> to vector<1x32xf32>
    %616 = vector.extract_strided_slice %571 {offsets = [8, 0], sizes = [8, 6], strides = [1, 1]} : vector<16x6xf32> to vector<8x6xf32>
    %617 = vector.extract_strided_slice %616 {offsets = [0, 0], sizes = [8, 5], strides = [1, 1]} : vector<8x6xf32> to vector<8x5xf32>
    %618 = vector.broadcast %573 : f32 to vector<8x5xf32>
    %619 = arith.mulf %617, %618 : vector<8x5xf32>
    %cst_94 = arith.constant dense<0xFF800000> : vector<5xf32>
    %620 = vector.multi_reduction <maximumf>, %619, %cst_94 [0] : vector<8x5xf32> to vector<5xf32>
    %621 = vector.shape_cast %620 : vector<5xf32> to vector<1x5xf32>
    %622 = vector.broadcast %621 : vector<1x5xf32> to vector<8x5xf32>
    %623 = arith.subf %619, %622 : vector<8x5xf32>
    %624 = math.exp %623 : vector<8x5xf32>
    %cst_95 = arith.constant dense<0.000000e+00> : vector<5xf32>
    %625 = vector.multi_reduction <add>, %624, %cst_95 [0] : vector<8x5xf32> to vector<5xf32>
    %626 = vector.shape_cast %625 : vector<5xf32> to vector<1x5xf32>
    %627 = tpu.reciprocal %626 {approx = true} : vector<1x5xf32> -> vector<1x5xf32>
    %628 = vector.broadcast %627 : vector<1x5xf32> to vector<8x5xf32>
    %629 = arith.mulf %624, %628 : vector<8x5xf32>
    %630 = vector.extract_strided_slice %616 {offsets = [0, 5], sizes = [8, 1], strides = [1, 1]} : vector<8x6xf32> to vector<8x1xf32>
    %631 = vector.broadcast %630 : vector<8x1xf32> to vector<8x5xf32>
    %632 = arith.mulf %631, %629 : vector<8x5xf32>
    %cst_96 = arith.constant dense<0.000000e+00> : vector<5xf32>
    %633 = vector.multi_reduction <add>, %632, %cst_96 [0] : vector<8x5xf32> to vector<5xf32>
    %634 = vector.shape_cast %633 : vector<5xf32> to vector<1x5xf32>
    %635 = vector.broadcast %575 : f32 to vector<1x5xf32>
    %636 = arith.mulf %634, %635 : vector<1x5xf32>
    %cst_97 = arith.constant dense<0xFF800000> : vector<1xf32>
    %637 = vector.multi_reduction <maximumf>, %636, %cst_97 [1] : vector<1x5xf32> to vector<1xf32>
    %638 = vector.shape_cast %637 : vector<1xf32> to vector<1x1xf32>
    %639 = vector.broadcast %638 : vector<1x1xf32> to vector<1x5xf32>
    %640 = arith.subf %636, %639 : vector<1x5xf32>
    %641 = math.exp %640 : vector<1x5xf32>
    %cst_98 = arith.constant dense<0.000000e+00> : vector<1xf32>
    %642 = vector.multi_reduction <add>, %641, %cst_98 [1] : vector<1x5xf32> to vector<1xf32>
    %643 = vector.shape_cast %642 : vector<1xf32> to vector<1x1xf32>
    %644 = tpu.reciprocal %643 {approx = true} : vector<1x1xf32> -> vector<1x1xf32>
    %645 = vector.broadcast %644 : vector<1x1xf32> to vector<1x5xf32>
    %646 = arith.mulf %641, %645 : vector<1x5xf32>
    %647 = vector.broadcast %646 : vector<1x5xf32> to vector<8x5xf32>
    %648 = arith.mulf %647, %629 : vector<8x5xf32>
    %cst_99 = arith.constant dense<0.000000e+00> : vector<8xf32>
    %649 = vector.multi_reduction <add>, %648, %cst_99 [1] : vector<8x5xf32> to vector<8xf32>
    %650 = vector.shape_cast %649 : vector<8xf32> to vector<8x1xf32>
    %651 = vector.extract_strided_slice %553 {offsets = [8, 0], sizes = [8, 32], strides = [1, 1]} : vector<16x32xf32> to vector<8x32xf32>
    %652 = vector.broadcast %650 : vector<8x1xf32> to vector<8x32xf32>
    %653 = arith.mulf %652, %651 : vector<8x32xf32>
    %cst_100 = arith.constant dense<0.000000e+00> : vector<32xf32>
    %654 = vector.multi_reduction <add>, %653, %cst_100 [0] : vector<8x32xf32> to vector<32xf32>
    %655 = vector.shape_cast %654 : vector<32xf32> to vector<1x32xf32>
    %656 = tpu.concatenate %615, %655 in 0 : vector<1x32xf32>, vector<1x32xf32> -> vector<2x32xf32>
    %657 = tpu.concatenate %606, %646 in 0 : vector<1x5xf32>, vector<1x5xf32> -> vector<2x5xf32>
    %cst_101 = arith.constant dense<0.000000e+00> : vector<2x4xf32>
    %658 = tpu.matmul %656, %3, %cst_101 {dimension_numbers = #tpu.dot_dimension_numbers<[1], [0], [0], [1], [0, 0, 1, 1], [], []>} : vector<2x32xf32>, vector<32x4xf32>, vector<2x4xf32> -> vector<2x4xf32>
    %659 = vector.broadcast %8 : vector<1x4xf32> to vector<2x4xf32>
    %660 = arith.addf %658, %659 : vector<2x4xf32>
    %661 = tpu.concatenate %660, %657, %535 in 1 : vector<2x4xf32>, vector<2x5xf32>, vector<2x32xf32> -> vector<2x41xf32>
    %cst_102 = arith.constant 0.000000e+00 : f32
    %662 = vector.broadcast %cst_102 : f32 to vector<2x87xf32>
    %663 = tpu.concatenate %661, %662 in 1 : vector<2x41xf32>, vector<2x87xf32> -> vector<2x128xf32>
    %cst_103 = arith.constant 0.000000e+00 : f32
    %664 = vector.broadcast %cst_103 : f32 to vector<6x128xf32>
    %665 = tpu.concatenate %663, %664 in 0 : vector<2x128xf32>, vector<6x128xf32> -> vector<8x128xf32>
    %c0_104 = arith.constant 0 : index
    %c0_105 = arith.constant 0 : index
    %666 = vector.load %arg3[%c0_104, %c0_105] : memref<8x128xf32, #tpu.memory_space<vmem>>, vector<8x128xf32>
    tpu.vector_store %arg3[%c0_104, %c0_105], %665 {strides = array<i32>} : memref<8x128xf32, #tpu.memory_space<vmem>>, vector<8x128xf32>,
    return
  }
}

</mosaic_0001>

<bundles_post_ra>
// kernel: model_forward.1
= control target key start
LH: loop header
LB: loop body
LE: loop exit
PB: predicated region body
PF: predicated region fallthrough
CT: control target
= control target key end

     0   :  { %v3085_v0 = vmov 0   ;;  %vm286_vm0 = vcmask 1041408   ;;  %v75_v40 = vlaneseq  ;;  %vm237_vm1 = vcmask 408576   ;;  %s3086_s11 = smov 32   ;;  %s3089_s28 = smov 96   ;;  %s3894_s1 = inlined_call_operand.vmem [shape: f32[126,1], index: 1, kind: input, shape index: {}]   ;;  %s3895_s0 = inlined_call_operand.vmem [shape: s32[126,1], index: 0, kind: input, shape index: {}]   ;;  %s3896_s2 = inlined_call_operand.vmem [shape: f32[96,512], index: 2, kind: input, shape index: {}]   ;;  %s3897_s3 = inlined_call_operand.vmem [shape: f32[8,128], index: 3, kind: output, shape index: {}]  }
   0x1   :  { %2958 = vset.pattern.permute.xlu1 %v3085_v0  ;;  %2957 = vset.pattern.permute.xlu0 %v3085_v0  ;;  %v59_v1 = vld [vmem:[%s3894_s1] sm:$0xff]  ;;  %v60_v3 = vld [vmem:[%s3894_s1 + $0x8] sm:$0xff]  ;;  %v46_v5 = vld [vmem:[%s3895_s0 + $0x18] sm:$0xff]  ;;  %s3090_s29 = smov 112   ;;  %s3091_s30 = smov 80  }
   0x2   :  { %v43_v2 = vld [vmem:[%s3895_s0] sm:$0xff]  ;;  %143 = vperm.xlu1 %2958, %v59_v1   ;;  %v44_v4 = vld [vmem:[%s3895_s0 + $0x8] sm:$0xff]  ;;  %v45_v6 = vld [vmem:[%s3895_s0 + $0x10] sm:$0xff]  ;;  %v3239_v41 = vand.u32 127, %v75_v40  ;;  %s3092_s4 = smov 48   ;;  %s3093_s5 = smov 16  }
   0x3   :  { %78 = vperm.xlu0 %2957, %v43_v2   ;;  %v62_v7 = vld [vmem:[%s3894_s1 + $0x18] sm:$0xff]  ;;  %v61_v8 = vld [vmem:[%s3894_s1 + $0x10] sm:$0xff]  ;;  %v36_v9 = vld [vmem:[%s3896_s2 + $0x140] sm:$0x3]  ;;  %s3094_s8 = smov 64   ;;  %s3098_s7 = smov 9  }
   0x4   :  { %2754 = vmatprep.subr.msk.mxu0 %vm286_vm0, %v36_v9  ;;  %v35_v10 = vld [vmem:[%s3896_s2 + $0x120] sm:$0xff]  ;;  %v48_v12 = vld [vmem:[%s3895_s0 + $0x28] sm:$0xff]  ;;  %v50_v19 = vld [vmem:[%s3895_s0 + $0x38] sm:$0xff] }
   0x5   :  { %2755 = vmatpush3.msk.msra.mxu0 %vm286_vm0, %v36_v9  ;;  %v34_v11 = vld [vmem:[%s3896_s2 + $0x100] sm:$0xff]  ;;  %v64_v15 = vld [vmem:[%s3894_s1 + $0x28] sm:$0xff]  ;;  %v49_v20 = vld [vmem:[%s3895_s0 + $0x30] sm:$0xff] }
   0x6   :  { %148 = vperm.xlu1 %2958, %v60_v3   ;;  %v47_v13 = vld [vmem:[%s3895_s0 + $0x20] sm:$0xff]  ;;  %2756 = vmatprep.subr.mxu0 %v35_v10  ;;  %v66_v22 = vld [vmem:[%s3894_s1 + $0x38] sm:$0xff]  ;;  %v65_v23 = vld [vmem:[%s3894_s1 + $0x30] sm:$0xff] }
   0x7   :  { %81 = vperm.xlu0 %2957, %v44_v4   ;;  %2757 = vmatpush3.msra.mxu0 %v35_v10  ;;  %v33_v14 = vld [vmem:[%s3896_s2 + $0xe0] sm:$0xff]  ;;  %v52_v24 = vld [vmem:[%s3895_s0 + $0x48] sm:$0xff]  ;;  %v54_v28 = vld [vmem:[%s3895_s0 + $0x58] sm:$0xff] }
   0x8   :  { %2758 = vmatprep.subr.mxu0 %v34_v11  ;;  %v63_v16 = vld [vmem:[%s3894_s1 + $0x20] sm:$0xff]  ;;  %v68_v26 = vld [vmem:[%s3894_s1 + $0x48] sm:$0xff]  ;;  %v53_v29 = vld [vmem:[%s3895_s0 + $0x50] sm:$0xff] }
   0x9   :  { %2759 = vmatpush3.msra.mxu0 %v34_v11  ;;  %v32_v17 = vld [vmem:[%s3896_s2 + $0xc0] sm:$0xff]  ;;  %v70_v30 = vld [vmem:[%s3894_s1 + $0x58] sm:$0xff]  ;;  %v69_v31 = vld [vmem:[%s3894_s1 + $0x50] sm:$0xff] }
   0xa   :  { %87 = vperm.xlu1 %2958, %v46_v5   ;;  %2760 = vmatprep.subr.mxu0 %v33_v14  ;;  %v31_v18 = vld [vmem:[%s3896_s2 + $0xa0] sm:$0xff]  ;;  %v56_v32 = vld [vmem:[%s3895_s0 + $0x68] sm:$0xff]  ;;  %v58_v36 = vld [vmem:[%s3895_s0 + $0x78] sm:$0x3f] }
   0xb   :  { %84 = vperm.xlu0 %2957, %v45_v6   ;;  %2761 = vmatpush3.msra.mxu0 %v33_v14  ;;  %v30_v21 = vld [vmem:[%s3896_s2 + $0x80] sm:$0xff]  ;;  %v72_v34 = vld [vmem:[%s3894_s1 + $0x68] sm:$0xff]  ;;  %v57_v37 = vld [vmem:[%s3895_s0 + $0x70] sm:$0xff] }
   0xc   :  { %2762 = vmatprep.subr.mxu0 %v32_v17  ;;  %v51_v25 = vld [vmem:[%s3895_s0 + $0x40] sm:$0xff]  ;;  %v74_v38 = vld [vmem:[%s3894_s1 + $0x78] sm:$0x3f]  ;;  %v73_v39 = vld [vmem:[%s3894_s1 + $0x70] sm:$0xff] }
   0xd   :  { %2763 = vmatpush3.msra.mxu0 %v32_v17  ;;  %v67_v27 = vld [vmem:[%s3894_s1 + $0x40] sm:$0xff] }
   0xe   :  { %158 = vperm.xlu1 %2958, %v62_v7   ;;  %2764 = vmatprep.subr.mxu0 %v31_v18  ;;  %v55_v33 = vld [vmem:[%s3895_s0 + $0x60] sm:$0xff] }
   0xf   :  { %153 = vperm.xlu0 %2957, %v61_v8   ;;  %2765 = vmatpush3.msra.mxu0 %v31_v18  ;;  %v71_v35 = vld [vmem:[%s3894_s1 + $0x60] sm:$0xff] }
  0x10   :  { %2766 = vmatprep.subr.mxu0 %v30_v21 }
  0x11   :  { %2767 = vmatpush3.msra.mxu0 %v30_v21 }
  0x12   :  { %93 = vperm.xlu1 %2958, %v48_v12  }
  0x13   :  { %90 = vperm.xlu0 %2957, %v47_v13  }
  0x16   :  { %168 = vperm.xlu1 %2958, %v64_v15  }
  0x17   :  { %163 = vperm.xlu0 %2957, %v63_v16  }
  0x1a   :  { %99 = vperm.xlu1 %2958, %v50_v19  }
  0x1b   :  { %96 = vperm.xlu0 %2957, %v49_v20  }
  0x1e   :  { %178 = vperm.xlu1 %2958, %v66_v22  }
  0x1f   :  { %173 = vperm.xlu0 %2957, %v65_v23  }
  0x22   :  { %105 = vperm.xlu1 %2958, %v52_v24  }
  0x23   :  { %102 = vperm.xlu0 %2957, %v51_v25  }
  0x26   :  { %188 = vperm.xlu1 %2958, %v68_v26   ;;  %v21_v26 = vld [vmem:[%s3896_s2 + $0x68] sm:$0xff] }
  0x27   :  { %183 = vperm.xlu0 %2957, %v67_v27   ;;  %v3279_v27 = vld [vmem:[%s3896_s2 + $0x60] sm:$0xff] }
  0x2a   :  { %111 = vperm.xlu1 %2958, %v54_v28   ;;  %v20_v28 = vld [vmem:[%s3896_s2 + $0x48] sm:$0xff] }
  0x2b   :  { %108 = vperm.xlu0 %2957, %v53_v29   ;;  %v3290_v29 = vld [vmem:[%s3896_s2 + $0x40] sm:$0xff] }
  0x2e   :  { %198 = vperm.xlu1 %2958, %v70_v30   ;;  %v19_v30 = vld [vmem:[%s3896_s2 + $0x28] sm:$0xff] }
  0x2f   :  { %193 = vperm.xlu0 %2957, %v69_v31   ;;  %v3301_v31 = vld [vmem:[%s3896_s2 + $0x20] sm:$0xff] }
  0x32   :  { %117 = vperm.xlu1 %2958, %v56_v32   ;;  %v18_v32 = vld [vmem:[%s3896_s2 + $0x8] sm:$0xff] }
  0x33   :  { %114 = vperm.xlu0 %2957, %v55_v33   ;;  %v3312_v33 = vld [vmem:[%s3896_s2] sm:$0xff] }
  0x36   :  { %208 = vperm.xlu1 %2958, %v72_v34   ;;  %v3087_v34 = vmov 0.0  }
  0x37   :  { %203 = vperm.xlu0 %2957, %v71_v35   ;;  %2792 = vmatprep.subr.mxu1 %v3087_v34  ;;  %v38_v35 = vld [vmem:[%s3896_s2 + $0x168] ss:$0 sm:$0xff] }
  0x38   :  { %2844 = vmatprep.subr.mxu0 %v3087_v34 }
  0x3a   :  { %123 = vperm.xlu1 %2958, %v58_v36   ;;  %v3329_v36 = vld [vmem:[%s3896_s2 + $0x160] ss:$0 sm:$0xff] }
  0x3b   :  { %120 = vperm.xlu0 %2957, %v57_v37  }
  0x3e   :  { %218 = vperm.xlu1 %2958, %v74_v38  }
  0x3f   :  { %213 = vperm.xlu0 %2957, %v73_v39  }
  0x42   :  { %658 = vrot.lane.b32.xlu1 %v21_v26, %s3086_s11 }
  0x43   :  { %656 = vrot.lane.b32.xlu0 %v3279_v27, %s3086_s11 }
  0x46   :  { %654 = vrot.lane.b32.xlu1 %v20_v28, %s3086_s11 }
  0x47   :  { %652 = vrot.lane.b32.xlu0 %v3290_v29, %s3086_s11 }
  0x4a   :  { %650 = vrot.lane.b32.xlu1 %v19_v30, %s3086_s11 }
  0x4b   :  { %648 = vrot.lane.b32.xlu0 %v3301_v31, %s3086_s11 }
  0x4e   :  { %646 = vrot.lane.b32.xlu1 %v18_v32, %s3086_s11 }
  0x4f   :  { %644 = vrot.lane.b32.xlu0 %v3312_v33, %s3086_s11 }
  0x52   :  { %672 = vrot.lane.b32.xlu1 %v38_v35, %s3086_s11 }
  0x53   :  { %670 = vrot.lane.b32.xlu0 %v3329_v36, %s3086_s11 }
  0x7d   :  { %v144_v42 = vpop.permute.xlu1 %143 }
  0x7e   :  { %v79_v43 = vpop.permute.xlu0 %78 }
  0x7f   :  { %vm125_vm2 = vcmp.eq.s32.totalorder %v79_v43, %v3239_v41 }
  0x80   :  { %v221_v44 = vsel %vm125_vm2, %v144_v42, 0.0 }
  0x81   :  { %2768 = vmatprep.mubr.msk.f32.mxu0 %vm237_vm1, %v221_v44  ;;  %v149_v45 = vpop.permute.xlu1 %148 }
  0x82   :  { %v82_v46 = vpop.permute.xlu0 %81 }
  0x83   :  { %vm126_vm3 = vcmp.eq.s32.totalorder %v82_v46, %v3239_v41 }
  0x84   :  { %v222_v47 = vsel %vm126_vm3, %v149_v45, 0.0 }
  0x85   :  { %2769 = vmatmul.mubr.msk.f32.vlgmr.msra.gmra.mxu0 %vm237_vm1, %v222_v47  ;;  %v88_v48 = vpop.permute.xlu1 %87 }
  0x86   :  { %v85_v49 = vpop.permute.xlu0 %84  ;;  %vm128_vm4 = vcmp.eq.s32.totalorder %v88_v48, %v3239_v41 }
  0x87   :  { %vm127_vm5 = vcmp.eq.s32.totalorder %v85_v49, %v3239_v41 }
  0x89   :  { %v159_v50 = vpop.permute.xlu1 %158 }
  0x8a   :  { %v154_v51 = vpop.permute.xlu0 %153  ;;  %v224_v52 = vsel %vm128_vm4, %v159_v50, 0.0  ;;  %vm554_vm4 = vcmask 261120  }
  0x8b   :  { %v223_v53 = vsel %vm127_vm5, %v154_v51, 0.0  ;;  %vm470_vm5 = vcmask 1045504  }
  0x8c   :  { %2771 = vmatprep.mubr.msk.f32.mxu0 %vm237_vm1, %v223_v53 }
  0x8d   :  { %2772 = vmatmul.mubr.msk.f32.gmra.mxu0 %vm237_vm1, %v224_v52  ;;  %v94_v54 = vpop.permute.xlu1 %93 }
  0x8e   :  { %v91_v55 = vpop.permute.xlu0 %90  ;;  %vm130_vm6 = vcmp.eq.s32.totalorder %v94_v54, %v3239_v41 }
  0x8f   :  { %vm129_vm7 = vcmp.eq.s32.totalorder %v91_v55, %v3239_v41 }
  0x91   :  { %v169_v56 = vpop.permute.xlu1 %168 }
  0x92   :  { %v164_v57 = vpop.permute.xlu0 %163  ;;  %v226_v58 = vsel %vm130_vm6, %v169_v56, 0.0 }
  0x93   :  { %v225_v59 = vsel %vm129_vm7, %v164_v57, 0.0 }
  0x94   :  { %2774 = vmatprep.mubr.msk.f32.mxu0 %vm237_vm1, %v225_v59 }
  0x95   :  { %2775 = vmatmul.mubr.msk.f32.gmra.mxu0 %vm237_vm1, %v226_v58  ;;  %v100_v60 = vpop.permute.xlu1 %99 }
  0x96   :  { %v97_v61 = vpop.permute.xlu0 %96  ;;  %vm132_vm8 = vcmp.eq.s32.totalorder %v100_v60, %v3239_v41 }
  0x97   :  { %vm131_vm9 = vcmp.eq.s32.totalorder %v97_v61, %v3239_v41 }
  0x99   :  { %v179_v62 = vpop.permute.xlu1 %178 }
  0x9a   :  { %v174_v63 = vpop.permute.xlu0 %173  ;;  %v228_v0 = vsel %vm132_vm8, %v179_v62, 0.0 }
  0x9b   :  { %v227_v1 = vsel %vm131_vm9, %v174_v63, 0.0 }
  0x9c   :  { %2777 = vmatprep.mubr.msk.f32.mxu0 %vm237_vm1, %v227_v1 }
  0x9d   :  { %2778 = vmatmul.mubr.msk.f32.gmra.mxu0 %vm237_vm1, %v228_v0  ;;  %v106_v2 = vpop.permute.xlu1 %105 }
  0x9e   :  { %v103_v3 = vpop.permute.xlu0 %102  ;;  %vm134_vm10 = vcmp.eq.s32.totalorder %v106_v2, %v3239_v41 }
  0x9f   :  { %vm133_vm11 = vcmp.eq.s32.totalorder %v103_v3, %v3239_v41  ;;  %v3382_v3 = vshrl.u32 %v75_v40, 7 }
  0xa1   :  { %v189_v4 = vpop.permute.xlu1 %188  ;;  %v438_v40 = vadd.s32 16, %v3382_v3 }
  0xa2   :  { %v184_v5 = vpop.permute.xlu0 %183  ;;  %v230_v6 = vsel %vm134_vm10, %v189_v4, 0.0  ;;  %v439_v4 = vmul.u32 6, %v3382_v3 }
  0xa3   :  { %v229_v7 = vsel %vm133_vm11, %v184_v5, 0.0  ;;  %v437_v5 = vadd.s32 8, %v3382_v3  ;;  %vm460_vm11 = vcmask 1031168  }
  0xa4   :  { %2780 = vmatprep.mubr.msk.f32.mxu0 %vm237_vm1, %v229_v7  ;;  %vm442_vm6 = vcmp.ge.s32.totalorder %v3239_v41, %v439_v4 }
  0xa5   :  { %2781 = vmatmul.mubr.msk.f32.gmra.mxu0 %vm237_vm1, %v230_v6  ;;  %v112_v8 = vpop.permute.xlu1 %111  ;;  %v445_v6 = vadd.s32 6, %v439_v4  ;;  %v440_v7 = vmul.u32 6, %v437_v5 }
  0xa6   :  { %v109_v9 = vpop.permute.xlu0 %108  ;;  %vm136_vm12 = vcmp.eq.s32.totalorder %v112_v8, %v3239_v41 }
  0xa7   :  { %vm135_vm13 = vcmp.eq.s32.totalorder %v109_v9, %v3239_v41  ;;  %vm448_vm7 = vcmp.lt.s32.totalorder %v3239_v41, %v445_v6  ;;  %v446_v8 = vadd.s32 6, %v440_v7  ;;  %v441_v9 = vmul.u32 6, %v438_v40 }
  0xa8   :  { %vm451_vm8 = vmand %vm442_vm6, %vm448_vm7  ;;  %vm443_vm9 = vcmp.ge.s32.totalorder %v3239_v41, %v440_v7  ;;  %vm2176_vm6 = vcmask 523264   ;;  %vm2128_vm7 = vcmask 1040384  }
  0xa9   :  { %v199_v10 = vpop.permute.xlu1 %198  ;;  %vm449_vm10 = vcmp.lt.s32.totalorder %v3239_v41, %v446_v8 }
  0xaa   :  { %v194_v11 = vpop.permute.xlu0 %193  ;;  %v232_v12 = vsel %vm136_vm12, %v199_v10, 0.0  ;;  %v447_v10 = vadd.s32 6, %v441_v9  ;;  %vm452_vm12 = vmand %vm443_vm9, %vm449_vm10  ;;  %vm2136_vm9 = vcmask 1043456   ;;  %vm2144_vm10 = vcmask 1046528  }
  0xab   :  { %v231_v13 = vsel %vm135_vm13, %v194_v11, 0.0  ;;  %v2622_v11 = vsel %vm451_vm8, 1.0, %v3087_v34  ;;  %vm444_vm13 = vcmp.ge.s32.totalorder %v3239_v41, %v441_v9  ;;  %vm2133_vm8 = vcmask 1042432  }
  0xac   :  { %2783 = vmatprep.mubr.msk.f32.mxu0 %vm237_vm1, %v231_v13 }
  0xad   :  { %2784 = vmatmul.mubr.msk.f32.gmra.mxu0 %vm237_vm1, %v232_v12  ;;  %v118_v14 = vpop.permute.xlu1 %117  ;;  %v2623_v12 = vsel %vm452_vm12, 1.0, %v3087_v34 }
  0xae   :  { %v115_v15 = vpop.permute.xlu0 %114  ;;  %vm138_vm14 = vcmp.eq.s32.totalorder %v118_v14, %v3239_v41 }
  0xaf   :  { %vm137_vm15 = vcmp.eq.s32.totalorder %v115_v15, %v3239_v41 }
  0xb1   :  { %v209_v16 = vpop.permute.xlu1 %208 }
  0xb2   :  { %v204_v17 = vpop.permute.xlu0 %203  ;;  %v234_v18 = vsel %vm138_vm14, %v209_v16, 0.0  ;;  %vm450_vm14 = vcmp.lt.s32.totalorder %v3239_v41, %v447_v10 }
  0xb3   :  { %v233_v19 = vsel %vm137_vm15, %v204_v17, 0.0  ;;  %vm453_vm15 = vmand %vm444_vm13, %vm450_vm14 }
  0xb4   :  { %2786 = vmatprep.mubr.msk.f32.mxu0 %vm237_vm1, %v233_v19  ;;  %v2624_v13 = vsel %vm453_vm15, 1.0, %v3087_v34  ;;  %vm2296_vm15 = vcmask 785408  }
  0xb5   :  { %2787 = vmatmul.mubr.msk.f32.gmra.mxu0 %vm237_vm1, %v234_v18  ;;  %v124_v20 = vpop.permute.xlu1 %123 }
  0xb6   :  { %v121_v21 = vpop.permute.xlu0 %120  ;;  %vm140_vm2 = vcmp.eq.s32.totalorder %v124_v20, %v3239_v41 }
  0xb7   :  { %vm139_vm3 = vcmp.eq.s32.totalorder %v121_v21, %v3239_v41 }
  0xb9   :  { %v219_v22 = vpop.permute.xlu1 %218 }
  0xba   :  { %v214_v23 = vpop.permute.xlu0 %213  ;;  %v236_v24 = vsel %vm140_vm2, %v219_v22, 0.0  ;;  %vm811_vm2 = vcmask 130048  }
  0xbb   :  { %v235_v25 = vsel %vm139_vm3, %v214_v23, 0.0  ;;  %vm2139_vm3 = vcmask 1044480  }
  0xbc   :  { %2789 = vmatprep.mubr.msk.f32.mxu0 %vm237_vm1, %v235_v25 }
  0xbd   :  { %2790 = vmatmul.mubr.msk.f32.gmra.mxu0 %vm237_vm1, %v236_v24  ;;  %vm3088_vm1 = vmmov 0   ;;  %v659_v42 = vpop.permute.xlu1 %658 }
  0xbe   :  { %2824 = vmatprep.mubr.msk.f32.mxu1 %vm3088_vm1, %v3087_v34  ;;  %2852 = vmatprep.mubr.msk.f32.mxu0 %vm3088_vm1, %v3087_v34  ;;  %v657_v43 = vpop.permute.xlu0 %656 }
  0xbf   :  { %v3341_v44 = vsel %vm554_vm4, %v657_v43, %v659_v42 }
  0xc0   :  { %2845 = vmatpush3.msra.mxu0 %v3341_v44 }
  0xc1   :  { %2846 = vmatprep.subr.mxu0 %v3087_v34  ;;  %v655_v47 = vpop.permute.xlu1 %654 }
  0xc2   :  { %v653_v48 = vpop.permute.xlu0 %652 }
  0xc3   :  { %v3350_v50 = vsel %vm554_vm4, %v653_v48, %v655_v47 }
  0xc4   :  { %2847 = vmatpush3.msra.mxu0 %v3350_v50 }
  0xc5   :  { %2848 = vmatprep.subr.mxu0 %v3087_v34  ;;  %v651_v52 = vpop.permute.xlu1 %650 }
  0xc6   :  { %v649_v53 = vpop.permute.xlu0 %648 }
  0xc7   :  { %v3355_v54 = vsel %vm554_vm4, %v649_v53, %v651_v52 }
  0xc8   :  { %2849 = vmatpush3.msra.mxu0 %v3355_v54 }
  0xc9   :  { %2850 = vmatprep.subr.mxu0 %v3087_v34  ;;  %v647_v56 = vpop.permute.xlu1 %646 }
  0xca   :  { %v645_v57 = vpop.permute.xlu0 %644 }
  0xcb   :  { %v3360_v59 = vsel %vm554_vm4, %v645_v57, %v647_v56 }
  0xcc   :  { %2851 = vmatpush3.msra.mxu0 %v3360_v59 }
  0xcd   :  { %2866 = vmatprep.subr.mxu0 %v3087_v34  ;;  %2853 = vmatmul.mubr.f32.vlgmr.msra.gmra.mxu0 %v3087_v34  ;;  %v673_v14 = vpop.permute.xlu1 %672 }
  0xce   :  { %2867 = vmatpush3.msra.mxu0 %v3341_v44  ;;  %2874 = vmatprep.mubr.msk.f32.mxu0 %vm3088_vm1, %v3087_v34  ;;  %v671_v15 = vpop.permute.xlu0 %670 }
  0xcf   :  { %2868 = vmatprep.subr.mxu0 %v3087_v34  ;;  %v3428_v16 = vsel %vm554_vm4, %v671_v15, %v673_v14 }
  0xd0   :  { %2869 = vmatpush3.msra.mxu0 %v3350_v50 }
  0xd1   :  { %2870 = vmatprep.subr.mxu0 %v3087_v34 }
  0xd2   :  { %2871 = vmatpush3.msra.mxu0 %v3355_v54 }
  0xd3   :  { %2872 = vmatprep.subr.mxu0 %v3087_v34 }
  0xd4   :  { %2873 = vmatpush3.msra.mxu0 %v3360_v59 }
  0xd5   :  { %2888 = vmatprep.subr.mxu0 %v3087_v34 }
 0x145   :  { %v3334_v37 = vpop.f32.mrf.mxu0 }
 0x147   :  { %v3336_v38 = vpop.f32.mrf.mxu0 }
 0x14d   :  { %v3338_v39 = vpop.f32.mrf.mxu0 }
 0x14f   :  { %v3344_v45 = vpop.f32.mrf.mxu0 }
 0x155   :  { %v3347_v46 = vpop.f32.mrf.mxu0 }
 0x157   :  { %v376_v49 = vpop.f32.mrf.mxu0 }
 0x15d   :  { %v2779_v51 = vpop.f32.mrf.mxu0 }
 0x15f   :  { %v386_v55 = vpop.f32.mrf.mxu0 }
 0x165   :  { %v2782_v58 = vpop.f32.mrf.mxu0 }
 0x167   :  { %v396_v60 = vpop.f32.mrf.mxu0 }
 0x16d   :  { %v2785_v61 = vpop.f32.mrf.mxu0 }
 0x16f   :  { %v406_v62 = vpop.f32.mrf.mxu0 }
 0x175   :  { %v2788_v63 = vpop.f32.mrf.mxu0 }
 0x177   :  { %v416_v0 = vpop.f32.mrf.mxu0 }
 0x17d   :  { %v2791_v1 = vpop.f32.mrf.mxu0 }
 0x17e   :  { %2793 = vmatpush3.msk.msra.mxu1 %vm470_vm5, %v2791_v1 }
 0x17f   :  { %v426_v2 = vpop.f32.mrf.mxu0  ;;  %2794 = vmatprep.subr.mxu1 %v3087_v34 }
 0x180   :  { %2795 = vmatpush3.msra.mxu1 %v426_v2 }
 0x181   :  { %2796 = vmatprep.subr.mxu1 %v3087_v34 }
 0x182   :  { %2797 = vmatpush3.msra.mxu1 %v2788_v63 }
 0x183   :  { %2798 = vmatprep.subr.mxu1 %v3087_v34 }
 0x184   :  { %2799 = vmatpush3.msra.mxu1 %v416_v0 }
 0x185   :  { %2800 = vmatprep.subr.mxu1 %v3087_v34 }
 0x186   :  { %2801 = vmatpush3.msra.mxu1 %v2785_v61 }
 0x187   :  { %2802 = vmatprep.subr.mxu1 %v3087_v34 }
 0x188   :  { %2803 = vmatpush3.msra.mxu1 %v406_v62 }
 0x189   :  { %2804 = vmatprep.subr.mxu1 %v3087_v34 }
 0x18a   :  { %2805 = vmatpush3.msra.mxu1 %v2782_v58 }
 0x18b   :  { %2806 = vmatprep.subr.mxu1 %v3087_v34 }
 0x18c   :  { %2807 = vmatpush3.msra.mxu1 %v396_v60 }
 0x18d   :  { %2808 = vmatprep.subr.mxu1 %v3087_v34  ;;  %v745_v17 = vpop.f32.mrf.mxu0 }
 0x18e   :  { %2809 = vmatpush3.msra.mxu1 %v2779_v51  ;;  %v746_v18 = vadd.f32 %v745_v17, %v3428_v16 }
 0x18f   :  { %2810 = vmatprep.subr.mxu1 %v3087_v34  ;;  %v2854_v19 = vpop.f32.mrf.mxu0 }
 0x190   :  { %2811 = vmatpush3.msra.mxu1 %v386_v55  ;;  %757 = vrot.lane.b32.xlu1 %v746_v18, %s3089_s28  ;;  %v775_v20 = vrot.slane %v746_v18, 2 }
 0x191   :  { %2812 = vmatprep.subr.mxu1 %v3087_v34 }
 0x192   :  { %2813 = vmatpush3.msra.mxu1 %v3347_v46  ;;  %784 = vrot.lane.b32.xlu0 %v775_v20, %s3089_s28 }
 0x193   :  { %2814 = vmatprep.subr.mxu1 %v3087_v34 }
 0x194   :  { %2815 = vmatpush3.msra.mxu1 %v376_v49 }
 0x195   :  { %2816 = vmatprep.subr.mxu1 %v3087_v34 }
 0x196   :  { %2817 = vmatpush3.msra.mxu1 %v3338_v39 }
 0x197   :  { %2818 = vmatprep.subr.mxu1 %v3087_v34 }
 0x198   :  { %2819 = vmatpush3.msra.mxu1 %v3344_v45 }
 0x199   :  { %2820 = vmatprep.subr.mxu1 %v3087_v34 }
 0x19a   :  { %2821 = vmatpush3.msra.mxu1 %v3334_v37 }
 0x19b   :  { %2822 = vmatprep.subr.mxu1 %v3087_v34 }
 0x19c   :  { %2823 = vmatpush3.msra.mxu1 %v3336_v38 }
 0x19d   :  { %2825 = vmatmul.mubr.msk.f32.vlgmr.msra.gmra.mxu1 %vm460_vm11, %v2622_v11  ;;  %2833 = vmatprep.subr.mxu1 %v3279_v27 }
 0x19e   :  { %2827 = vmatprep.mubr.msk.f32.mxu1 %vm3088_vm1, %v3087_v34  ;;  %2834 = vmatpush3.msra.mxu1 %v3279_v27 }
 0x19f   :  { %2835 = vmatprep.subr.mxu1 %v3290_v29 }
 0x1a0   :  { %2836 = vmatpush3.msra.mxu1 %v3290_v29 }
 0x1a1   :  { %2828 = vmatmul.mubr.msk.f32.gmra.mxu1 %vm460_vm11, %v2623_v12  ;;  %2837 = vmatprep.subr.mxu1 %v3301_v31 }
 0x1a2   :  { %2830 = vmatprep.mubr.msk.f32.mxu1 %vm3088_vm1, %v3087_v34  ;;  %2838 = vmatpush3.msra.mxu1 %v3301_v31 }
 0x1a3   :  { %2839 = vmatprep.subr.mxu1 %v3312_v33 }
 0x1a4   :  { %2840 = vmatpush3.msra.mxu1 %v3312_v33 }
 0x1a5   :  { %2831 = vmatmul.mubr.msk.f32.gmra.mxu1 %vm460_vm11, %v2624_v13  ;;  %2855 = vmatprep.subr.mxu1 %v3087_v34 }
 0x204   :  { %v785_v43 = vpop.permute.xlu0 %784 }
 0x25d   :  { %v540_v21 = vpop.f32.mrf.mxu1 }
 0x25e   :  { %2841 = vmatprep.mubr.msk.f32.mxu1 %vm554_vm4, %v540_v21 }
 0x25f   :  { %v2826_v22 = vpop.f32.mrf.mxu1 }
 0x261   :  { %v545_v23 = vpop.f32.mrf.mxu1 }
 0x262   :  { %2842 = vmatmul.mubr.msk.f32.vlgmr.msra.gmra.mxu1 %vm554_vm4, %v545_v23 }
 0x263   :  { %2856 = vmatpush3.msra.mxu1 %v3341_v44  ;;  %v2829_v24 = vpop.f32.mrf.mxu1  ;;  %2863 = vmatprep.mubr.msk.f32.mxu1 %vm3088_vm1, %v3087_v34 }
 0x264   :  { %2857 = vmatprep.subr.mxu1 %v3087_v34 }
 0x265   :  { %2858 = vmatpush3.msra.mxu1 %v3350_v50  ;;  %v3440_v25 = vpop.f32.mrf.mxu1 }
 0x266   :  { %2859 = vmatprep.subr.mxu1 %v3087_v34 }
 0x267   :  { %2860 = vmatpush3.msra.mxu1 %v3355_v54  ;;  %v2832_v26 = vpop.f32.mrf.mxu1 }
 0x268   :  { %2861 = vmatprep.subr.mxu1 %v3087_v34 }
 0x269   :  { %2862 = vmatpush3.msra.mxu1 %v3360_v59 }
 0x26a   :  { %2877 = vmatprep.subr.mxu1 %v3087_v34 }
 0x322   :  { %v2843_v27 = vpop.f32.mrf.mxu1 }
 0x323   :  { %v3448_v28 = vadd.f32 %v2843_v27, %v3329_v36 }
 0x324   :  { %v627_v29 = vpop.f32.mrf.mxu1 }
 0x325   :  { %v3451_v30 = vadd.f32 %v627_v29, %v3329_v36  ;;  %v777_v31 = vadd.f32 %v775_v20, %v3448_v28  ;;  %v758_v36 = vpop.permute.xlu1 %757 }
 0x327   :  { %v749_v32 = vadd.f32 %v746_v18, %v3451_v30  ;;  %v2632_v33 = vmul.f32 -1.442695, %v777_v31 }
 0x329   :  { %v2631_v35 = vmul.f32 -1.442695, %v749_v32  ;;  %2961 = vpow2.f32 %v2632_v33 }
 0x32b   :  { %2963 = vpow2.f32 %v2631_v35 }
 0x336   :  { %v2962_v37 = vpop.eup %2961 }
 0x337   :  { %v781_v38 = vadd.f32 1.0, %v2962_v37 }
 0x338   :  { %v2964_v39 = vpop.eup %2963 }
 0x339   :  { %v753_v42 = vadd.f32 1.0, %v2964_v39  ;;  %2965 = vrcp.f32 %v781_v38 }
 0x33b   :  { %2967 = vrcp.f32 %v753_v42 }
 0x346   :  { %v2966_v45 = vpop.eup %2965 }
 0x347   :  { %v787_v46 = vmul.f32 %v2966_v45, %v785_v43  ;;  %v794_v57 = vsub.f32 1.0, %v2966_v45  ;;  %v800_v60 = vmul.f32 0.0, %v2966_v45 }
 0x348   :  { %v2968_v47 = vpop.eup %2967 }
 0x349   :  { %v760_v48 = vmul.f32 %v2968_v47, %v758_v36  ;;  %789 = vrot.lane.b32.xlu0 %v787_v46, %s3086_s11  ;;  %v767_v62 = vsub.f32 1.0, %v2968_v47  ;;  %v773_v1 = vmul.f32 0.0, %v2968_v47 }
 0x34b   :  { %762 = vrot.lane.b32.xlu1 %v760_v48, %s3086_s11 }
 0x3bb   :  { %v790_v49 = vpop.permute.xlu0 %789 }
 0x3bc   :  { %v792_v51 = vadd.f32 %v790_v49, %v3448_v28 }
 0x3bd   :  { %v763_v52 = vpop.permute.xlu1 %762 }
 0x3be   :  { %2969 = vtanh.f32 %v792_v51  ;;  %v765_v53 = vadd.f32 %v763_v52, %v3451_v30 }
 0x3c0   :  { %2971 = vtanh.f32 %v765_v53 }
 0x3cb   :  { %v2970_v55 = vpop.eup %2969 }
 0x3cc   :  { %796 = vrot.lane.b32.xlu0 %v2970_v55, %s3090_s29 }
 0x3cd   :  { %v2972_v56 = vpop.eup %2971 }
 0x3ce   :  { %769 = vrot.lane.b32.xlu1 %v2972_v56, %s3090_s29 }
 0x43e   :  { %v797_v58 = vpop.permute.xlu0 %796 }
 0x43f   :  { %v799_v61 = vmul.f32 %v797_v58, %v794_v57 }
 0x440   :  { %v770_v63 = vpop.permute.xlu1 %769 }
 0x441   :  { %v3461_v0 = vadd.f32 %v800_v60, %v799_v61  ;;  %v772_v2 = vmul.f32 %v770_v63, %v767_v62 }
 0x443   :  { %v774_v4 = vadd.f32 %v773_v1, %v772_v2  ;;  %v807_v5 = vrot.slane %v3461_v0, 6 }
 0x445   :  { %808 = vrot.lane.b32.xlu1 %v807_v5, %s3091_s30  ;;  %803 = vrot.lane.b32.xlu0 %v774_v4, %s3090_s29 }
 0x4b7   :  { %v3466_v6 = vpop.permute.xlu0 %803  ;;  %v809_v7 = vpop.permute.xlu1 %808 }
 0x4b8   :  { %v812_v40 = vsel %vm811_vm2, %v3466_v6, %v809_v7 }
 0x4b9   :  { %2864 = vmatmul.mubr.msk.f32.vlgmr.msra.gmra.mxu1 %vm554_vm4, %v812_v40  ;;  %v943_v31 = vrot.slane %v812_v40, 4  ;;  %v912_v32 = vrot.slane %v812_v40, 6 }
 0x4ba   :  { %2878 = vmatpush3.msra.mxu1 %v3341_v44  ;;  %2885 = vmatprep.mubr.msk.f32.mxu1 %vm3088_vm1, %v3087_v34 }
 0x4bb   :  { %2879 = vmatprep.subr.mxu1 %v3087_v34 }
 0x4bc   :  { %2880 = vmatpush3.msra.mxu1 %v3350_v50 }
 0x4bd   :  { %2881 = vmatprep.subr.mxu1 %v3087_v34 }
 0x4be   :  { %2882 = vmatpush3.msra.mxu1 %v3355_v54 }
 0x4bf   :  { %2883 = vmatprep.subr.mxu1 %v3087_v34 }
 0x4c0   :  { %2884 = vmatpush3.msra.mxu1 %v3360_v59 }
 0x4c1   :  { %2899 = vmatprep.subr.mxu1 %v3087_v34 }
 0x579   :  { %v882_v8 = vpop.f32.mrf.mxu1 }
 0x57a   :  { %v883_v9 = vadd.f32 %v882_v8, %v3428_v16 }
 0x57b   :  { %v2865_v10 = vpop.f32.mrf.mxu1 }
 0x57c   :  { %v887_v11 = vrot.slane %v883_v9, 6  ;;  %v918_v12 = vrot.slane %v883_v9, 4 }
 0x57e   :  { %927 = vrot.lane.b32.xlu0 %v918_v12, %s3089_s28  ;;  %896 = vrot.lane.b32.xlu1 %v887_v11, %s3089_s28  ;;  %v889_v13 = vadd.f32 %v887_v11, %v3451_v30  ;;  %v920_v14 = vadd.f32 %v918_v12, %v3448_v28 }
 0x580   :  { %v2634_v15 = vmul.f32 -1.442695, %v889_v13  ;;  %v2635_v17 = vmul.f32 -1.442695, %v920_v14 }
 0x582   :  { %2973 = vpow2.f32 %v2634_v15 }
 0x583   :  { %2975 = vpow2.f32 %v2635_v17 }
 0x58f   :  { %v2974_v18 = vpop.eup %2973 }
 0x590   :  { %v2976_v19 = vpop.eup %2975  ;;  %v893_v20 = vadd.f32 1.0, %v2974_v18 }
 0x591   :  { %v924_v21 = vadd.f32 1.0, %v2976_v19 }
 0x592   :  { %2977 = vrcp.f32 %v893_v20 }
 0x593   :  { %2979 = vrcp.f32 %v924_v21 }
 0x59f   :  { %v2978_v22 = vpop.eup %2977 }
 0x5a0   :  { %v2980_v23 = vpop.eup %2979  ;;  %v906_v51 = vsub.f32 1.0, %v2978_v22 }
 0x5a1   :  { %v937_v45 = vsub.f32 1.0, %v2980_v23 }
 0x5f0   :  { %v928_v24 = vpop.permute.xlu0 %927  ;;  %v897_v26 = vpop.permute.xlu1 %896 }
 0x5f1   :  { %v930_v27 = vmul.f32 %v2980_v23, %v928_v24  ;;  %v899_v29 = vmul.f32 %v2978_v22, %v897_v26 }
 0x5f3   :  { %932 = vrot.lane.b32.xlu0 %v930_v27, %s3086_s11  ;;  %901 = vrot.lane.b32.xlu1 %v899_v29, %s3086_s11 }
 0x5f7   :  { %944 = vrot.lane.b32.xlu1 %v943_v31, %s3092_s4 }
 0x5fb   :  { %913 = vrot.lane.b32.xlu1 %v912_v32, %s3093_s5 }
 0x665   :  { %v933_v33 = vpop.permute.xlu0 %932  ;;  %v902_v35 = vpop.permute.xlu1 %901 }
 0x666   :  { %v935_v37 = vadd.f32 %v933_v33, %v3448_v28  ;;  %v904_v38 = vadd.f32 %v902_v35, %v3451_v30 }
 0x668   :  { %2981 = vtanh.f32 %v935_v37 }
 0x669   :  { %2983 = vtanh.f32 %v904_v38  ;;  %v945_v43 = vpop.permute.xlu1 %944 }
 0x66a   :  { %v947_v47 = vmul.f32 %v2980_v23, %v945_v43 }
 0x66d   :  { %v914_v48 = vpop.permute.xlu1 %913 }
 0x66e   :  { %v916_v53 = vmul.f32 %v2978_v22, %v914_v48 }
 0x675   :  { %v2982_v39 = vpop.eup %2981 }
 0x676   :  { %939 = vrot.lane.b32.xlu0 %v2982_v39, %s3090_s29  ;;  %v2984_v42 = vpop.eup %2983 }
 0x67a   :  { %908 = vrot.lane.b32.xlu0 %v2984_v42, %s3090_s29 }
 0x6e8   :  { %v940_v46 = vpop.permute.xlu0 %939 }
 0x6e9   :  { %v942_v36 = vmul.f32 %v940_v46, %v937_v45 }
 0x6eb   :  { %v3494_v49 = vadd.f32 %v947_v47, %v942_v36 }
 0x6ec   :  { %v909_v52 = vpop.permute.xlu0 %908 }
 0x6ed   :  { %v911_v55 = vmul.f32 %v909_v52, %v906_v51  ;;  %v954_v56 = vrot.slane %v3494_v49, 2 }
 0x6ef   :  { %v917_v57 = vadd.f32 %v916_v53, %v911_v55  ;;  %955 = vrot.lane.b32.xlu1 %v954_v56, %s3091_s30 }
 0x6f1   :  { %950 = vrot.lane.b32.xlu0 %v917_v57, %s3090_s29 }
 0x761   :  { %v956_v58 = vpop.permute.xlu1 %955 }
 0x763   :  { %v3499_v60 = vpop.permute.xlu0 %950 }
 0x764   :  { %v958_v61 = vsel %vm811_vm2, %v3499_v60, %v956_v58 }
 0x765   :  { %v960_v62 = vrot.slane %v958_v61, 2  ;;  %v1059_v21 = vrot.slane %v958_v61, 6 }
 0x767   :  { %2875 = vmatmul.mubr.msk.f32.vlgmr.msra.gmra.mxu0 %vm554_vm4, %v960_v62 }
 0x768   :  { %2889 = vmatpush3.msra.mxu0 %v3341_v44  ;;  %2896 = vmatprep.mubr.msk.f32.mxu0 %vm3088_vm1, %v3087_v34 }
 0x769   :  { %2890 = vmatprep.subr.mxu0 %v3087_v34 }
 0x76a   :  { %2891 = vmatpush3.msra.mxu0 %v3350_v50 }
 0x76b   :  { %2892 = vmatprep.subr.mxu0 %v3087_v34 }
 0x76c   :  { %2893 = vmatpush3.msra.mxu0 %v3355_v54 }
 0x76d   :  { %2894 = vmatprep.subr.mxu0 %v3087_v34 }
 0x76e   :  { %2895 = vmatpush3.msra.mxu0 %v3360_v59 }
 0x76f   :  { %2910 = vmatprep.subr.mxu0 %v3087_v34 }
 0x827   :  { %v1029_v63 = vpop.f32.mrf.mxu0 }
 0x828   :  { %v1030_v1 = vadd.f32 %v1029_v63, %v3428_v16 }
 0x829   :  { %v2876_v2 = vpop.f32.mrf.mxu0 }
 0x82a   :  { %v1034_v4 = vrot.slane %v1030_v1, 4  ;;  %v1065_v5 = vrot.slane %v1030_v1, 6 }
 0x82c   :  { %1074 = vrot.lane.b32.xlu0 %v1065_v5, %s3089_s28  ;;  %1043 = vrot.lane.b32.xlu1 %v1034_v4, %s3089_s28  ;;  %v1036_v7 = vadd.f32 %v1034_v4, %v3451_v30  ;;  %v1067_v40 = vadd.f32 %v1065_v5, %v3448_v28 }
 0x82e   :  { %v2637_v8 = vmul.f32 -1.442695, %v1036_v7  ;;  %v2638_v9 = vmul.f32 -1.442695, %v1067_v40 }
 0x830   :  { %2985 = vpow2.f32 %v2637_v8 }
 0x831   :  { %2987 = vpow2.f32 %v2638_v9 }
 0x83d   :  { %v2986_v10 = vpop.eup %2985 }
 0x83e   :  { %v2988_v11 = vpop.eup %2987  ;;  %v1040_v12 = vadd.f32 1.0, %v2986_v10 }
 0x83f   :  { %v1071_v13 = vadd.f32 1.0, %v2988_v11 }
 0x840   :  { %2989 = vrcp.f32 %v1040_v12 }
 0x841   :  { %2991 = vrcp.f32 %v1071_v13 }
 0x84d   :  { %v2990_v14 = vpop.eup %2989 }
 0x84e   :  { %v2992_v15 = vpop.eup %2991  ;;  %v1053_v42 = vsub.f32 1.0, %v2990_v14 }
 0x84f   :  { %v1084_v32 = vsub.f32 1.0, %v2992_v15 }
 0x89e   :  { %v1075_v17 = vpop.permute.xlu0 %1074  ;;  %v1044_v18 = vpop.permute.xlu1 %1043 }
 0x89f   :  { %v1077_v19 = vmul.f32 %v2992_v15, %v1075_v17  ;;  %v1046_v20 = vmul.f32 %v2990_v14, %v1044_v18 }
 0x8a1   :  { %1079 = vrot.lane.b32.xlu0 %v1077_v19, %s3086_s11  ;;  %1048 = vrot.lane.b32.xlu1 %v1046_v20, %s3086_s11 }
 0x8a5   :  { %1090 = vrot.lane.b32.xlu1 %v958_v61, %s3092_s4 }
 0x8a9   :  { %1060 = vrot.lane.b32.xlu1 %v1059_v21, %s3093_s5 }
 0x913   :  { %v1080_v22 = vpop.permute.xlu0 %1079  ;;  %v1049_v23 = vpop.permute.xlu1 %1048 }
 0x914   :  { %v1082_v24 = vadd.f32 %v1080_v22, %v3448_v28  ;;  %v1051_v26 = vadd.f32 %v1049_v23, %v3451_v30 }
 0x916   :  { %2993 = vtanh.f32 %v1082_v24 }
 0x917   :  { %2995 = vtanh.f32 %v1051_v26  ;;  %v1091_v31 = vpop.permute.xlu1 %1090 }
 0x918   :  { %v1093_v35 = vmul.f32 %v2992_v15, %v1091_v31 }
 0x91b   :  { %v1061_v38 = vpop.permute.xlu1 %1060 }
 0x91c   :  { %v1063_v45 = vmul.f32 %v2990_v14, %v1061_v38 }
 0x923   :  { %v2994_v27 = vpop.eup %2993 }
 0x924   :  { %1086 = vrot.lane.b32.xlu0 %v2994_v27, %s3090_s29  ;;  %v2996_v29 = vpop.eup %2995 }
 0x928   :  { %1055 = vrot.lane.b32.xlu0 %v2996_v29, %s3090_s29 }
 0x996   :  { %v1087_v33 = vpop.permute.xlu0 %1086 }
 0x997   :  { %v1089_v37 = vmul.f32 %v1087_v33, %v1084_v32 }
 0x999   :  { %v3527_v39 = vadd.f32 %v1093_v35, %v1089_v37 }
 0x99a   :  { %v1056_v43 = vpop.permute.xlu0 %1055 }
 0x99b   :  { %v1058_v46 = vmul.f32 %v1056_v43, %v1053_v42  ;;  %v1100_v47 = vrot.slane %v3527_v39, 6 }
 0x99d   :  { %v1064_v36 = vadd.f32 %v1063_v45, %v1058_v46  ;;  %1101 = vrot.lane.b32.xlu1 %v1100_v47, %s3091_s30 }
 0x99f   :  { %1096 = vrot.lane.b32.xlu0 %v1064_v36, %s3090_s29 }
 0xa0f   :  { %v1102_v48 = vpop.permute.xlu1 %1101 }
 0xa11   :  { %v3532_v51 = vpop.permute.xlu0 %1096 }
 0xa12   :  { %v1104_v52 = vsel %vm811_vm2, %v3532_v51, %v1102_v48 }
 0xa13   :  { %v1106_v53 = vrot.slane %v1104_v52, 4  ;;  %v1205_v13 = vrot.slane %v1104_v52, 6 }
 0xa15   :  { %2886 = vmatmul.mubr.msk.f32.vlgmr.msra.gmra.mxu1 %vm554_vm4, %v1106_v53 }
 0xa16   :  { %2900 = vmatpush3.msra.mxu1 %v3341_v44  ;;  %2907 = vmatprep.mubr.msk.f32.mxu1 %vm3088_vm1, %v3087_v34 }
 0xa17   :  { %2901 = vmatprep.subr.mxu1 %v3087_v34 }
 0xa18   :  { %2902 = vmatpush3.msra.mxu1 %v3350_v50 }
 0xa19   :  { %2903 = vmatprep.subr.mxu1 %v3087_v34 }
 0xa1a   :  { %2904 = vmatpush3.msra.mxu1 %v3355_v54 }
 0xa1b   :  { %2905 = vmatprep.subr.mxu1 %v3087_v34 }
 0xa1c   :  { %2906 = vmatpush3.msra.mxu1 %v3360_v59 }
 0xa1d   :  { %2921 = vmatprep.subr.mxu1 %v3087_v34 }
 0xad5   :  { %v1175_v55 = vpop.f32.mrf.mxu1 }
 0xad6   :  { %v1176_v56 = vadd.f32 %v1175_v55, %v3428_v16 }
 0xad7   :  { %v2887_v57 = vpop.f32.mrf.mxu1 }
 0xad8   :  { %1218 = vrot.lane.b32.xlu0 %v1176_v56, %s3089_s28  ;;  %v1180_v58 = vrot.slane %v1176_v56, 2  ;;  %v1211_v61 = vadd.f32 %v1176_v56, %v3448_v28 }
 0xada   :  { %1189 = vrot.lane.b32.xlu1 %v1180_v58, %s3089_s28  ;;  %v1182_v62 = vadd.f32 %v1180_v58, %v3451_v30  ;;  %v2641_v63 = vmul.f32 -1.442695, %v1211_v61 }
 0xadc   :  { %v2640_v1 = vmul.f32 -1.442695, %v1182_v62  ;;  %2997 = vpow2.f32 %v2641_v63 }
 0xade   :  { %2999 = vpow2.f32 %v2640_v1 }
 0xae9   :  { %v2998_v2 = vpop.eup %2997 }
 0xaea   :  { %v1215_v5 = vadd.f32 1.0, %v2998_v2 }
 0xaeb   :  { %v3000_v4 = vpop.eup %2999 }
 0xaec   :  { %v1186_v7 = vadd.f32 1.0, %v3000_v4  ;;  %3001 = vrcp.f32 %v1215_v5 }
 0xaee   :  { %3003 = vrcp.f32 %v1186_v7 }
 0xaf9   :  { %v3002_v40 = vpop.eup %3001 }
 0xafa   :  { %v1228_v22 = vsub.f32 1.0, %v3002_v40 }
 0xafb   :  { %v3004_v10 = vpop.eup %3003 }
 0xafc   :  { %v1199_v31 = vsub.f32 1.0, %v3004_v10 }
 0xb4a   :  { %v1219_v8 = vpop.permute.xlu0 %1218 }
 0xb4b   :  { %v1221_v9 = vmul.f32 %v3002_v40, %v1219_v8 }
 0xb4c   :  { %v1190_v11 = vpop.permute.xlu1 %1189 }
 0xb4d   :  { %v1192_v12 = vmul.f32 %v3004_v10, %v1190_v11  ;;  %1223 = vrot.lane.b32.xlu0 %v1221_v9, %s3086_s11 }
 0xb4f   :  { %1194 = vrot.lane.b32.xlu1 %v1192_v12, %s3086_s11 }
 0xb53   :  { %1234 = vrot.lane.b32.xlu1 %v1106_v53, %s3092_s4 }
 0xb57   :  { %1206 = vrot.lane.b32.xlu1 %v1205_v13, %s3093_s5 }
 0xbbf   :  { %v1224_v14 = vpop.permute.xlu0 %1223 }
 0xbc0   :  { %v1226_v15 = vadd.f32 %v1224_v14, %v3448_v28 }
 0xbc1   :  { %v1195_v17 = vpop.permute.xlu1 %1194 }
 0xbc2   :  { %3005 = vtanh.f32 %v1226_v15  ;;  %v1197_v18 = vadd.f32 %v1195_v17, %v3451_v30 }
 0xbc4   :  { %3007 = vtanh.f32 %v1197_v18 }
 0xbc5   :  { %v1235_v21 = vpop.permute.xlu1 %1234 }
 0xbc6   :  { %v1237_v24 = vmul.f32 %v3002_v40, %v1235_v21 }
 0xbc9   :  { %v1207_v27 = vpop.permute.xlu1 %1206 }
 0xbca   :  { %v1209_v33 = vmul.f32 %v3004_v10, %v1207_v27 }
 0xbcf   :  { %v3006_v19 = vpop.eup %3005 }
 0xbd0   :  { %1230 = vrot.lane.b32.xlu0 %v3006_v19, %s3090_s29 }
 0xbd1   :  { %v3008_v20 = vpop.eup %3007 }
 0xbd4   :  { %1201 = vrot.lane.b32.xlu0 %v3008_v20, %s3090_s29 }
 0xc42   :  { %v1231_v23 = vpop.permute.xlu0 %1230 }
 0xc43   :  { %v1233_v26 = vmul.f32 %v1231_v23, %v1228_v22 }
 0xc45   :  { %v3560_v29 = vadd.f32 %v1237_v24, %v1233_v26 }
 0xc46   :  { %v1202_v32 = vpop.permute.xlu0 %1201 }
 0xc47   :  { %v1204_v35 = vmul.f32 %v1202_v32, %v1199_v31  ;;  %v1244_v37 = vrot.slane %v3560_v29, 2 }
 0xc49   :  { %v1210_v38 = vadd.f32 %v1209_v33, %v1204_v35  ;;  %1245 = vrot.lane.b32.xlu1 %v1244_v37, %s3091_s30 }
 0xc4b   :  { %1240 = vrot.lane.b32.xlu0 %v1210_v38, %s3090_s29 }
 0xcbb   :  { %v1246_v42 = vpop.permute.xlu1 %1245 }
 0xcbd   :  { %v3565_v43 = vpop.permute.xlu0 %1240 }
 0xcbe   :  { %v1248_v45 = vsel %vm811_vm2, %v3565_v43, %v1246_v42 }
 0xcbf   :  { %v1250_v46 = vrot.slane %v1248_v45, 6 }
 0xcc1   :  { %2897 = vmatmul.mubr.msk.f32.vlgmr.msra.gmra.mxu0 %vm554_vm4, %v1250_v46 }
 0xcc2   :  { %2911 = vmatpush3.msra.mxu0 %v3341_v44  ;;  %2918 = vmatprep.mubr.msk.f32.mxu0 %vm3088_vm1, %v3087_v34 }
 0xcc3   :  { %2912 = vmatprep.subr.mxu0 %v3087_v34 }
 0xcc4   :  { %2913 = vmatpush3.msra.mxu0 %v3350_v50 }
 0xcc5   :  { %2914 = vmatprep.subr.mxu0 %v3087_v34 }
 0xcc6   :  { %2915 = vmatpush3.msra.mxu0 %v3355_v54 }
 0xcc7   :  { %2916 = vmatprep.subr.mxu0 %v3087_v34 }
 0xcc8   :  { %2917 = vmatpush3.msra.mxu0 %v3360_v59 }
 0xd81   :  { %v1319_v47 = vpop.f32.mrf.mxu0 }
 0xd82   :  { %v1320_v36 = vadd.f32 %v1319_v47, %v3428_v16 }
 0xd83   :  { %v2898_v48 = vpop.f32.mrf.mxu0 }
 0xd84   :  { %1331 = vrot.lane.b32.xlu1 %v1320_v36, %s3089_s28  ;;  %v1352_v52 = vrot.slane %v1320_v36, 2  ;;  %v1323_v53 = vadd.f32 %v1320_v36, %v3448_v28 }
 0xd86   :  { %1361 = vrot.lane.b32.xlu0 %v1352_v52, %s3089_s28  ;;  %v1354_v55 = vadd.f32 %v1352_v52, %v3451_v30  ;;  %v2643_v56 = vmul.f32 -1.442695, %v1323_v53 }
 0xd88   :  { %v2644_v57 = vmul.f32 -1.442695, %v1354_v55  ;;  %3009 = vpow2.f32 %v2643_v56 }
 0xd8a   :  { %3011 = vpow2.f32 %v2644_v57 }
 0xd95   :  { %v3010_v58 = vpop.eup %3009 }
 0xd96   :  { %v1327_v62 = vadd.f32 1.0, %v3010_v58 }
 0xd97   :  { %v3012_v61 = vpop.eup %3011 }
 0xd98   :  { %v1358_v63 = vadd.f32 1.0, %v3012_v61  ;;  %3013 = vrcp.f32 %v1327_v62 }
 0xd9a   :  { %3015 = vrcp.f32 %v1358_v63 }
 0xda5   :  { %v3014_v1 = vpop.eup %3013 }
 0xda6   :  { %v1341_v22 = vsub.f32 1.0, %v3014_v1 }
 0xda7   :  { %v3016_v5 = vpop.eup %3015 }
 0xda8   :  { %v1371_v15 = vsub.f32 1.0, %v3016_v5 }
 0xdf6   :  { %v1332_v2 = vpop.permute.xlu1 %1331 }
 0xdf7   :  { %v1334_v4 = vmul.f32 %v3014_v1, %v1332_v2 }
 0xdf8   :  { %v1362_v7 = vpop.permute.xlu0 %1361 }
 0xdf9   :  { %v1364_v40 = vmul.f32 %v3016_v5, %v1362_v7  ;;  %1336 = vrot.lane.b32.xlu1 %v1334_v4, %s3086_s11 }
 0xdfb   :  { %1366 = vrot.lane.b32.xlu0 %v1364_v40, %s3086_s11 }
 0xdfd   :  { %1377 = vrot.lane.b32.xlu1 %v1248_v45, %s3092_s4 }
 0xe01   :  { %1347 = vrot.lane.b32.xlu1 %v1250_v46, %s3093_s5 }
 0xe6b   :  { %v1337_v8 = vpop.permute.xlu1 %1336 }
 0xe6c   :  { %v1339_v11 = vadd.f32 %v1337_v8, %v3448_v28 }
 0xe6d   :  { %v1367_v9 = vpop.permute.xlu0 %1366 }
 0xe6e   :  { %v1369_v10 = vadd.f32 %v1367_v9, %v3451_v30 }
 0xe6f   :  { %v1378_v14 = vpop.permute.xlu1 %1377 }
 0xe70   :  { %3017 = vtanh.f32 %v1369_v10  ;;  %v1380_v18 = vmul.f32 %v3016_v5, %v1378_v14 }
 0xe71   :  { %3019 = vtanh.f32 %v1339_v11 }
 0xe73   :  { %v1348_v20 = vpop.permute.xlu1 %1347 }
 0xe74   :  { %v1350_v24 = vmul.f32 %v3014_v1, %v1348_v20 }
 0xe7d   :  { %v3018_v12 = vpop.eup %3017 }
 0xe7e   :  { %1373 = vrot.lane.b32.xlu0 %v3018_v12, %s3090_s29  ;;  %v3020_v13 = vpop.eup %3019 }
 0xe82   :  { %1343 = vrot.lane.b32.xlu0 %v3020_v13, %s3090_s29 }
 0xef0   :  { %v1374_v17 = vpop.permute.xlu0 %1373 }
 0xef1   :  { %v1376_v19 = vmul.f32 %v1374_v17, %v1371_v15 }
 0xef3   :  { %v3592_v21 = vadd.f32 %v1380_v18, %v1376_v19 }
 0xef4   :  { %v1344_v23 = vpop.permute.xlu0 %1343 }
 0xef5   :  { %v1346_v26 = vmul.f32 %v1344_v23, %v1341_v22  ;;  %v1387_v27 = vrot.slane %v3592_v21, 6 }
 0xef7   :  { %v1351_v31 = vadd.f32 %v1350_v24, %v1346_v26  ;;  %1388 = vrot.lane.b32.xlu1 %v1387_v27, %s3091_s30 }
 0xef9   :  { %1383 = vrot.lane.b32.xlu0 %v1351_v31, %s3090_s29 }
 0xf69   :  { %v1389_v32 = vpop.permute.xlu1 %1388 }
 0xf6b   :  { %v3597_v33 = vpop.permute.xlu0 %1383 }
 0xf6c   :  { %v1391_v35 = vsel %vm811_vm2, %v3597_v33, %v1389_v32 }
 0xf6d   :  { %2908 = vmatmul.mubr.msk.f32.vlgmr.msra.gmra.mxu1 %vm554_vm4, %v1391_v35  ;;  %v1522_v62 = vrot.slane %v1391_v35, 4  ;;  %v1491_v63 = vrot.slane %v1391_v35, 6 }
 0xf6e   :  { %2922 = vmatpush3.msra.mxu1 %v3341_v44  ;;  %2929 = vmatprep.mubr.msk.f32.mxu1 %vm3088_vm1, %v3087_v34 }
 0xf6f   :  { %2923 = vmatprep.subr.mxu1 %v3087_v34 }
 0xf70   :  { %2924 = vmatpush3.msra.mxu1 %v3350_v50 }
 0xf71   :  { %2925 = vmatprep.subr.mxu1 %v3087_v34 }
 0xf72   :  { %2926 = vmatpush3.msra.mxu1 %v3355_v54 }
 0xf73   :  { %2927 = vmatprep.subr.mxu1 %v3087_v34 }
 0xf74   :  { %2928 = vmatpush3.msra.mxu1 %v3360_v59 }
0x102d   :  { %v1461_v37 = vpop.f32.mrf.mxu1 }
0x102e   :  { %v1462_v38 = vadd.f32 %v1461_v37, %v3428_v16 }
0x102f   :  { %v2909_v42 = vpop.f32.mrf.mxu1 }
0x1030   :  { %v1466_v44 = vrot.slane %v1462_v38, 6  ;;  %v1497_v45 = vrot.slane %v1462_v38, 4 }
0x1032   :  { %1506 = vrot.lane.b32.xlu0 %v1497_v45, %s3089_s28  ;;  %1475 = vrot.lane.b32.xlu1 %v1466_v44, %s3089_s28  ;;  %v1468_v50 = vadd.f32 %v1466_v44, %v3448_v28  ;;  %v1499_v46 = vadd.f32 %v1497_v45, %v3451_v30 }
0x1034   :  { %v2646_v47 = vmul.f32 -1.442695, %v1468_v50  ;;  %v2647_v54 = vmul.f32 -1.442695, %v1499_v46 }
0x1036   :  { %3021 = vpow2.f32 %v2646_v47 }
0x1037   :  { %3023 = vpow2.f32 %v2647_v54 }
0x1043   :  { %v3022_v36 = vpop.eup %3021 }
0x1044   :  { %v3024_v59 = vpop.eup %3023  ;;  %v1472_v48 = vadd.f32 1.0, %v3022_v36 }
0x1045   :  { %v1503_v52 = vadd.f32 1.0, %v3024_v59 }
0x1046   :  { %3025 = vrcp.f32 %v1472_v48 }
0x1047   :  { %3027 = vrcp.f32 %v1503_v52 }
0x1053   :  { %v3026_v53 = vpop.eup %3025 }
0x1054   :  { %v3028_v55 = vpop.eup %3027  ;;  %v1485_v15 = vsub.f32 1.0, %v3026_v53 }
0x1055   :  { %v1516_v9 = vsub.f32 1.0, %v3028_v55 }
0x10a4   :  { %v1507_v56 = vpop.permute.xlu0 %1506  ;;  %v1476_v57 = vpop.permute.xlu1 %1475 }
0x10a5   :  { %v1509_v58 = vmul.f32 %v3028_v55, %v1507_v56  ;;  %v1478_v61 = vmul.f32 %v3026_v53, %v1476_v57 }
0x10a7   :  { %1511 = vrot.lane.b32.xlu0 %v1509_v58, %s3086_s11  ;;  %1480 = vrot.lane.b32.xlu1 %v1478_v61, %s3086_s11 }
0x10ab   :  { %1523 = vrot.lane.b32.xlu1 %v1522_v62, %s3092_s4 }
0x10af   :  { %1492 = vrot.lane.b32.xlu1 %v1491_v63, %s3093_s5 }
0x1119   :  { %v1512_v1 = vpop.permute.xlu0 %1511  ;;  %v1481_v2 = vpop.permute.xlu1 %1480 }
0x111a   :  { %v1514_v4 = vadd.f32 %v1512_v1, %v3451_v30  ;;  %v1483_v5 = vadd.f32 %v1481_v2, %v3448_v28 }
0x111c   :  { %3029 = vtanh.f32 %v1514_v4 }
0x111d   :  { %3031 = vtanh.f32 %v1483_v5  ;;  %v1524_v8 = vpop.permute.xlu1 %1523 }
0x111e   :  { %v1526_v11 = vmul.f32 %v3028_v55, %v1524_v8 }
0x1121   :  { %v1493_v13 = vpop.permute.xlu1 %1492 }
0x1122   :  { %v1495_v18 = vmul.f32 %v3026_v53, %v1493_v13 }
0x1129   :  { %v3030_v7 = vpop.eup %3029 }
0x112a   :  { %1518 = vrot.lane.b32.xlu0 %v3030_v7, %s3090_s29  ;;  %v3032_v40 = vpop.eup %3031 }
0x112e   :  { %1487 = vrot.lane.b32.xlu0 %v3032_v40, %s3090_s29 }
0x119c   :  { %v1519_v10 = vpop.permute.xlu0 %1518 }
0x119d   :  { %v1521_v12 = vmul.f32 %v1519_v10, %v1516_v9 }
0x119f   :  { %v3624_v14 = vadd.f32 %v1526_v11, %v1521_v12 }
0x11a0   :  { %v1488_v17 = vpop.permute.xlu0 %1487 }
0x11a1   :  { %v1533_v19 = vrot.slane %v3624_v14, 2  ;;  %v1490_v20 = vmul.f32 %v1488_v17, %v1485_v15 }
0x11a3   :  { %v1496_v22 = vadd.f32 %v1495_v18, %v1490_v20  ;;  %1534 = vrot.lane.b32.xlu1 %v1533_v19, %s3091_s30 }
0x11a5   :  { %1529 = vrot.lane.b32.xlu0 %v1496_v22, %s3090_s29 }
0x1215   :  { %v1535_v23 = vpop.permute.xlu1 %1534 }
0x1217   :  { %v3629_v24 = vpop.permute.xlu0 %1529 }
0x1218   :  { %v1537_v26 = vsel %vm811_vm2, %v3629_v24, %v1535_v23 }
0x1219   :  { %v1539_v27 = vrot.slane %v1537_v26, 2  ;;  %v1638_v57 = vrot.slane %v1537_v26, 6 }
0x121b   :  { %2919 = vmatmul.mubr.msk.f32.vlgmr.msra.gmra.mxu0 %vm554_vm4, %v1539_v27 }
0x121c   :  { %2266 = vmatprep.mubr.f32.mxu0 %v3087_v34 }
0x12db   :  { %v1608_v31 = vpop.f32.mrf.mxu0 }
0x12dc   :  { %v1609_v32 = vadd.f32 %v1608_v31, %v3428_v16 }
0x12dd   :  { %v2920_v35 = vpop.f32.mrf.mxu0 }
0x12de   :  { %v1613_v37 = vrot.slane %v1609_v32, 4  ;;  %v1644_v38 = vrot.slane %v1609_v32, 6 }
0x12e0   :  { %1653 = vrot.lane.b32.xlu0 %v1644_v38, %s3089_s28  ;;  %1622 = vrot.lane.b32.xlu1 %v1613_v37, %s3089_s28  ;;  %v1615_v42 = vadd.f32 %v1613_v37, %v3448_v28  ;;  %v1646_v44 = vadd.f32 %v1644_v38, %v3451_v30 }
0x12e2   :  { %v2649_v45 = vmul.f32 -1.442695, %v1615_v42  ;;  %v2650_v50 = vmul.f32 -1.442695, %v1646_v44 }
0x12e4   :  { %3033 = vpow2.f32 %v2649_v45 }
0x12e5   :  { %3035 = vpow2.f32 %v2650_v50 }
0x12f1   :  { %v3034_v46 = vpop.eup %3033 }
0x12f2   :  { %v3036_v47 = vpop.eup %3035  ;;  %v1619_v54 = vadd.f32 1.0, %v3034_v46 }
0x12f3   :  { %v1650_v36 = vadd.f32 1.0, %v3036_v47 }
0x12f4   :  { %3037 = vrcp.f32 %v1619_v54 }
0x12f5   :  { %3039 = vrcp.f32 %v1650_v36 }
0x1301   :  { %v3038_v59 = vpop.eup %3037 }
0x1302   :  { %v3040_v48 = vpop.eup %3039  ;;  %v1632_v11 = vsub.f32 1.0, %v3038_v59 }
0x1303   :  { %v1663_v5 = vsub.f32 1.0, %v3040_v48 }
0x1352   :  { %v1654_v52 = vpop.permute.xlu0 %1653  ;;  %v1623_v53 = vpop.permute.xlu1 %1622 }
0x1353   :  { %v1656_v55 = vmul.f32 %v3040_v48, %v1654_v52  ;;  %v1625_v56 = vmul.f32 %v3038_v59, %v1623_v53 }
0x1355   :  { %1658 = vrot.lane.b32.xlu0 %v1656_v55, %s3086_s11  ;;  %1627 = vrot.lane.b32.xlu1 %v1625_v56, %s3086_s11 }
0x1359   :  { %1669 = vrot.lane.b32.xlu1 %v1537_v26, %s3092_s4 }
0x135d   :  { %1639 = vrot.lane.b32.xlu1 %v1638_v57, %s3093_s5 }
0x13c7   :  { %v1659_v58 = vpop.permute.xlu0 %1658  ;;  %v1628_v61 = vpop.permute.xlu1 %1627 }
0x13c8   :  { %v1661_v62 = vadd.f32 %v1659_v58, %v3451_v30  ;;  %v1630_v63 = vadd.f32 %v1628_v61, %v3448_v28  ;;  %v3081_v58 = vld [vmem:[%s3896_s2 + $0x68] sm:$0xff] }
0x13ca   :  { %3041 = vtanh.f32 %v1661_v62 }
0x13cb   :  { %3043 = vtanh.f32 %v1630_v63  ;;  %v1670_v4 = vpop.permute.xlu1 %1669 }
0x13cc   :  { %v1672_v40 = vmul.f32 %v3040_v48, %v1670_v4 }
0x13cf   :  { %v1640_v9 = vpop.permute.xlu1 %1639 }
0x13d0   :  { %v1642_v13 = vmul.f32 %v3038_v59, %v1640_v9  ;;  %v24_v9 = vld [vmem:[%s3896_s2 + $0x50] sm:$0xff] }
0x13d7   :  { %v3042_v1 = vpop.eup %3041 }
0x13d8   :  { %1665 = vrot.lane.b32.xlu0 %v3042_v1, %s3090_s29  ;;  %v3044_v2 = vpop.eup %3043 }
0x13dc   :  { %1634 = vrot.lane.b32.xlu0 %v3044_v2, %s3090_s29 }
0x144a   :  { %v1666_v7 = vpop.permute.xlu0 %1665 }
0x144b   :  { %v1668_v8 = vmul.f32 %v1666_v7, %v1663_v5 }
0x144d   :  { %v1673_v10 = vadd.f32 %v1672_v40, %v1668_v8  ;;  %v3082_v8 = vld [vmem:[%s3896_s2 + $0x48] sm:$0xff] }
0x144e   :  { %v1635_v12 = vpop.permute.xlu0 %1634 }
0x144f   :  { %v1679_v15 = vrot.slane %v1673_v10, 6  ;;  %v1637_v17 = vmul.f32 %v1635_v12, %v1632_v11  ;;  %v3083_v11 = vld [vmem:[%s3896_s2 + $0x28] sm:$0xff] }
0x1451   :  { %v1643_v18 = vadd.f32 %v1642_v13, %v1637_v17  ;;  %1680 = vrot.lane.b32.xlu1 %v1679_v15, %s3091_s30  ;;  %v23_v13 = vld [vmem:[%s3896_s2 + $0x30] sm:$0xff]  ;;  %v3713_v17 = vsub.s32 0, %v3382_v3 }
0x1452   :  { %v2604_v15 = vld [vmem:[%s3896_s2 + $0x168] ss:$8 sm:$0x3] }
0x1453   :  { %1675 = vrot.lane.b32.xlu0 %v1643_v18, %s3090_s29 }
0x14c3   :  { %v1681_v19 = vpop.permute.xlu1 %1680 }
0x14c5   :  { %v3650_v20 = vpop.permute.xlu0 %1675 }
0x14c6   :  { %v1683_v22 = vsel %vm811_vm2, %v3650_v20, %v1681_v19  ;;  %v3084_v19 = vld [vmem:[%s3896_s2 + $0x8] sm:$0xff] }
0x14c7   :  { %v1685_v23 = vrot.slane %v1683_v22, 4  ;;  %v1784_v52 = vrot.slane %v1683_v22, 6  ;;  %v2151_v22 = vrot.slane %v2604_v15, %v3713_v17 }
0x14c9   :  { %2930 = vmatmul.mubr.msk.f32.vlgmr.msra.gmra.mxu1 %vm554_vm4, %v1685_v23 }
0x1589   :  { %v1754_v26 = vpop.f32.mrf.mxu1 }
0x158a   :  { %v1755_v27 = vadd.f32 %v1754_v26, %v3428_v16  ;;  %v22_v26 = vld [vmem:[%s3896_s2 + $0x10] sm:$0xff] }
0x158b   :  { %v2931_v31 = vpop.f32.mrf.mxu1 }
0x158c   :  { %v1759_v32 = vrot.slane %v1755_v27, 2  ;;  %1797 = vrot.lane.b32.xlu1 %v1755_v27, %s3089_s28  ;;  %v1790_v35 = vadd.f32 %v1755_v27, %v3451_v30 }
0x158e   :  { %1768 = vrot.lane.b32.xlu0 %v1759_v32, %s3089_s28  ;;  %v1761_v37 = vadd.f32 %v1759_v32, %v3448_v28  ;;  %v2653_v38 = vmul.f32 -1.442695, %v1790_v35  ;;  %v42_v32 = vld [vmem:[%s3896_s2 + $0x161] ss:$0 sm:$0xff] }
0x1590   :  { %v2652_v42 = vmul.f32 -1.442695, %v1761_v37  ;;  %3045 = vpow2.f32 %v2653_v38  ;;  %v3732_v37 = vsel %vm2139_vm3, %v3440_v25, %v42_v32 }
0x1592   :  { %3047 = vpow2.f32 %v2652_v42 }
0x159d   :  { %v3046_v44 = vpop.eup %3045 }
0x159e   :  { %v1794_v50 = vadd.f32 1.0, %v3046_v44 }
0x159f   :  { %v3048_v45 = vpop.eup %3047 }
0x15a0   :  { %v1765_v46 = vadd.f32 1.0, %v3048_v45  ;;  %3049 = vrcp.f32 %v1794_v50  ;;  %v3095_v45 = vmov 1966171168  }
0x15a1   :  { %v1862_v25 = vunpack.c.l.s4 %v3095_v45 }
0x15a2   :  { %3051 = vrcp.f32 %v1765_v46 }
0x15a3   :  { %v1863_v50 = vunpack.c.0.s8 %v1862_v25 }
0x15ad   :  { %v3050_v16 = vpop.eup %3049 }
0x15af   :  { %v3052_v36 = vpop.eup %3051 }
0x15fe   :  { %v1798_v47 = vpop.permute.xlu1 %1797 }
0x15ff   :  { %v1800_v54 = vmul.f32 %v3050_v16, %v1798_v47 }
0x1600   :  { %v1769_v59 = vpop.permute.xlu0 %1768 }
0x1601   :  { %v1771_v48 = vmul.f32 %v3052_v36, %v1769_v59  ;;  %1802 = vrot.lane.b32.xlu1 %v1800_v54, %s3086_s11 }
0x1603   :  { %1773 = vrot.lane.b32.xlu0 %v1771_v48, %s3086_s11 }
0x1605   :  { %1785 = vrot.lane.b32.xlu1 %v1784_v52, %s3093_s5 }
0x1609   :  { %1813 = vrot.lane.b32.xlu1 %v1685_v23, %s3092_s4  ;;  %v2154_v23 = vsub.s32 1, %v3382_v3 }
0x160b   :  { %v2155_v35 = vrot.slane %v2604_v15, %v2154_v23 }
0x160d   :  { %1840 = vrot.lane.b32.xlu1 %v3592_v21, %s3091_s30 }
0x1611   :  { %1848 = vrot.lane.b32.xlu1 %v3527_v39, %s3091_s30 }
0x1615   :  { %1844 = vrot.lane.b32.xlu1 %v3560_v29, %s3091_s30  ;;  %v1778_v29 = vsub.f32 1.0, %v3052_v36 }
0x1619   :  { %2172 = vrot.lane.b32.xlu1 %v3081_v58, %s3094_s8 }
0x1673   :  { %v1803_v53 = vpop.permute.xlu1 %1802 }
0x1674   :  { %v1805_v57 = vadd.f32 %v1803_v53, %v3451_v30 }
0x1675   :  { %v1774_v55 = vpop.permute.xlu0 %1773 }
0x1676   :  { %v1776_v56 = vadd.f32 %v1774_v55, %v3448_v28  ;;  %v25_v28 = vld [vmem:[%s3896_s2 + $0x70] sm:$0xff] }
0x1677   :  { %v1786_v30 = vpop.permute.xlu1 %1785 }
0x1678   :  { %3053 = vtanh.f32 %v1776_v56  ;;  %v1788_v62 = vmul.f32 %v3052_v36, %v1786_v30 }
0x1679   :  { %3055 = vtanh.f32 %v1805_v57 }
0x167b   :  { %v1814_v1 = vpop.permute.xlu1 %1813 }
0x167c   :  { %v1816_v5 = vmul.f32 %v3050_v16, %v1814_v1 }
0x167f   :  { %v1841_v7 = vpop.permute.xlu1 %1840 }
0x1680   :  { %v1843_v46 = vsel %vm811_vm2, %v3565_v43, %v1841_v7 }
0x1681   :  { %v1935_v47 = vcombine.high %v1843_v46, %v1843_v46 }
0x1683   :  { %v1849_v12 = vpop.permute.xlu1 %1848 }
0x1684   :  { %v1851_v36 = vsel %vm811_vm2, %v3629_v24, %v1849_v12 }
0x1685   :  { %v3054_v21 = vpop.eup %3053 }
0x1686   :  { %1780 = vrot.lane.b32.xlu0 %v3054_v21, %s3090_s29  ;;  %v3056_v39 = vpop.eup %3055 }
0x1687   :  { %v1845_v27 = vpop.permute.xlu1 %1844 }
0x1688   :  { %v1847_v59 = vsel %vm811_vm2, %v3597_v33, %v1845_v27 }
0x168a   :  { %1809 = vrot.lane.b32.xlu0 %v3056_v39, %s3090_s29 }
0x168b   :  { %v2173_v38 = vpop.permute.xlu1 %2172 }
0x168e   :  { %1832 = vrot.lane.b32.xlu0 %v1673_v10, %s3091_s30 }
0x1692   :  { %1836 = vrot.lane.b32.xlu0 %v3624_v14, %s3091_s30  ;;  %v1807_v14 = vsub.f32 1.0, %v3050_v16  ;;  %v3745_v16 = vsub.s32 %v1863_v50, %v3382_v3 }
0x1694   :  { %v1942_v54 = vrot.slane %v1935_v47, %v3745_v16  ;;  %v1990_v53 = vrot.slane %v1851_v36, %v3745_v16  ;;  %v1967_v55 = vrot.slane %v1847_v59, %v3745_v16 }
0x1696   :  { %1856 = vrot.lane.b32.xlu0 %v3461_v0, %s3091_s30  ;;  %v1943_v52 = vcombine.high %v1942_v54, %v1942_v54  ;;  %v1950_v57 = vrot.slane %v1942_v54, %v3745_v16  ;;  %v1991_v21 = vcombine.high %v1990_v53, %v1990_v53  ;;  %v1998_v33 = vrot.slane %v1990_v53, %v3745_v16 }
0x1697   :  { %v1968_v39 = vcombine.high %v1967_v55, %v1967_v55 }
0x1698   :  { %v1957_v24 = vrot.slane %v1943_v52, %v3745_v16  ;;  %v1958_v30 = vcombine.high %v1950_v57, %v1950_v57  ;;  %v2006_v1 = vcombine.high %v1998_v33, %v1998_v33  ;;  %v2298_v52 = vadd.s32 128, %v3239_v41 }
0x169a   :  { %1852 = vrot.lane.b32.xlu0 %v3494_v49, %s3091_s30  ;;  %v2081_v7 = vrot.slane %v1958_v30, %v3713_v17  ;;  %v2101_v12 = vrot.slane %v2006_v1, %v3713_v17 }
0x169e   :  { %2174 = vrot.lane.b32.xlu0 %v25_v28, %s3094_s8 }
0x16f8   :  { %v1781_v61 = vpop.permute.xlu0 %1780 }
0x16f9   :  { %v1783_v63 = vmul.f32 %v1781_v61, %v1778_v29 }
0x16fb   :  { %v1789_v2 = vadd.f32 %v1788_v62, %v1783_v63  ;;  %v1959_v62 = vcombine.high %v1957_v24, %v1957_v24  ;;  %v2005_v63 = vrot.slane %v1991_v21, %v3745_v16 }
0x16fc   :  { %v1810_v4 = vpop.permute.xlu0 %1809 }
0x16fd   :  { %v1812_v0 = vmul.f32 %v1810_v4, %v1807_v14  ;;  %1819 = vrot.lane.b32.xlu1 %v1789_v2, %s3090_s29  ;;  %v1975_v14 = vrot.slane %v1967_v55, %v3745_v16  ;;  %v3771_v4 = vrot.slane %v1968_v39, %v3745_v16 }
0x16ff   :  { %v3690_v49 = vadd.f32 %v1816_v5, %v1812_v0 }
0x1700   :  { %v1833_v40 = vpop.permute.xlu0 %1832 }
0x1701   :  { %2168 = vrot.lane.b32.xlu1 %v3082_v8, %s3094_s8  ;;  %1828 = vrot.lane.b32.xlu0 %v3690_v49, %s3091_s30  ;;  %v1835_v48 = vsel %vm811_vm2, %v3499_v60, %v1833_v40 }
0x1702   :  { %v1892_v56 = vrot.slane %v1835_v48, %v3745_v16 }
0x1704   :  { %v1837_v10 = vpop.permute.xlu0 %1836  ;;  %v1893_v28 = vcombine.high %v1892_v56, %v1892_v56 }
0x1705   :  { %2164 = vrot.lane.b32.xlu1 %v3083_v11, %s3094_s8  ;;  %2170 = vrot.lane.b32.xlu0 %v24_v9, %s3094_s8  ;;  %v1839_v43 = vsel %vm811_vm2, %v3532_v51, %v1837_v10  ;;  %v1900_v51 = vrot.slane %v1892_v56, %v3745_v16  ;;  %v2085_v10 = vrot.slane %v1959_v62, %v3713_v17 }
0x1706   :  { %v1911_v58 = vcombine.high %v1839_v43, %v1839_v43  ;;  %v1907_v5 = vrot.slane %v1893_v28, %v3745_v16  ;;  %v2007_v11 = vcombine.high %v2005_v63, %v2005_v63 }
0x1707   :  { %v1908_v40 = vcombine.high %v1900_v51, %v1900_v51 }
0x1708   :  { %v1857_v18 = vpop.permute.xlu0 %1856  ;;  %v1918_v29 = vrot.slane %v1911_v58, %v3745_v16  ;;  %v1909_v27 = vcombine.high %v1907_v5, %v1907_v5 }
0x1709   :  { %2160 = vrot.lane.b32.xlu1 %v3084_v19, %s3094_s8  ;;  %2166 = vrot.lane.b32.xlu0 %v23_v13, %s3094_s8  ;;  %v2061_v32 = vrot.slane %v1908_v40, %v3713_v17 }
0x170a   :  { %v1919_v8 = vcombine.high %v1918_v29, %v1918_v29  ;;  %v1926_v23 = vrot.slane %v1918_v29, %v3745_v16  ;;  %v2065_v59 = vrot.slane %v1909_v27, %v3713_v17  ;;  %v2105_v29 = vrot.slane %v2007_v11, %v3713_v17 }
0x170c   :  { %v1853_v31 = vpop.permute.xlu0 %1852  ;;  %v2071_v47 = vrot.slane %v1926_v23, %v3713_v17 }
0x170d   :  { %2189 = vrot.lane.b32.xlu1 %v2151_v22, %s3094_s8  ;;  %2162 = vrot.lane.b32.xlu0 %v22_v26, %s3094_s8  ;;  %v1855_v60 = vsel %vm811_vm2, %v3650_v20, %v1853_v31  ;;  %v2095_v22 = vrot.slane %v3771_v4, %v3713_v17 }
0x170e   :  { %v2009_v61 = vcombine.high %v1855_v60, %v1855_v60 }
0x1710   :  { %v2175_v42 = vpop.permute.xlu0 %2174  ;;  %v2016_v9 = vrot.slane %v2009_v61, %v3745_v16 }
0x1711   :  { %2285 = vrot.lane.b32.xlu1 %v3732_v37, %s3086_s11  ;;  %2191 = vrot.lane.b32.xlu0 %v2155_v35, %s3094_s8  ;;  %v2180_v44 = vsel %vm2176_vm6, %v2173_v38, %v2175_v42  ;;  %v1933_v35 = vrot.slane %v1919_v8, %v3745_v16  ;;  %s3097_s11 = smov 4  }
0x1712   :  { %2226 = vmatprep.subr.mxu0 %v2175_v42  ;;  %v2017_v38 = vcombine.high %v2016_v9, %v2016_v9  ;;  %v3791_v42 = vmul.u32 32, %v3382_v3  ;;  %v2024_v54 = vrot.slane %v2016_v9, %v3745_v16 }
0x1713   :  { %2227 = vmatpush1.msra.mxu0 %v2180_v44  ;;  %v2075_v53 = vrot.slane %v1933_v35, %v3713_v17 }
0x1714   :  { %v2031_v43 = vrot.slane %v2017_v38, %v3745_v16  ;;  %v2302_v56 = vadd.s32 32, %v3791_v42  ;;  %v2111_v39 = vrot.slane %v2024_v54, %v3713_v17  ;;  %vm2301_vm11 = vcmp.ge.s32.totalorder %v2298_v52, %v3791_v42 }
0x1715   :  { %2291 = vrot.lane.b32.xlu1 %v3732_v37, %s3089_s28  ;;  %2288 = vrot.lane.b32.xlu0 %v3732_v37, %s3094_s8 }
0x1716   :  { %v2115_v62 = vrot.slane %v2031_v43, %v3713_v17  ;;  %vm2304_vm12 = vcmp.lt.s32.totalorder %v2298_v52, %v2302_v56  ;;  %vm2303_vm14 = vcmp.lt.s32.totalorder %v3239_v41, %v2302_v56 }
0x1717   :  { %vm2306_vm13 = vmand %vm2301_vm11, %vm2304_vm12 }
0x176f   :  { %v3767_v2 = vpop.permute.xlu1 %1819 }
0x1770   :  { %v1859_v20 = vsel %vm811_vm2, %v3767_v2, %v1857_v18  ;;  %v2091_v18 = vrot.slane %v1975_v14, %v3713_v17 }
0x1771   :  { %v2033_v0 = vcombine.high %v1859_v20, %v1859_v20 }
0x1773   :  { %v2040_v13 = vrot.slane %v2033_v0, %v3745_v16  ;;  %v2169_v15 = vpop.permute.xlu1 %2168  ;;  %v1829_v19 = vpop.permute.xlu0 %1828 }
0x1774   :  { %v1831_v26 = vsel %vm811_vm2, %v3466_v6, %v1829_v19 }
0x1775   :  { %v1867_v31 = vrot.slane %v1831_v26, %v3745_v16  ;;  %v2041_v44 = vcombine.high %v2040_v13, %v2040_v13  ;;  %v2048_v45 = vrot.slane %v2040_v13, %v3745_v16 }
0x1777   :  { %v1868_v25 = vcombine.high %v1867_v31, %v1867_v31  ;;  %v1875_v50 = vrot.slane %v1867_v31, %v3745_v16  ;;  %v2165_v6 = vpop.permute.xlu1 %2164  ;;  %v2171_v46 = vpop.permute.xlu0 %2170  ;;  %v2055_v57 = vrot.slane %v2041_v44, %v3745_v16  ;;  %v2056_v58 = vcombine.high %v2048_v45, %v2048_v45 }
0x1778   :  { %v2179_v36 = vsel %vm2176_vm6, %v2169_v15, %v2171_v46  ;;  %2228 = vmatprep.subr.mxu0 %v2171_v46 }
0x1779   :  { %v1882_v3 = vrot.slane %v1868_v25, %v3745_v16  ;;  %v2129_v48 = vsel %vm2128_vm7, %v1875_v50, %v2061_v32  ;;  %2229 = vmatpush1.msra.mxu0 %v2179_v36  ;;  %v2057_v14 = vcombine.high %v2055_v57, %v2055_v57  ;;  %v2121_v4 = vrot.slane %v2056_v58, %v3713_v17 }
0x177a   :  { %v2131_v55 = vsel %vm286_vm0, %v2129_v48, %v2071_v47 }
0x177b   :  { %v2130_v24 = vsel %vm2128_vm7, %v1882_v3, %v2065_v59  ;;  %v2134_v21 = vsel %vm2133_vm8, %v2131_v55, %v2081_v7  ;;  %v2161_v33 = vpop.permute.xlu1 %2160  ;;  %v2167_v60 = vpop.permute.xlu0 %2166  ;;  %v2125_v11 = vrot.slane %v2057_v14, %v3713_v17 }
0x177c   :  { %v2132_v28 = vsel %vm286_vm0, %v2130_v24, %v2075_v53  ;;  %v2178_v30 = vsel %vm2176_vm6, %v2165_v6, %v2167_v60  ;;  %2230 = vmatprep.subr.mxu0 %v2167_v60  ;;  %v2137_v51 = vsel %vm2136_vm9, %v2134_v21, %v2091_v18 }
0x177d   :  { %2231 = vmatpush1.msra.mxu0 %v2178_v30  ;;  %v2140_v16 = vsel %vm2139_vm3, %v2137_v51, %v2101_v12  ;;  %v2135_v61 = vsel %vm2133_vm8, %v2132_v28, %v2085_v10  ;;  %vm2596_vm8 = vcmask 334848  }
0x177e   :  { %v2142_v63 = vsel %vm470_vm5, %v2140_v16, %v2111_v39  ;;  %v2138_v1 = vsel %vm2136_vm9, %v2135_v61, %v2095_v22 }
0x177f   :  { %v2190_v20 = vpop.permute.xlu1 %2189  ;;  %v2163_v5 = vpop.permute.xlu0 %2162  ;;  %v2141_v0 = vsel %vm2139_vm3, %v2138_v1, %v2105_v29  ;;  %v3825_v8 = vsel %vm2144_vm10, %v2142_v63, %v2121_v4 }
0x1780   :  { %v2177_v7 = vsel %vm2176_vm6, %v2161_v33, %v2163_v5  ;;  %2232 = vmatprep.subr.mxu0 %v2163_v5  ;;  %v2143_v40 = vsel %vm470_vm5, %v2141_v0, %v2115_v62  ;;  %vm2300_vm5 = vcmp.ge.s32.totalorder %v3239_v41, %v3791_v42  ;;  %v3096_v41 = vmov 5  }
0x1781   :  { %2233 = vmatpush1.msra.mxu0 %v2177_v7  ;;  %v3838_v15 = vsel %vm2144_vm10, %v2143_v40, %v2125_v11  ;;  %vm2305_vm3 = vmand %vm2300_vm5, %vm2303_vm14  ;;  %2959 = vset.pattern.permute.xlu0 %v3096_v41 }
0x1782   :  { %2654 = vmatmul.mubr.msk.f32.vlgmr.msra.gmra.mxu0 %vm554_vm4, %v3825_v8  ;;  %2932 = vmatprep.subr.mxu0 %v3087_v34 }
0x1783   :  { %v2286_v9 = vpop.permute.xlu1 %2285  ;;  %v2192_v10 = vpop.permute.xlu0 %2191  ;;  %2272 = vmatprep.mubr.f32.mxu0 %v3087_v34  ;;  %2960 = vset.pattern.permute.xlu1 %v3096_v41 }
0x1784   :  { %v2294_v12 = vsel %vm554_vm4, %v3732_v37, %v2286_v9  ;;  %v2193_v22 = vsel %vm2176_vm6, %v2190_v20, %v2192_v10 }
0x1785   :  { %v2308_v13 = vsel %vm2306_vm13, %v2294_v12, 0.0 }
0x1786   :  { %2655 = vmatmul.mubr.msk.f32.gmra.mxu0 %vm554_vm4, %v3838_v15  ;;  %2656 = vmatprep.subr.msk.mxu1 %vm2176_vm6, %v2308_v13 }
0x1787   :  { %v2292_v19 = vpop.permute.xlu1 %2291  ;;  %v2289_v17 = vpop.permute.xlu0 %2288  ;;  %2940 = vmatprep.mubr.msk.f32.mxu0 %vm3088_vm1, %v3087_v34  ;;  %vm2394_vm1 = vcmask 39936  }
0x1788   :  { %v2295_v37 = vsel %vm2176_vm6, %v2294_v12, %v2289_v17 }
0x1789   :  { %v2297_v18 = vsel %vm2296_vm15, %v2295_v37, %v2292_v19 }
0x178a   :  { %2657 = vmatpush1.xpose.msk.msra.mxu1 %vm2305_vm3, %v2297_v18 }
0x1842   :  { %v2268_v23 = vpop.f32.mrf.mxu0 }
0x1843   :  { %v2269_v26 = vadd.f32 %v2268_v23, %v2193_v22 }
0x1844   :  { %v2270_v27 = vpop.f32.mrf.mxu0 }
0x1845   :  { %v2271_v31 = vadd.f32 %v2270_v27, %v2192_v10 }
0x1846   :  { %v2274_v32 = vpop.f32.mrf.mxu0 }
0x1847   :  { %3057 = vtanh.f32 %v2271_v31  ;;  %v2275_v35 = vadd.f32 %v2274_v32, %v2193_v22 }
0x1848   :  { %3059 = vtanh.f32 %v2269_v26  ;;  %v2276_v38 = vpop.f32.mrf.mxu0 }
0x1849   :  { %v2277_v42 = vadd.f32 %v2276_v38, %v2192_v10 }
0x184b   :  { %3061 = vtanh.f32 %v2277_v42 }
0x184c   :  { %3063 = vtanh.f32 %v2275_v35 }
0x1854   :  { %v3058_v44 = vpop.eup %3057 }
0x1855   :  { %v3060_v45 = vpop.eup %3059  ;;  %2658 = vmatprep.mubr.msk.f32.mxu1 %vm2176_vm6, %v3058_v44 }
0x1856   :  { %2383 = vmatmul.mubr.f32.vlgmr.msra.gmra.mxu1 %v3060_v45 }
0x1858   :  { %v3062_v25 = vpop.eup %3061 }
0x1859   :  { %v3064_v50 = vpop.eup %3063  ;;  %2659 = vmatprep.mubr.msk.f32.mxu1 %vm2176_vm6, %v3062_v25  ;;  %vm2594_vm6 = vcmask 72704  }
0x185a   :  { %2388 = vmatmul.mubr.f32.gmra.mxu1 %v3064_v50 }
0x1916   :  { %v2384_v6 = vpop.f32.mrf.mxu1 }
0x1917   :  { %2416 = vperm.xlu0 %2959, %v2384_v6   ;;  %v2393_v36 = vmul.f32 0.17677669, %v2384_v6 }
0x1918   :  { %v2386_v46 = vpop.f32.mrf.mxu1 }
0x1919   :  { %v2395_v59 = vsel %vm2394_vm1, %v2393_v36, -inf }
0x191a   :  { %v2389_v47 = vpop.f32.mrf.mxu1  ;;  %v2396_v48 = vrot.slane %v2395_v59, 4 }
0x191b   :  { %2473 = vperm.xlu1 %2960, %v2389_v47   ;;  %v2451_v3 = vmul.f32 0.17677669, %v2389_v47 }
0x191c   :  { %v2391_v54 = vpop.f32.mrf.mxu1  ;;  %v2397_v53 = vmax.f32 %v2395_v59, %v2396_v48 }
0x191d   :  { %v2452_v52 = vsel %vm2394_vm1, %v2451_v3, -inf }
0x191e   :  { %v2453_v43 = vrot.slane %v2452_v52, 4  ;;  %v2398_v55 = vrot.slane %v2397_v53, 2 }
0x1920   :  { %v2454_v56 = vmax.f32 %v2452_v52, %v2453_v43  ;;  %v2399_v57 = vmax.f32 %v2397_v53, %v2398_v55 }
0x1922   :  { %v2455_v58 = vrot.slane %v2454_v56, 2  ;;  %v2400_v24 = vrot.slane %v2399_v57, 1 }
0x1924   :  { %v2456_v21 = vmax.f32 %v2454_v56, %v2455_v58  ;;  %v2401_v33 = vmax.f32 %v2399_v57, %v2400_v24 }
0x1926   :  { %v2457_v60 = vrot.slane %v2456_v21, 1  ;;  %v2402_v39 = vsub.f32 %v2393_v36, %v2401_v33 }
0x1928   :  { %v2458_v28 = vmax.f32 %v2456_v21, %v2457_v60  ;;  %v2403_v30 = vmul.f32 1.442695, %v2402_v39 }
0x192a   :  { %v2459_v51 = vsub.f32 %v2451_v3, %v2458_v28  ;;  %3065 = vpow2.f32 %v2403_v30 }
0x192c   :  { %v2460_v29 = vmul.f32 1.442695, %v2459_v51 }
0x192e   :  { %3067 = vpow2.f32 %v2460_v29 }
0x1937   :  { %v3066_v16 = vpop.eup %3065 }
0x1938   :  { %v2405_v61 = vsel %vm2394_vm1, %v3066_v16, 0.0 }
0x1939   :  { %v2406_v63 = vrot.slane %v2405_v61, 4 }
0x193b   :  { %v3068_v62 = vpop.eup %3067  ;;  %v2407_v14 = vadd.f32 %v2406_v63, %v2405_v61  ;;  %v1823_v63 = vrot.slane %v3690_v49, 2  ;;  %v27_v49 = vld [vmem:[%s3896_s2 + $0x38] sm:$0xff] }
0x193c   :  { %v2462_v1 = vsel %vm2394_vm1, %v3068_v62, 0.0 }
0x193d   :  { %v2463_v4 = vrot.slane %v2462_v1, 4  ;;  %v2408_v5 = vrot.slane %v2407_v14, 2 }
0x193f   :  { %v2464_v20 = vadd.f32 %v2463_v4, %v2462_v1  ;;  %v2409_v0 = vadd.f32 %v2408_v5, %v2407_v14  ;;  %v29_v14 = vld [vmem:[%s3896_s2 + $0x78] sm:$0xff] }
0x1940   :  { %2933 = vmatpush3.msra.mxu0 %v29_v14  ;;  %v28_v4 = vld [vmem:[%s3896_s2 + $0x58] sm:$0xff] }
0x1941   :  { %v2465_v7 = vrot.slane %v2464_v20, 2  ;;  %v2410_v40 = vrot.slane %v2409_v0, 1  ;;  %2934 = vmatprep.subr.mxu0 %v3087_v34 }
0x1942   :  { %2935 = vmatpush3.msra.mxu0 %v28_v4 }
0x1943   :  { %v2466_v9 = vadd.f32 %v2465_v7, %v2464_v20  ;;  %v2411_v10 = vadd.f32 %v2410_v40, %v2409_v0  ;;  %2936 = vmatprep.subr.mxu0 %v3087_v34  ;;  %v26_v20 = vld [vmem:[%s3896_s2 + $0x18] sm:$0xff] }
0x1944   :  { %2937 = vmatpush3.msra.mxu0 %v27_v49 }
0x1945   :  { %v2467_v11 = vrot.slane %v2466_v9, 1  ;;  %3069 = vrcp.f32 %v2411_v10  ;;  %2938 = vmatprep.subr.mxu0 %v3087_v34 }
0x1946   :  { %2939 = vmatpush3.msra.mxu0 %v26_v20 }
0x1947   :  { %v2468_v12 = vadd.f32 %v2467_v11, %v2466_v9 }
0x1949   :  { %3071 = vrcp.f32 %v2468_v12 }
0x1952   :  { %v3070_v13 = vpop.eup %3069 }
0x1953   :  { %v2413_v19 = vmul.f32 %v3070_v13, %v3066_v16 }
0x1956   :  { %v3072_v17 = vpop.eup %3071 }
0x1957   :  { %v2470_v22 = vmul.f32 %v3072_v17, %v3068_v62 }
0x1992   :  { %v2417_v37 = vpop.permute.xlu0 %2416 }
0x1993   :  { %v2419_v18 = vmul.f32 %v2417_v37, %v2413_v19 }
0x1995   :  { %v2420_v41 = vsel %vm2394_vm1, %v2419_v18, 0.0 }
0x1996   :  { %v2421_v23 = vrot.slane %v2420_v41, 4  ;;  %v2474_v26 = vpop.permute.xlu1 %2473 }
0x1997   :  { %v2476_v27 = vmul.f32 %v2474_v26, %v2470_v22 }
0x1998   :  { %v2422_v31 = vadd.f32 %v2421_v23, %v2420_v41 }
0x1999   :  { %v2477_v32 = vsel %vm2394_vm1, %v2476_v27, 0.0 }
0x199a   :  { %v2423_v35 = vrot.slane %v2422_v31, 2  ;;  %v2478_v38 = vrot.slane %v2477_v32, 4 }
0x199c   :  { %v2424_v42 = vadd.f32 %v2423_v35, %v2422_v31  ;;  %v2479_v44 = vadd.f32 %v2478_v38, %v2477_v32 }
0x199e   :  { %v2480_v45 = vrot.slane %v2479_v44, 2  ;;  %v2425_v25 = vrot.slane %v2424_v42, 1 }
0x19a0   :  { %v2481_v50 = vadd.f32 %v2480_v45, %v2479_v44  ;;  %v2426_v6 = vadd.f32 %v2425_v25, %v2424_v42 }
0x19a2   :  { %v2427_v46 = vmul.f32 0.35355338, %v2426_v6  ;;  %v2482_v47 = vrot.slane %v2481_v50, 1 }
0x19a4   :  { %v2428_v54 = vsel %vm2394_vm1, %v2427_v46, -inf  ;;  %v2483_v36 = vadd.f32 %v2482_v47, %v2481_v50 }
0x19a5   :  { %2429 = vmax.xlane.f32.xlu1 %v2428_v54 }
0x19a6   :  { %v2484_v59 = vmul.f32 0.35355338, %v2483_v36 }
0x19a8   :  { %v2485_v3 = vsel %vm2394_vm1, %v2484_v59, -inf }
0x19a9   :  { %2486 = vmax.xlane.f32.xlu0 %v2485_v3 }
0x1a2e   :  { %v2430_v48 = vpop.xlane.xlu1 %2429 }
0x1a2f   :  { %v2431_v52 = vsub.f32 %v2427_v46, %v2430_v48 }
0x1a31   :  { %v2432_v53 = vmul.f32 1.442695, %v2431_v52 }
0x1a32   :  { %v2487_v43 = vpop.xlane.xlu0 %2486 }
0x1a33   :  { %3073 = vpow2.f32 %v2432_v53  ;;  %v2488_v55 = vsub.f32 %v2484_v59, %v2487_v43 }
0x1a35   :  { %v2489_v56 = vmul.f32 1.442695, %v2488_v55 }
0x1a37   :  { %3075 = vpow2.f32 %v2489_v56 }
0x1a40   :  { %v3074_v57 = vpop.eup %3073 }
0x1a41   :  { %v2434_v58 = vsel %vm2394_vm1, %v3074_v57, 0.0 }
0x1a42   :  { %2435 = vadd.xlane.f32.xlu0 %v2434_v58 }
0x1a44   :  { %v3076_v24 = vpop.eup %3075 }
0x1a45   :  { %v2491_v21 = vsel %vm2394_vm1, %v3076_v24, 0.0 }
0x1a46   :  { %2492 = vadd.xlane.f32.xlu1 %v2491_v21 }
0x1acb   :  { %v2436_v33 = vpop.xlane.xlu0 %2435 }
0x1acc   :  { %3077 = vrcp.f32 %v2436_v33 }
0x1acf   :  { %v2493_v60 = vpop.xlane.xlu1 %2492 }
0x1ad0   :  { %3079 = vrcp.f32 %v2493_v60 }
0x1ad9   :  { %v3078_v39 = vpop.eup %3077 }
0x1ada   :  { %v2438_v28 = vmul.f32 %v3078_v39, %v3074_v57 }
0x1adc   :  { %v2439_v30 = vmul.f32 %v2438_v28, %v2413_v19 }
0x1add   :  { %v3080_v51 = vpop.eup %3079 }
0x1ade   :  { %v2440_v29 = vsel %vm2394_vm1, %v2439_v30, 0.0  ;;  %v2495_v16 = vmul.f32 %v3080_v51, %v3076_v24 }
0x1adf   :  { %2441 = vadd.xlane.f32.xlu0 %v2440_v29 }
0x1ae0   :  { %v2496_v61 = vmul.f32 %v2495_v16, %v2470_v22  ;;  %v2509_v1 = vsel %vm2128_vm7, %v2438_v28, %v2495_v16 }
0x1ae2   :  { %v2497_v62 = vsel %vm2394_vm1, %v2496_v61, 0.0 }
0x1ae3   :  { %2498 = vadd.xlane.f32.xlu1 %v2497_v62 }
0x1af4   :  { %2584 = vrot.lane.b32.xlu1 %v2509_v1, %s3097_s11 }
0x1af5   :  { %1824 = vrot.lane.b32.xlu0 %v1823_v63, %s3091_s30 }
0x1b68   :  { %v2442_v5 = vpop.xlane.xlu0 %2441 }
0x1b69   :  { %v2443_v0 = vmul.f32 %v2442_v5, %v3825_v8 }
0x1b6b   :  { %v2444_v7 = vsel %vm554_vm4, %v2443_v0, 0.0 }
0x1b6c   :  { %v2445_v40 = vrot.slane %v2444_v7, 4  ;;  %v2499_v9 = vpop.xlane.xlu1 %2498  ;;  %v1825_v10 = vpop.permute.xlu0 %1824 }
0x1b6d   :  { %v2500_v11 = vmul.f32 %v2499_v9, %v3838_v15  ;;  %v1827_v12 = vsel %vm811_vm2, %v3767_v2, %v1825_v10  ;;  %v41_v2 = vld [vmem:[%s3896_s2 + $0x178] ss:$0 sm:$0xff]  ;;  %vm2592_vm2 = vcmask 31744  }
0x1b6e   :  { %v2446_v13 = vadd.f32 %v2445_v40, %v2444_v7  ;;  %v2588_v19 = vrot.slane %v1827_v12, 6 }
0x1b6f   :  { %v2501_v17 = vsel %vm554_vm4, %v2500_v11, 0.0 }
0x1b70   :  { %v2447_v37 = vrot.slane %v2446_v13, 2  ;;  %v2502_v34 = vrot.slane %v2501_v17, 4  ;;  %2589 = vrot.lane.b32.xlu1 %v2588_v19, %s3098_s7  ;;  %v2585_v32 = vpop.permute.xlu1 %2584 }
0x1b72   :  { %v2448_v18 = vadd.f32 %v2447_v37, %v2446_v13  ;;  %v2503_v8 = vadd.f32 %v2502_v34, %v2501_v17 }
0x1b74   :  { %v2504_v41 = vrot.slane %v2503_v8, 2  ;;  %v2449_v22 = vrot.slane %v2448_v18, 1 }
0x1b76   :  { %v2505_v23 = vadd.f32 %v2504_v41, %v2503_v8  ;;  %v2450_v27 = vadd.f32 %v2449_v22, %v2448_v18 }
0x1b78   :  { %v2506_v26 = vrot.slane %v2505_v23, 1 }
0x1b7a   :  { %v2507_v31 = vadd.f32 %v2506_v26, %v2505_v23 }
0x1b7c   :  { %v2508_v15 = vsel %vm2128_vm7, %v2450_v27, %v2507_v31 }
0x1b7d   :  { %2941 = vmatmul.mubr.msk.f32.vlgmr.msra.gmra.mxu0 %vm554_vm4, %v2508_v15 }
0x1be2   :  { %v2590_v44 = vpop.permute.xlu1 %2589 }
0x1c3d   :  { %v2579_v35 = vpop.f32.mrf.mxu0 }
0x1c3e   :  { %v2580_v38 = vadd.f32 %v2579_v35, %v41_v2 }
0x1c3f   :  { %v2942_v42 = vpop.f32.mrf.mxu0 }
0x1c40   :  { %v2593_v45 = vsel %vm2592_vm2, %v2580_v38, %v2585_v32 }
0x1c41   :  { %v2595_v25 = vsel %vm2594_vm6, %v2593_v45, %v2590_v44 }
0x1c42   :  { %v2597_v50 = vsel %vm2596_vm8, %v2595_v25, 0.0 }
0x1c43   :  { %v2598_v6 = vsel %vm286_vm0, %v2597_v50, 0.0 }
0x1c44   :  { %2599 = vst [vmem:[%s3897_s3] sm:$0xff] %v2598_v6 }

</bundles_post_ra>
